<compile_context>
chip_gen: v7x
topology: tpu7x:2x2x1
jax: 0.10.0
libtpu: 0.0.40
codegen_flags: <defaults>
</compile_context>

<pallas_src>
import functools

import jax
import jax.numpy as jnp
from jax.experimental import pallas as pl
from jax.experimental.pallas import tpu as pltpu

_NEG_BIG = -1.0e30   # plain Python float: never captured as a device constant


# ----------------------------------------------------------------------------
# small helpers
# ----------------------------------------------------------------------------
def _round_up(x, m):
    return ((x + m - 1) // m) * m


def _pad2(x, rows, cols):
    return jnp.pad(x, ((0, rows - x.shape[0]), (0, cols - x.shape[1])))


def _tile_for(dim, pref):
    """Largest tile <= pref that divides dim (dim is a multiple of 128 when > pref)."""
    if dim <= pref:
        return dim
    t = pref
    while dim % t:
        t -= 128
    return t


def _graph_neg_mask(batch, num_graphs, g_pad, n_rows):
    """(n_rows, g_pad) additive mask: 0 where node belongs to graph g, -1e30 otherwise."""
    sel = batch[:, None] == jnp.arange(num_graphs, dtype=batch.dtype)[None, :]
    neg = jnp.where(sel, 0.0, _NEG_BIG).astype(jnp.float32)
    return jnp.pad(neg, ((0, n_rows - neg.shape[0]), (0, g_pad - num_graphs)),
                   constant_values=_NEG_BIG)


def _vmem_capacity_bytes():
    try:
        return int(pltpu.get_tpu_info().vmem_capacity_bytes)
    except Exception:
        return 64 << 20          # conservative (v7x per-TC) fallback


def _fused_vmem_bytes(n, fp, odp, g_pad):
    """Conservative VMEM footprint of the fused per-branch kernel (grid=(2,))."""
    bf, f32 = 2, 4
    per_branch_in = (n * n * bf + n * fp * bf + 2 * fp * fp * bf + fp * odp * bf
                     + n * g_pad * f32 + 2 * fp * f32 + odp * f32)
    out_bytes = g_pad * odp * f32
    # xw1/g1/h/hw2/g2/pool-temp in f32 + bf16 copies of xw1/h/hw2 + pooled scratch
    intermediates = 6 * n * fp * f32 + 3 * n * fp * bf + 2 * g_pad * fp * f32
    total = 2 * (per_branch_in + out_bytes) + intermediates     # 2x: input double-buffer
    return int(total * 1.3)                                     # compiler-scratch margin


# ----------------------------------------------------------------------------
# Fused per-branch kernel: gcn1 -> relu -> residual -> gcn2 -> gmp -> fc1 -> relu
# Grid axis 0 = branch (wild / mutant), marked "parallel" (v7x megacore).
# ----------------------------------------------------------------------------
def _branch_kernel(a_ref, x_ref, w1_ref, b1_ref, w2_ref, b2_ref,
                   neg_ref, fcw_ref, fcb_ref, o_ref, pooled_ref, *, num_graphs):
    f32, bf16 = jnp.float32, jnp.bfloat16
    a = a_ref[...]                                      # (Np, Np) bf16
    x = x_ref[...]                                      # (Np, Fp) bf16

    # GCN1: relu(A_hat @ (X @ W1) + b1)   (dropout = identity in eval mode)
    xw1 = jnp.dot(x, w1_ref[...], preferred_element_type=f32).astype(bf16)
    g1 = jnp.dot(a, xw1, preferred_element_type=f32) + b1_ref[...]
    g1 = jnp.maximum(g1, 0.0)

    # residual: h = x + relu(gcn1)
    h = (x.astype(f32) + g1).astype(bf16)

    # GCN2: A_hat @ (H @ W2) + b2
    hw2 = jnp.dot(h, w2_ref[...], preferred_element_type=f32).astype(bf16)
    g2 = jnp.dot(a, hw2, preferred_element_type=f32) + b2_ref[...]

    # global max pool: additive mask (0 keep / -1e30 drop), one sublane-max per graph
    neg = neg_ref[...]                                  # (Np, g_pad) f32
    pooled_ref[...] = jnp.zeros(pooled_ref.shape, f32)
    for g in range(num_graphs):                         # num_graphs is static & small
        pooled_ref[g:g + 1, :] = jnp.max(g2 + neg[:, g:g + 1], axis=0, keepdims=True)

    # fc1 + ReLU
    fc = jnp.dot(pooled_ref[...].astype(bf16), fcw_ref[...],
                 preferred_element_type=f32) + fcb_ref[...]
    o_ref[...] = jnp.maximum(fc, 0.0)


def _branches_fused(params, wx, wa, wneg, mx, ma, mneg,
                    num_graphs, g_pad, n_pad, vmem_limit):
    f = wx.shape[1]
    fp = _round_up(f, 128)
    od = params["wild_fc1_w"].shape[1]
    odp = _round_up(od, 128)
    bf16 = jnp.bfloat16

    a = jnp.stack([_pad2(wa, n_pad, n_pad), _pad2(ma, n_pad, n_pad)]).astype(bf16)
    x = jnp.stack([_pad2(wx, n_pad, fp), _pad2(mx, n_pad, fp)]).astype(bf16)
    neg = jnp.stack([wneg, mneg])                                        # (2, Np, g_pad)
    w1 = jnp.stack([_pad2(params["wild_conv1_w"], fp, fp),
                    _pad2(params["mutant_conv1_w"], fp, fp)]).astype(bf16)
    b1 = jnp.stack([_pad2(params["wild_conv1_b"], 1, fp),
                    _pad2(params["mutant_conv1_b"], 1, fp)])
    w2 = jnp.stack([_pad2(params["wild_conv2_w"], fp, fp),
                    _pad2(params["mutant_conv2_w"], fp, fp)]).astype(bf16)
    b2 = jnp.stack([_pad2(params["wild_conv2_b"], 1, fp),
                    _pad2(params["mutant_conv2_b"], 1, fp)])
    fcw = jnp.stack([_pad2(params["wild_fc1_w"], fp, odp),
                     _pad2(params["mutant_fc1_w"], fp, odp)]).astype(bf16)
    fcb = jnp.stack([_pad2(params["wild_fc1_b"], 1, odp),
                     _pad2(params["mutant_fc1_b"], 1, odp)])

    out = pl.pallas_call(
        functools.partial(_branch_kernel, num_graphs=num_graphs),
        out_shape=jax.ShapeDtypeStruct((2, g_pad, odp), jnp.float32),
        grid=(2,),                                        # branch axis: wild / mutant
        in_specs=[
            pl.BlockSpec((None, n_pad, n_pad), lambda b: (b, 0, 0)),     # A_hat
            pl.BlockSpec((None, n_pad, fp), lambda b: (b, 0, 0)),        # X
            pl.BlockSpec((None, fp, fp), lambda b: (b, 0, 0)),           # W1
            pl.BlockSpec((None, 1, fp), lambda b: (b, 0, 0)),            # b1
            pl.BlockSpec((None, fp, fp), lambda b: (b, 0, 0)),           # W2
            pl.BlockSpec((None, 1, fp), lambda b: (b, 0, 0)),            # b2
            pl.BlockSpec((None, n_pad, g_pad), lambda b: (b, 0, 0)),     # additive mask
            pl.BlockSpec((None, fp, odp), lambda b: (b, 0, 0)),          # fc1 W
            pl.BlockSpec((None, 1, odp), lambda b: (b, 0, 0)),           # fc1 b
        ],
        out_specs=pl.BlockSpec((None, g_pad, odp), lambda b: (b, 0, 0)),
        scratch_shapes=[pltpu.VMEM((g_pad, fp), jnp.float32)],           # pooled rows
        compiler_params=pltpu.CompilerParams(
            dimension_semantics=("parallel",),            # v7x: one TC per branch
            vmem_limit_bytes=int(vmem_limit)),
    )(a, x, w1, b1, w2, b2, neg, fcw, fcb)
    return out[0, :, :od], out[1, :, :od]                # (g_pad, out_dim) each


# ----------------------------------------------------------------------------
# Tiled fallback kernels (graphs too large for the fused VMEM budget)
# ----------------------------------------------------------------------------
def _matmul_kernel(*refs, relu, has_residual):
    if has_residual:
        a_ref, b_ref, bias_ref, res_ref, o_ref, acc_ref = refs
    else:
        a_ref, b_ref, bias_ref, o_ref, acc_ref = refs

    @pl.when(pl.program_id(2) == 0)
    def _init():
        acc_ref[...] = jnp.zeros(acc_ref.shape, jnp.float32)

    acc_ref[...] += jnp.dot(a_ref[...], b_ref[...],
                            preferred_element_type=jnp.float32)

    # bias / ReLU / residual / store only on the last K step.
    @pl.when(pl.program_id(2) == pl.num_programs(2) - 1)
    def _finalize():
        out = acc_ref[...] + bias_ref[...]
        if relu:
            out = jnp.maximum(out, 0.0)
        if has_residual:
            out = out + res_ref[...].astype(jnp.float32)
        o_ref[...] = out.astype(o_ref.dtype)


def _matmul_padded(a, b, bias=None, *, relu=False, residual=None,
                   out_dtype=jnp.float32, tm_pref=256, tn_pref=512, tk_pref=512):
    """Matmul on already-padded operands; returns a padded result (no slicing)."""
    m, k = a.shape
    k2, n = b.shape
    assert k == k2
    tm, tn, tk = _tile_for(m, tm_pref), _tile_for(n, tn_pref), _tile_for(k, tk_pref)
    assert m % tm == 0 and n % tn == 0 and k % tk == 0

    if bias is None:
        bias = jnp.zeros((1, n), jnp.float32)
    has_res = residual is not None

    in_arrays = [a.astype(jnp.bfloat16), b.astype(jnp.bfloat16),
                 bias.astype(jnp.float32)]
    in_specs = [pl.BlockSpec((tm, tk), lambda i, j, kk: (i, kk)),
                pl.BlockSpec((tk, tn), lambda i, j, kk: (kk, j)),
                pl.BlockSpec((1, tn), lambda i, j, kk: (0, j))]
    if has_res:
        in_arrays.append(residual)
        in_specs.append(pl.BlockSpec((tm, tn), lambda i, j, kk: (i, j)))

    return pl.pallas_call(
        functools.partial(_matmul_kernel, relu=relu, has_residual=has_res),
        out_shape=jax.ShapeDtypeStruct((m, n), out_dtype),
        grid=(m // tm, n // tn, k // tk),
        in_specs=in_specs,
        out_specs=pl.BlockSpec((tm, tn), lambda i, j, kk: (i, j)),
        scratch_shapes=[pltpu.VMEM((tm, tn), jnp.float32)],
        compiler_params=pltpu.CompilerParams(
            dimension_semantics=("parallel", "parallel", "arbitrary")),
    )(*in_arrays)


def _gmp_kernel(neg_ref, x_ref, o_ref, acc_ref, *, num_graphs):
    kk = pl.program_id(0)

    @pl.when(kk == 0)
    def _init():
        acc_ref[...] = jnp.full(acc_ref.shape, _NEG_BIG, jnp.float32)

    x = x_ref[...].astype(jnp.float32)                    # (tk, Fp)
    neg = neg_ref[...]                                    # (tk, g_pad) additive
    for g in range(num_graphs):
        row = jnp.max(x + neg[:, g:g + 1], axis=0, keepdims=True)
        acc_ref[g:g + 1, :] = jnp.maximum(acc_ref[g:g + 1, :], row)

    @pl.when(kk == pl.num_programs(0) - 1)
    def _finalize():
        res = acc_ref[...]
        row_ids = jax.lax.broadcasted_iota(jnp.int32, res.shape, 0)
        o_ref[...] = jnp.where(row_ids < num_graphs, res, 0.0)


def _global_max_pool_padded(x, neg_mask, num_graphs, g_pad, tk_pref=512):
    np_, fp = x.shape
    tk = _tile_for(np_, tk_pref)
    return pl.pallas_call(
        functools.partial(_gmp_kernel, num_graphs=num_graphs),
        out_shape=jax.ShapeDtypeStruct((g_pad, fp), jnp.float32),
        grid=(np_ // tk,),
        in_specs=[pl.BlockSpec((tk, g_pad), lambda kk: (kk, 0)),
                  pl.BlockSpec((tk, fp), lambda kk: (kk, 0))],
        out_specs=pl.BlockSpec((g_pad, fp), lambda kk: (0, 0)),
        scratch_shapes=[pltpu.VMEM((g_pad, fp), jnp.float32)],
        compiler_params=pltpu.CompilerParams(dimension_semantics=("arbitrary",)),
    )(neg_mask, x)


def _branch_tiled(a_hat, x, w1, b1, w2, b2, batch, fcw, fcb, num_graphs, g_pad):
    bf16 = jnp.bfloat16
    n, f = x.shape
    od = fcw.shape[1]
    fp = _round_up(f, 128)
    odp = _round_up(od, 128)
    np_ = _round_up(n, 128)

    # pad once; every intermediate stays padded until the final slice
    a_p = _pad2(a_hat, np_, np_).astype(bf16)
    x_p = _pad2(x, np_, fp).astype(bf16)
    w1_p = _pad2(w1, fp, fp)
    w2_p = _pad2(w2, fp, fp)
    b1_p = _pad2(b1.reshape(1, -1), 1, fp)
    b2_p = _pad2(b2.reshape(1, -1), 1, fp)
    fcw_p = _pad2(fcw, fp, odp)
    fcb_p = _pad2(fcb.reshape(1, -1), 1, odp)
    neg = _graph_neg_mask(batch, num_graphs, g_pad, np_)

    xw1 = _matmul_padded(x_p, w1_p, out_dtype=bf16)                       # X @ W1
    # h = x + relu(A @ XW1 + b1): residual fused into the finalize epilogue
    h = _matmul_padded(a_p, xw1, bias=b1_p, relu=True, residual=x_p, out_dtype=bf16)
    hw2 = _matmul_padded(h, w2_p, out_dtype=bf16)                         # H @ W2
    g2 = _matmul_padded(a_p, hw2, bias=b2_p, out_dtype=bf16)              # A @ HW2 + b2
    pooled = _global_max_pool_padded(g2, neg, num_graphs, g_pad)          # (g_pad, Fp)
    out = _matmul_padded(pooled, fcw_p, bias=fcb_p, relu=True)            # relu(fc1)
    return out[:, :od]


# ----------------------------------------------------------------------------
# Fused MLP head: xc = cat((xt, x), 1) -> Linear/ReLU stack, one pallas_call.
# The concat is eliminated by splitting the first-layer weight into W_top/W_bot.
# ----------------------------------------------------------------------------
def _mlp_kernel(xt_ref, x_ref, *refs, n_layers):
    f32, bf16 = jnp.float32, jnp.bfloat16
    o_ref = refs[-1]
    wrefs = refs[:-1]

    h = (jnp.dot(xt_ref[...].astype(bf16), wrefs[0][...], preferred_element_type=f32)
         + jnp.dot(x_ref[...].astype(bf16), wrefs[1][...], preferred_element_type=f32)
         + wrefs[2][...])
    if n_layers > 1:
        h = jnp.maximum(h, 0.0)                           # ReLU (dropout = identity)
    idx = 3
    for i in range(1, n_layers):
        w = wrefs[idx][...]
        b = wrefs[idx + 1][...]
        idx += 2
        h = jnp.dot(h.astype(bf16), w, preferred_element_type=f32) + b
        if i < n_layers - 1:
            h = jnp.maximum(h, 0.0)
    o_ref[...] = h


def mlp_head(xt, x, mlp_params, num_graphs, n_output, out_dim):
    g_pad = xt.shape[0]
    n_layers = len(mlp_params)
    odp = _round_up(out_dim, 128)

    xt_p = _pad2(xt.astype(jnp.float32), g_pad, odp)
    x_p = _pad2(x.astype(jnp.float32), g_pad, odp)

    w0, b0 = mlp_params[0]
    assert w0.shape[0] == 2 * out_dim
    d0p = _round_up(w0.shape[1], 128)
    flat = [_pad2(w0[:out_dim], odp, d0p).astype(jnp.bfloat16),           # xt rows
            _pad2(w0[out_dim:], odp, d0p).astype(jnp.bfloat16),           # x rows
            _pad2(b0.reshape(1, -1).astype(jnp.float32), 1, d0p)]
    prev = d0p
    for (w, b) in mlp_params[1:]:
        dp = _round_up(w.shape[1], 128)
        flat.append(_pad2(w, prev, dp).astype(jnp.bfloat16))
        flat.append(_pad2(b.reshape(1, -1).astype(jnp.float32), 1, dp))
        prev = dp
    n_out_pad = prev                                      # lane-dense output slab

    arrays = [xt_p, x_p] + flat
    specs = [pl.BlockSpec(a.shape, lambda *_: (0, 0)) for a in arrays]
    out = pl.pallas_call(
        functools.partial(_mlp_kernel, n_layers=n_layers),
        out_shape=jax.ShapeDtypeStruct((g_pad, n_out_pad), jnp.float32),
        in_specs=specs,
        out_specs=pl.BlockSpec((g_pad, n_out_pad), lambda *_: (0, 0)),
    )(*arrays)
    return out[:num_graphs, :n_output]


# ----------------------------------------------------------------------------
# Glue: normalized adjacency, parameter init, forward pass
# ----------------------------------------------------------------------------
def normalized_adjacency(edge_index, num_nodes):
    # PyG GCNConv gcn_norm (edge_weight=None): duplicate non-self-loop edges accumulate
    # (scatter-add); every node ends up with exactly one weight-1 self-loop
    # (add_remaining_self_loops replaces existing self-loop edges).
    src, dst = edge_index[0], edge_index[1]
    w = jnp.where(src != dst, 1.0, 0.0).astype(jnp.float32)
    a = jnp.zeros((num_nodes, num_nodes), jnp.float32)
    a = a.at[dst, src].add(w)
    idx = jnp.arange(num_nodes)
    a = a.at[idx, idx].add(1.0)
    deg = jnp.sum(a, axis=1)
    d = jax.lax.rsqrt(deg)
    return a * d[:, None] * d[None, :]


def _glorot(key, shape):
    fan_in, fan_out = shape
    limit = (6.0 / (fan_in + fan_out)) ** 0.5
    return jax.random.uniform(key, shape, jnp.float32, -limit, limit)


def init_params(key, num_features_pro, output_dim, inner_dim, n_output, num_layers):
    keys = iter(jax.random.split(key, 32))
    p = {}
    for name in ("wild_conv1", "wild_conv2", "mutant_conv1", "mutant_conv2"):
        p[f"{name}_w"] = _glorot(next(keys), (num_features_pro, num_features_pro))
        p[f"{name}_b"] = jnp.zeros((1, num_features_pro), jnp.float32)
    for name in ("wild_fc1", "mutant_fc1"):
        p[f"{name}_w"] = _glorot(next(keys), (num_features_pro, output_dim))
        p[f"{name}_b"] = jnp.zeros((1, output_dim), jnp.float32)
    # TODO(synk): MLP class definition not present in the source file; implemented as
    # Linear(2*output_dim, inner)+ReLU, (num_layers-1)x[Linear(inner,inner)+ReLU],
    # Linear(inner, n_output).
    mlp = []
    dims = [2 * output_dim] + [inner_dim] * num_layers + [n_output]
    for i in range(len(dims) - 1):
        mlp.append((_glorot(next(keys), (dims[i], dims[i + 1])),
                    jnp.zeros((1, dims[i + 1]), jnp.float32)))
    p["mlp"] = mlp
    return p


def stagcnn_forward(params, wild_x, wild_a_hat, wild_batch,
                    mutant_x, mutant_a_hat, mutant_batch, num_graphs,
                    *, use_fused=None):
    # TODO(synk): a graph id with zero nodes would pool to -1e30 (matches gmp's
    #             undefined behavior on empty graphs); only padded slots are zeroed.
    f = wild_x.shape[1]
    out_dim = params["wild_fc1_w"].shape[1]
    n_output = params["mlp"][-1][0].shape[1]
    g_pad = _round_up(max(int(num_graphs), 1), 8)
    fp = _round_up(f, 128)
    odp = _round_up(out_dim, 128)
    n_pad = _round_up(max(wild_x.shape[0], mutant_x.shape[0]), 128)

    cap = _vmem_capacity_bytes()                          # generation-aware budget
    budget = max(cap - (16 << 20), 24 << 20)
    vmem_limit = max(cap - (8 << 20), 32 << 20)

    if use_fused is None:
        use_fused = _fused_vmem_bytes(n_pad, fp, odp, g_pad) <= budget

    if use_fused:
        wneg = _graph_neg_mask(wild_batch, num_graphs, g_pad, n_pad)
        mneg = _graph_neg_mask(mutant_batch, num_graphs, g_pad, n_pad)
        x_wild, x_mut = _branches_fused(params, wild_x, wild_a_hat, wneg,
                                        mutant_x, mutant_a_hat, mneg,
                                        num_graphs, g_pad, n_pad, vmem_limit)
    else:
        x_wild = _branch_tiled(wild_a_hat, wild_x,
                               params["wild_conv1_w"], params["wild_conv1_b"],
                               params["wild_conv2_w"], params["wild_conv2_b"],
                               wild_batch, params["wild_fc1_w"], params["wild_fc1_b"],
                               num_graphs, g_pad)
        x_mut = _branch_tiled(mutant_a_hat, mutant_x,
                              params["mutant_conv1_w"], params["mutant_conv1_b"],
                              params["mutant_conv2_w"], params["mutant_conv2_b"],
                              mutant_batch, params["mutant_fc1_w"], params["mutant_fc1_b"],
                              num_graphs, g_pad)

    # head: xc = torch.cat((xt, x), 1) -> wild_MLP(xc)   (mutant features first)
    return mlp_head(x_mut, x_wild, params["mlp"], num_graphs, n_output, out_dim)


# ----------------------------------------------------------------------------
# Example run
# ----------------------------------------------------------------------------
if __name__ == "__main__":
    key = jax.random.PRNGKey(0)
    ks = jax.random.split(key, 8)

    # small, module-consistent hyperparameters (module defaults are 1024/2048/512/1/2)
    NUM_FEATURES_PRO = 128
    OUTPUT_DIM = 256
    INNER_DIM = 128
    N_OUTPUT = 1
    NUM_LAYERS = 2
    NUM_GRAPHS = 2

    NW, NM = 272, 240                 # nodes per branch (2 graphs each)
    EW, EM = 4 * NW, 4 * NM

    wild_x = jax.random.normal(ks[0], (NW, NUM_FEATURES_PRO), jnp.float32)
    wild_edge_index = jax.random.randint(ks[1], (2, EW), 0, NW)
    wild_batch = jnp.concatenate([jnp.zeros(NW // 2, jnp.int32),
                                  jnp.ones(NW - NW // 2, jnp.int32)])

    mutant_x = jax.random.normal(ks[2], (NM, NUM_FEATURES_PRO), jnp.float32)
    mutant_edge_index = jax.random.randint(ks[3], (2, EM), 0, NM)
    mutant_batch = jnp.concatenate([jnp.zeros(NM // 2, jnp.int32),
                                    jnp.ones(NM - NM // 2, jnp.int32)])

    params = init_params(ks[4], NUM_FEATURES_PRO, OUTPUT_DIM, INNER_DIM,
                         N_OUTPUT, NUM_LAYERS)

    wild_a = normalized_adjacency(wild_edge_index, NW)
    mutant_a = normalized_adjacency(mutant_edge_index, NM)

    # fused path: one pallas_call covering both branches + one fused MLP head
    out_fused = jax.block_until_ready(
        stagcnn_forward(params, wild_x, wild_a, wild_batch,
                        mutant_x, mutant_a, mutant_batch, NUM_GRAPHS,
                        use_fused=True))
    # tiled fallback path (K-reduction grids) — exercised & cross-checked here
    out_tiled = jax.block_until_ready(
        stagcnn_forward(params, wild_x, wild_a, wild_batch,
                        mutant_x, mutant_a, mutant_batch, NUM_GRAPHS,
                        use_fused=False))

    assert out_fused.shape == (NUM_GRAPHS, N_OUTPUT), out_fused.shape
    assert out_tiled.shape == (NUM_GRAPHS, N_OUTPUT), out_tiled.shape
    assert bool(jnp.all(jnp.isfinite(out_fused)))
    assert bool(jnp.all(jnp.isfinite(out_tiled)))
    rel = float(jnp.max(jnp.abs(out_fused - out_tiled))
                / (jnp.max(jnp.abs(out_tiled)) + 1.0))
    assert rel < 0.05, rel
    print("KERNEL_OK")
</pallas_src>

<mosaic_0001>
module attributes {stable_mosaic.version = 11 : i64} {
  func.func @_branch_kernel(%arg0: i32, %arg1: memref<1x384x384xbf16, #tpu.memory_space<vmem>>, %arg2: memref<1x384x128xbf16, #tpu.memory_space<vmem>>, %arg3: memref<1x128x128xbf16, #tpu.memory_space<vmem>>, %arg4: memref<1x1x128xf32, #tpu.memory_space<vmem>>, %arg5: memref<1x128x128xbf16, #tpu.memory_space<vmem>>, %arg6: memref<1x1x128xf32, #tpu.memory_space<vmem>>, %arg7: memref<1x384x8xf32, #tpu.memory_space<vmem>>, %arg8: memref<1x128x256xbf16, #tpu.memory_space<vmem>>, %arg9: memref<1x1x256xf32, #tpu.memory_space<vmem>>, %arg10: memref<1x8x256xf32, #tpu.memory_space<vmem>>, %arg11: memref<8x128xf32, #tpu.memory_space<vmem>>) attributes {dimension_semantics = [#tpu.dimension_semantics<parallel>], iteration_bounds = array<i64: 2>, scalar_prefetch = 0 : i64, scratch_operands = 1 : i64, tpu.core_type = #tpu.core_type<tc>, window_params = [{transform_indices = @transform_0, window_bounds = array<i64: 1, 384, 384>}, {transform_indices = @transform_1, window_bounds = array<i64: 1, 384, 128>}, {transform_indices = @transform_2, window_bounds = array<i64: 1, 128, 128>}, {transform_indices = @transform_3, window_bounds = array<i64: 1, 1, 128>}, {transform_indices = @transform_4, window_bounds = array<i64: 1, 128, 128>}, {transform_indices = @transform_5, window_bounds = array<i64: 1, 1, 128>}, {transform_indices = @transform_6, window_bounds = array<i64: 1, 384, 8>}, {transform_indices = @transform_7, window_bounds = array<i64: 1, 128, 256>}, {transform_indices = @transform_8, window_bounds = array<i64: 1, 1, 256>}, {transform_indices = @transform_9, window_bounds = array<i64: 1, 8, 256>}]} {
    %c0 = arith.constant 0 : index
    %c0_0 = arith.constant 0 : index
    %c0_1 = arith.constant 0 : index
    %0 = vector.load %arg1[%c0, %c0_0, %c0_1] : memref<1x384x384xbf16, #tpu.memory_space<vmem>>, vector<1x384x384xbf16>
    %1 = vector.shape_cast %0 : vector<1x384x384xbf16> to vector<384x384xbf16>
    %c0_2 = arith.constant 0 : index
    %c0_3 = arith.constant 0 : index
    %c0_4 = arith.constant 0 : index
    %2 = vector.load %arg2[%c0_2, %c0_3, %c0_4] : memref<1x384x128xbf16, #tpu.memory_space<vmem>>, vector<1x384x128xbf16>
    %3 = vector.shape_cast %2 : vector<1x384x128xbf16> to vector<384x128xbf16>
    %c0_5 = arith.constant 0 : index
    %c0_6 = arith.constant 0 : index
    %c0_7 = arith.constant 0 : index
    %4 = vector.load %arg3[%c0_5, %c0_6, %c0_7] : memref<1x128x128xbf16, #tpu.memory_space<vmem>>, vector<1x128x128xbf16>
    %5 = vector.shape_cast %4 : vector<1x128x128xbf16> to vector<128x128xbf16>
    %cst = arith.constant dense<0.000000e+00> : vector<384x128xf32>
    %6 = tpu.matmul %3, %5, %cst {dimension_numbers = #tpu.dot_dimension_numbers<[1], [0], [0], [1], [0, 0, 1, 1], [], []>} : vector<384x128xbf16>, vector<128x128xbf16>, vector<384x128xf32> -> vector<384x128xf32>
    %7 = arith.truncf %6 : vector<384x128xf32> to vector<384x128xbf16>
    %cst_8 = arith.constant dense<0.000000e+00> : vector<384x128xf32>
    %8 = tpu.matmul %1, %7, %cst_8 {dimension_numbers = #tpu.dot_dimension_numbers<[1], [0], [0], [1], [0, 0, 1, 1], [], []>} : vector<384x384xbf16>, vector<384x128xbf16>, vector<384x128xf32> -> vector<384x128xf32>
    %c0_9 = arith.constant 0 : index
    %c0_10 = arith.constant 0 : index
    %c0_11 = arith.constant 0 : index
    %9 = vector.load %arg4[%c0_9, %c0_10, %c0_11] : memref<1x1x128xf32, #tpu.memory_space<vmem>>, vector<1x1x128xf32>
    %10 = vector.shape_cast %9 : vector<1x1x128xf32> to vector<1x128xf32>
    %11 = vector.broadcast %10 : vector<1x128xf32> to vector<384x128xf32>
    %12 = arith.addf %8, %11 : vector<384x128xf32>
    %cst_12 = arith.constant 0.000000e+00 : f32
    %13 = vector.broadcast %cst_12 : f32 to vector<384x128xf32>
    %14 = arith.maximumf %12, %13 : vector<384x128xf32>
    %15 = arith.extf %3 : vector<384x128xbf16> to vector<384x128xf32>
    %16 = arith.addf %15, %14 : vector<384x128xf32>
    %17 = arith.truncf %16 : vector<384x128xf32> to vector<384x128xbf16>
    %c0_13 = arith.constant 0 : index
    %c0_14 = arith.constant 0 : index
    %c0_15 = arith.constant 0 : index
    %18 = vector.load %arg5[%c0_13, %c0_14, %c0_15] : memref<1x128x128xbf16, #tpu.memory_space<vmem>>, vector<1x128x128xbf16>
    %19 = vector.shape_cast %18 : vector<1x128x128xbf16> to vector<128x128xbf16>
    %cst_16 = arith.constant dense<0.000000e+00> : vector<384x128xf32>
    %20 = tpu.matmul %17, %19, %cst_16 {dimension_numbers = #tpu.dot_dimension_numbers<[1], [0], [0], [1], [0, 0, 1, 1], [], []>} : vector<384x128xbf16>, vector<128x128xbf16>, vector<384x128xf32> -> vector<384x128xf32>
    %21 = arith.truncf %20 : vector<384x128xf32> to vector<384x128xbf16>
    %cst_17 = arith.constant dense<0.000000e+00> : vector<384x128xf32>
    %22 = tpu.matmul %1, %21, %cst_17 {dimension_numbers = #tpu.dot_dimension_numbers<[1], [0], [0], [1], [0, 0, 1, 1], [], []>} : vector<384x384xbf16>, vector<384x128xbf16>, vector<384x128xf32> -> vector<384x128xf32>
    %c0_18 = arith.constant 0 : index
    %c0_19 = arith.constant 0 : index
    %c0_20 = arith.constant 0 : index
    %23 = vector.load %arg6[%c0_18, %c0_19, %c0_20] : memref<1x1x128xf32, #tpu.memory_space<vmem>>, vector<1x1x128xf32>
    %24 = vector.shape_cast %23 : vector<1x1x128xf32> to vector<1x128xf32>
    %25 = vector.broadcast %24 : vector<1x128xf32> to vector<384x128xf32>
    %26 = arith.addf %22, %25 : vector<384x128xf32>
    %c0_21 = arith.constant 0 : index
    %c0_22 = arith.constant 0 : index
    %c0_23 = arith.constant 0 : index
    %27 = vector.load %arg7[%c0_21, %c0_22, %c0_23] : memref<1x384x8xf32, #tpu.memory_space<vmem>>, vector<1x384x8xf32>
    %28 = vector.shape_cast %27 : vector<1x384x8xf32> to vector<384x8xf32>
    %cst_24 = arith.constant 0.000000e+00 : f32
    %29 = vector.broadcast %cst_24 : f32 to vector<8x128xf32>
    %c0_25 = arith.constant 0 : index
    %c0_26 = arith.constant 0 : index
    %30 = vector.load %arg11[%c0_25, %c0_26] : memref<8x128xf32, #tpu.memory_space<vmem>>, vector<8x128xf32>
    tpu.vector_store %arg11[%c0_25, %c0_26], %29 {strides = array<i32>} : memref<8x128xf32, #tpu.memory_space<vmem>>, vector<8x128xf32>,
    %31 = vector.extract_strided_slice %28 {offsets = [0, 0], sizes = [384, 1], strides = [1, 1]} : vector<384x8xf32> to vector<384x1xf32>
    %32 = vector.broadcast %31 : vector<384x1xf32> to vector<384x128xf32>
    %33 = arith.addf %26, %32 : vector<384x128xf32>
    %cst_27 = arith.constant dense<0xFF800000> : vector<128xf32>
    %34 = vector.multi_reduction <maximumf>, %33, %cst_27 [0] : vector<384x128xf32> to vector<128xf32>
    %35 = vector.shape_cast %34 : vector<128xf32> to vector<1x128xf32>
    %c0_28 = arith.constant 0 : index
    %c0_29 = arith.constant 0 : index
    %36 = vector.load %arg11[%c0_28, %c0_29] : memref<8x128xf32, #tpu.memory_space<vmem>>, vector<1x128xf32>
    tpu.vector_store %arg11[%c0_28, %c0_29], %35 {strides = array<i32>} : memref<8x128xf32, #tpu.memory_space<vmem>>, vector<1x128xf32>,
    %37 = vector.extract_strided_slice %28 {offsets = [0, 1], sizes = [384, 1], strides = [1, 1]} : vector<384x8xf32> to vector<384x1xf32>
    %38 = vector.broadcast %37 : vector<384x1xf32> to vector<384x128xf32>
    %39 = arith.addf %26, %38 : vector<384x128xf32>
    %cst_30 = arith.constant dense<0xFF800000> : vector<128xf32>
    %40 = vector.multi_reduction <maximumf>, %39, %cst_30 [0] : vector<384x128xf32> to vector<128xf32>
    %41 = vector.shape_cast %40 : vector<128xf32> to vector<1x128xf32>
    %c1 = arith.constant 1 : index
    %c0_31 = arith.constant 0 : index
    %42 = vector.load %arg11[%c1, %c0_31] : memref<8x128xf32, #tpu.memory_space<vmem>>, vector<1x128xf32>
    tpu.vector_store %arg11[%c1, %c0_31], %41 {strides = array<i32>} : memref<8x128xf32, #tpu.memory_space<vmem>>, vector<1x128xf32>,
    %c0_32 = arith.constant 0 : index
    %c0_33 = arith.constant 0 : index
    %43 = vector.load %arg11[%c0_32, %c0_33] : memref<8x128xf32, #tpu.memory_space<vmem>>, vector<8x128xf32>
    %44 = arith.truncf %43 : vector<8x128xf32> to vector<8x128xbf16>
    %c0_34 = arith.constant 0 : index
    %c0_35 = arith.constant 0 : index
    %c0_36 = arith.constant 0 : index
    %45 = vector.load %arg8[%c0_34, %c0_35, %c0_36] : memref<1x128x256xbf16, #tpu.memory_space<vmem>>, vector<1x128x256xbf16>
    %46 = vector.shape_cast %45 : vector<1x128x256xbf16> to vector<128x256xbf16>
    %cst_37 = arith.constant dense<0.000000e+00> : vector<8x256xf32>
    %47 = tpu.matmul %44, %46, %cst_37 {dimension_numbers = #tpu.dot_dimension_numbers<[1], [0], [0], [1], [0, 0, 1, 1], [], []>} : vector<8x128xbf16>, vector<128x256xbf16>, vector<8x256xf32> -> vector<8x256xf32>
    %c0_38 = arith.constant 0 : index
    %c0_39 = arith.constant 0 : index
    %c0_40 = arith.constant 0 : index
    %48 = vector.load %arg9[%c0_38, %c0_39, %c0_40] : memref<1x1x256xf32, #tpu.memory_space<vmem>>, vector<1x1x256xf32>
    %49 = vector.shape_cast %48 : vector<1x1x256xf32> to vector<1x256xf32>
    %50 = vector.broadcast %49 : vector<1x256xf32> to vector<8x256xf32>
    %51 = arith.addf %47, %50 : vector<8x256xf32>
    %cst_41 = arith.constant 0.000000e+00 : f32
    %52 = vector.broadcast %cst_41 : f32 to vector<8x256xf32>
    %53 = arith.maximumf %51, %52 : vector<8x256xf32>
    %c0_42 = arith.constant 0 : index
    %c0_43 = arith.constant 0 : index
    %c0_44 = arith.constant 0 : index
    %54 = vector.load %arg10[%c0_42, %c0_43, %c0_44] : memref<1x8x256xf32, #tpu.memory_space<vmem>>, vector<1x8x256xf32>
    %55 = vector.shape_cast %54 : vector<1x8x256xf32> to vector<8x256xf32>
    %56 = vector.shape_cast %53 : vector<8x256xf32> to vector<1x8x256xf32>
    tpu.vector_store %arg10[%c0_42, %c0_43, %c0_44], %56 {strides = array<i32>} : memref<1x8x256xf32, #tpu.memory_space<vmem>>, vector<1x8x256xf32>,
    return
  }
  func.func @transform_0(%arg0: i32) -> (i32, i32, i32) {
    %c0_i32 = arith.constant 0 : i32
    %c0_i32_0 = arith.constant 0 : i32
    %c0_i32_1 = arith.constant 0 : i32
    return %arg0, %c0_i32, %c0_i32_0 : i32, i32, i32
  }
  func.func @transform_1(%arg0: i32) -> (i32, i32, i32) {
    %c0_i32 = arith.constant 0 : i32
    %c0_i32_0 = arith.constant 0 : i32
    %c0_i32_1 = arith.constant 0 : i32
    return %arg0, %c0_i32, %c0_i32_0 : i32, i32, i32
  }
  func.func @transform_2(%arg0: i32) -> (i32, i32, i32) {
    %c0_i32 = arith.constant 0 : i32
    %c0_i32_0 = arith.constant 0 : i32
    %c0_i32_1 = arith.constant 0 : i32
    return %arg0, %c0_i32, %c0_i32_0 : i32, i32, i32
  }
  func.func @transform_3(%arg0: i32) -> (i32, i32, i32) {
    %c0_i32 = arith.constant 0 : i32
    %c0_i32_0 = arith.constant 0 : i32
    %c0_i32_1 = arith.constant 0 : i32
    return %arg0, %c0_i32, %c0_i32_0 : i32, i32, i32
  }
  func.func @transform_4(%arg0: i32) -> (i32, i32, i32) {
    %c0_i32 = arith.constant 0 : i32
    %c0_i32_0 = arith.constant 0 : i32
    %c0_i32_1 = arith.constant 0 : i32
    return %arg0, %c0_i32, %c0_i32_0 : i32, i32, i32
  }
  func.func @transform_5(%arg0: i32) -> (i32, i32, i32) {
    %c0_i32 = arith.constant 0 : i32
    %c0_i32_0 = arith.constant 0 : i32
    %c0_i32_1 = arith.constant 0 : i32
    return %arg0, %c0_i32, %c0_i32_0 : i32, i32, i32
  }
  func.func @transform_6(%arg0: i32) -> (i32, i32, i32) {
    %c0_i32 = arith.constant 0 : i32
    %c0_i32_0 = arith.constant 0 : i32
    %c0_i32_1 = arith.constant 0 : i32
    return %arg0, %c0_i32, %c0_i32_0 : i32, i32, i32
  }
  func.func @transform_7(%arg0: i32) -> (i32, i32, i32) {
    %c0_i32 = arith.constant 0 : i32
    %c0_i32_0 = arith.constant 0 : i32
    %c0_i32_1 = arith.constant 0 : i32
    return %arg0, %c0_i32, %c0_i32_0 : i32, i32, i32
  }
  func.func @transform_8(%arg0: i32) -> (i32, i32, i32) {
    %c0_i32 = arith.constant 0 : i32
    %c0_i32_0 = arith.constant 0 : i32
    %c0_i32_1 = arith.constant 0 : i32
    return %arg0, %c0_i32, %c0_i32_0 : i32, i32, i32
  }
  func.func @transform_9(%arg0: i32) -> (i32, i32, i32) {
    %c0_i32 = arith.constant 0 : i32
    %c0_i32_0 = arith.constant 0 : i32
    %c0_i32_1 = arith.constant 0 : i32
    return %arg0, %c0_i32, %c0_i32_0 : i32, i32, i32
  }
}

</mosaic_0001>

<bundles_post_ra>
// kernel: tpu_custom_call.1
= control target key start
LH: loop header
LB: loop body
LE: loop exit
PB: predicated region body
PF: predicated region fallthrough
CT: control target
= control target key end

     0   :  { %s6281_s0 = inlined_call_operand.hbm [shape: bf16[2,384,384], index: 0, kind: input, shape index: {}]   ;;  %s6282_s1 = inlined_call_operand.vmem [shape: bf16[2,384,128], index: 1, kind: input, shape index: {}]   ;;  %s6283_s2 = inlined_call_operand.vmem [shape: bf16[2,128,128], index: 2, kind: input, shape index: {}]   ;;  %s6284_s3 = inlined_call_operand.vmem [shape: f32[2,1,128], index: 3, kind: input, shape index: {}]   ;;  %s6285_s4 = inlined_call_operand.hbm [shape: bf16[2,128,128], index: 4, kind: input, shape index: {}]   ;;  %s6286_s5 = inlined_call_operand.vmem [shape: f32[2,1,128], index: 5, kind: input, shape index: {}]   ;;  %s6287_s6 = inlined_call_operand.vmem [shape: f32[2,384,8], index: 6, kind: input, shape index: {}]   ;;  %s6288_s7 = inlined_call_operand.vmem [shape: bf16[2,128,256], index: 7, kind: input, shape index: {}]   ;;  %s6289_s8 = inlined_call_operand.vmem [shape: f32[2,1,256], index: 8, kind: input, shape index: {}]   ;;  %s6290_s9 = inlined_call_operand.hbm [shape: f32[2,8,256], index: 9, kind: output, shape index: {}]  }
   0x1   :  { %6296 = sst [smem:[#allocation46_spill]] %s6281_s0 }
   0x2   :  { %14 = vsyncpa [#allocation4], 0 }
   0x3   :  { %16 = vsyncpa [#allocation4 + $0x1], 0 }
   0x4   :  { %17 = vsyncpa [#allocation7], 0 }
   0x5   :  { %19 = vsyncpa [#allocation7 + $0x1], 0 }
   0x6   :  { %20 = vsyncpa [#allocation5], 0 }
   0x7   :  { %22 = vsyncpa [#allocation5 + $0x1], 0  ;;  %s5015_s30 = smov 0   ;;  %s5017_s10 = smov 0  }
   0x8   :  { %s5019_s11 = smov 0   ;;  %s5021_s12 = smov 0  }
   0x9 LB: > { %6297 = sst [smem:[#allocation12_spill]] %s4949_s11  ;;  %s5036_s13 = sadd.s32 4294967295, %s4953_s12   ;;  %s4953_s12 = sphi %s5021_s12, %s6372_s12   ;;  %s4949_s11 = sphi %s5019_s11, %s6374_s11   ;;  %s4945_s10 = sphi %s5017_s10, %s6376_s10   ;;  %s4941_s30 = sphi %s5015_s30, %s6375_s30  }
   0xa   : > { %s3923_s14 = sadd.s32 4294967294, %s4953_s12   ;;  %s5040_s15 = sadd.s32 1, %s4953_s12  }
   0xb   : > { %6298 = sst [smem:[#allocation13_spill]] %s5040_s15  ;;  %s35_s16 = sadd.s32 1, %s4949_s11 }
   0xc   : > { %s32_s17 = ssub.s32 %s4953_s12, %s5040_s15  ;;  %p42_p0 = scmp.ne.s32.totalorder %s4949_s11, %s4945_s10 }
   0xd   : > { %p33_p1 = scmp.eq.s32.totalorder %s32_s17, 0  ;;  %p43_p2 = scmp.eq.s32.totalorder %s4953_s12, 0 }
   0xe   : > { %p48_p3 = scmp.ne.s32.totalorder %s4945_s10, %s4941_s30  ;;  %p49_p4 = scmp.eq.s32.totalorder %s5036_s13, 0 }
   0xf   : > { %s5052_s18 = scalar_select %p33_p1, %s4949_s11, %s35_s16  }
  0x10   : > { %p44_p5 = por %p43_p2, %p42_p0  ;;  %p5054_p6 = por %p49_p4, %p48_p3 }
  0x11   : > { %6299 = sst [smem:[#allocation14_spill]] %s5052_s18  ;;  %p280_p7 = scmp.eq.s32.totalorder %s5036_s13, 1 }
  0x12   : > { %s6300_s19 = scalar_select %p5054_p6, 1, 0 }
  0x13   : > { %p286_p8 = scmp.eq.s32.totalorder %s3923_s14, 1  ;;  %p4485_p10 = scmp.lt.s32.totalorder %s4953_s12, 2 }
  0x14   : > { %p5061_p11 = por %p280_p7, %p42_p0  ;;  %s5070_s22 = sand.u32 1, %s4949_s11  }
  0x15   : > { %p5065_p12 = por %p286_p8, %p48_p3  ;;  %s4464_s23 = smul.u32 9216, %s4953_s12 }
  0x16   : > { %s6301_s20 = scalar_select %p5061_p11, 1, 0 }
  0x17   : > { %s6302_s21 = scalar_select %p5065_p12, 1, 0 }
  0x18   : > { %s4463_s24 = smul.u32 576, %s5070_s22  ;;  %s6303_s0 = sld [smem:[#allocation46_spill]] }
  0x19   : > { %p5079_p13 = pnand %p4485_p10, %p44_p5  ;;  %s307_s16 = scalar_lea.sflag [#allocation4], %s5070_s22 }
  0x1a   : > { %s310_s29 = scalar_lea.vmem [#allocation3], %s4463_s24 }
  0x1b   : > { %s317_s14 = sshll.u32 %s310_s29, 4  ;;  %p4825_p1 = pneg %p5079_p13  ;;  %s5083_s14 = int_to_ptr.vmem [resolvable:$true] %s317_s14 }
  0x1e   : > { %s5077_s27 = scalar_lea.hbm %s6303_s0, %s4464_s23  ;;  %s4828_s26 = scalar_lea.hbm %s6303_s0, 18432 }
  0x1f   : > { %s4823_s17 = scalar_lea.hbm %s5077_s27, 9216  ;;  %p4829_p4 = scmp.lt.u32.totalorder %s5077_s27, %s6303_s0 }
  0x20   : > { %p4824_p0 = scmp.ne.s32.totalorder %s5077_s27, %s4823_s17  ;;  %p4830_p5 = scmp.lt.u32.totalorder %s4828_s26, %s4823_s17 }
  0x21   : > { %p4832_p8 = scmp.lt.u32.totalorder %s4823_s17, %s5077_s27 }
  0x22   : > { %p4826_p2 = pnand %p4825_p1, %p4824_p0  ;;  %p4831_p7 = por %p4830_p5, %p4829_p4 }
  0x24   : > { %p4827_p3 = pneg %p4826_p2  ;;  %p4833_p10 = por %p4832_p8, %p4831_p7 }
  0x26   : > { %p4834_p9 = pnand %p4833_p10, %p4827_p3 }
  0x28   : > { %4837 = shalt.err (!%p4834_p9)
}
  0x29   : > { %s4838_s24 = scalar_lea.vmem %s5083_s14, 9216  ;;  %s4955_s29 = smov [#allocation3]  }
  0x2a   : > { %p4839_p0 = scmp.ne.s32.totalorder %s5083_s14, %s4838_s24  ;;  %s4843_s23 = sshll.u32 %s4955_s29, 4  ;;  %s4844_s23 = int_to_ptr.vmem [resolvable:$false] %s4843_s23 }
  0x2b   : > { %s4845_s11 = scalar_lea.vmem %s4844_s23, 18432  ;;  %p4846_p11 = scmp.lt.s32.totalorder %s5083_s14, %s4844_s23 }
  0x2c   : > { %p4841_p2 = pnand %p4839_p0, %p4825_p1  ;;  %p4847_p4 = scmp.lt.s32.totalorder %s4845_s11, %s4838_s24 }
  0x2e   : > { %p4842_p12 = pneg %p4841_p2  ;;  %p4848_p5 = por %p4847_p4, %p4846_p11 }
  0x30   : > { %p4849_p7 = pnand %p4848_p5, %p4842_p12 }
  0x32   : > { %4852 = shalt.err (!%p4849_p7)
}
  0x33   : > { %s4956_s18 = smov 192   ;;  %s4957_s17 = smov 12  }
  0x34   : > { %4477 = dma.hbm_to_vmem [thread:$0]  (!%p5079_p13), %s5077_s27, 9216, %s5083_s14, %s307_s16, %s4956_s18, %s4956_s18, %s4957_s17  }
  0x35   : > { %p3930_p9 = scmp.ge.s32.totalorder %s4953_s12, 1  ;;  %p397_p3 = scmp.lt.s32.totalorder %s4953_s12, 3 }
  0x36   : > { %s3927_s25 = sshll.u32 %s5070_s22, 6  ;;  %s4075_s24 = sshll.u32 %s4953_s12, 10 }
  0x37   : > { %p5116_p11 = pnand %p3930_p9, %p397_p3  ;;  %s353_s29 = scalar_lea.vmem [#allocation6], %s3927_s25 }
  0x38   : > { %s360_s23 = sshll.u32 %s353_s29, 4  ;;  %s5124_s15 = scalar_lea.hbm %s6285_s4, %s4075_s24  ;;  %s5126_s23 = int_to_ptr.vmem [resolvable:$true] %s360_s23 }
  0x39   : > { %s350_s27 = scalar_lea.sflag [#allocation7], %s5070_s22  ;;  %s4853_s14 = scalar_lea.hbm %s5124_s15, 1024 }
  0x3a   : > { %p4854_p12 = scmp.ne.s32.totalorder %s5124_s15, %s4853_s14  ;;  %s4858_s17 = scalar_lea.hbm %s6285_s4, 2048 }
  0x3b   : > { %p4859_p0 = scmp.lt.u32.totalorder %s5124_s15, %s6285_s4  ;;  %p4860_p2 = scmp.lt.u32.totalorder %s4858_s17, %s4853_s14 }
  0x3c   : > { %p4856_p8 = pnand %p4854_p12, %p4825_p1  ;;  %p4862_p5 = scmp.lt.u32.totalorder %s4853_s14, %s5124_s15 }
  0x3d   : > { %p4861_p4 = por %p4860_p2, %p4859_p0 }
  0x3e   : > { %p4857_p10 = pneg %p4856_p8 }
  0x3f   : > { %p4863_p7 = por %p4862_p5, %p4861_p4 }
  0x41   : > { %p4864_p9 = pnand %p4863_p7, %p4857_p10 }
  0x43   : > { %4867 = shalt.err (!%p4864_p9)
}
  0x44   : > { %s4868_s24 = scalar_lea.vmem %s5126_s23, 1024  ;;  %s4958_s29 = smov [#allocation6]  }
  0x45   : > { %p4869_p3 = scmp.ne.s32.totalorder %s5126_s23, %s4868_s24  ;;  %s4873_s11 = sshll.u32 %s4958_s29, 4  ;;  %s4874_s11 = int_to_ptr.vmem [resolvable:$false] %s4873_s11 }
  0x46   : > { %s4875_s16 = scalar_lea.vmem %s4874_s11, 2048  ;;  %p4876_p6 = scmp.lt.s32.totalorder %s5126_s23, %s4874_s11 }
  0x47   : > { %p4871_p12 = pnand %p4869_p3, %p4825_p1  ;;  %p4877_p0 = scmp.lt.s32.totalorder %s4875_s16, %s4868_s24 }
  0x49   : > { %p4872_p8 = pneg %p4871_p12  ;;  %p4878_p2 = por %p4877_p0, %p4876_p6 }
  0x4b   : > { %p4879_p4 = pnand %p4878_p2, %p4872_p8 }
  0x4d   : > { %4882 = shalt.err (!%p4879_p4)
}
  0x4e   : > { %s4959_s14 = smov 64   ;;  %s4960_s18 = smov 4  }
  0x4f   : > { %4480 = dma.hbm_to_vmem [thread:$0]  (!%p5079_p13), %s5124_s15, 1024, %s5126_s23, %s350_s27, %s4959_s14, %s4959_s14, %s4960_s18  }
  0x50   : > { %401 = sbr.rel (%p5116_p11) target bundleno = 1645 (0x66d), region = 56 }
  0x57   : > { %s5157_s17 = sand.u32 1, %s4945_s10   ;;  %p6306_p6 = scmp.ne.s32.totalorder %s6300_s19, 0 }
  0x58   : > { %s4465_s0 = smul.u32 576, %s5157_s17  ;;  %s404_s25 = scalar_lea.sflag [#allocation4], %s5157_s17 }
  0x5a   : > { %s5161_s24 = scalar_lea.vmem [#allocation3], %s4465_s0 }
  0x5b   : > { %4928 = dma.done.wait (%p6306_p6), %s404_s25, 9216  }
  0x5c   : > { %4930 = vsyncadd (%p6306_p6), %s404_s25, 4294958080  ;;  %s3931_s15 = sshll.u32 %s5157_s17, 6  ;;  %s413_s22 = scalar_lea.sflag [#allocation7], %s5157_s17 }
  0x5d   : > { %s5169_s28 = scalar_lea.vmem [#allocation6], %s3931_s15 }
  0x5e   : > { %4932 = dma.done.wait (%p6306_p6), %s413_s22, 1024  }
  0x5f   : > { %4934 = vsyncadd (%p6306_p6), %s413_s22, 4294966272  ;;  %p486_p13 = scmp.lt.s32.totalorder %s5036_s13, 1  ;;  %v4961_v32 = vmov 0   ;;  %v5229_v33 = vld [vmem:[%s5161_s24 + $0x4] ss:$12 sps:$4 sm:$0xff]   ;;  %p6369_p11 = scmp.ne.s32.totalorder %s6301_s20, 0 }
  0x60   : > { %1509 = vmatprep.subr.bf16.mxu1 %v4961_v32  ;;  %4527 = vset.pattern.permute.xlu1 %v4961_v32  ;;  %v4595_v34 = vld [vmem:[%s5161_s24 + $0x8] ss:$12 sps:$4 sm:$0xff]   ;;  %s4964_s19 = smov [#allocation8]  }
  0x61   : > { %s5177_s26 = scalar_select %p486_p13, %s5036_s13, 1  ;;  %4526 = vset.pattern.permute.xlu0 %v4961_v32  ;;  %1541 = vmatprep.mubr.bf16.mxu1 %v5229_v33 }
  0x62   : > { %s4887_s14 = sshll.u32 %s4964_s19, 4  ;;  %s4888_s14 = int_to_ptr.vmem [resolvable:$false] %s4887_s14 }
  0x63   : > { %s4076_s23 = sshll.u32 %s5177_s26, 6  ;;  %s4466_s16 = smul.u32 192, %s5177_s26 }
  0x64   : > { %s495_s11 = scalar_lea.vmem %s6283_s2, %s4076_s23  ;;  %s498_s15 = scalar_lea.vmem %s6284_s3, %s5177_s26 }
  0x65   : > { %v4548_v0 = vld [vmem:[%s495_s11] sm:$0xff]   ;;  %v4549_v1 = vld [vmem:[%s495_s11 + $0x8] sm:$0xff]   ;;  %v4550_v2 = vld [vmem:[%s495_s11 + $0x10] sm:$0xff]   ;;  %s5187_s18 = scalar_lea.vmem %s6282_s1, %s4466_s16  ;;  %s4467_s22 = smul.u32 384, %s5177_s26 }
  0x66   : > { %4207 = vmatprep.subr.bf16.mxu0 %v4548_v0  ;;  %v4551_v3 = vld [vmem:[%s495_s11 + $0x18] sm:$0xff]   ;;  %v613_v4 = vld [vmem:[%s5187_s18] sm:$0xff]   ;;  %v4553_v6 = vld [vmem:[%s495_s11 + $0x28] sm:$0xff]   ;;  %s4077_s16 = sshll.u32 %s5177_s26, 7  ;;  %s3939_s0 = sshll.u32 %s5177_s26, 1 }
  0x67   : > { %4208 = vmatpush3.bf16.msra.mxu0 %v4548_v0  ;;  %4223 = vmatprep.mubr.bf16.mxu0 %v613_v4  ;;  %v4552_v5 = vld [vmem:[%s495_s11 + $0x20] sm:$0xff]   ;;  %v4554_v7 = vld [vmem:[%s495_s11 + $0x30] sm:$0xff]   ;;  %v4555_v8 = vld [vmem:[%s495_s11 + $0x38] sm:$0xff]   ;;  %s5487_s27 = scalar_lea.vmem %s6287_s6, %s4467_s22  ;;  %s501_s11 = scalar_lea.vmem %s6286_s5, %s5177_s26 }
  0x68   : > { %4209 = vmatprep.subr.bf16.mxu0 %v4549_v1  ;;  %v5191_v9 = vld [vmem:[%s5187_s18 + $0x8] sm:$0xff]   ;;  %v617_v10 = vld [vmem:[%s5187_s18 + $0x10] sm:$0xff]   ;;  %v5195_v11 = vld [vmem:[%s5187_s18 + $0x18] sm:$0xff]   ;;  %s515_s22 = scalar_lea.vmem %s6289_s8, %s3939_s0  ;;  %s4078_s23 = sshll.u32 %s5036_s13, 8 }
  0x69   : > { %v621_v12 = vld [vmem:[%s5187_s18 + $0x20] sm:$0xff]   ;;  %v5200_v13 = vld [vmem:[%s5187_s18 + $0x28] sm:$0xff]   ;;  %v625_v14 = vld [vmem:[%s5187_s18 + $0x30] sm:$0xff]   ;;  %s3738_s13 = scalar_lea.sflag [#allocation5], %s5157_s17 }
  0x6a   : > { %v5205_v15 = vld [vmem:[%s5187_s18 + $0x38] sm:$0xff]   ;;  %v629_v16 = vld [vmem:[%s5187_s18 + $0x40] sm:$0xff]   ;;  %v631_v17 = vld [vmem:[%s5187_s18 + $0x48] sm:$0xff]  }
  0x6b   : > { %4210 = vmatpush3.bf16.msra.mxu0 %v4549_v1  ;;  %v633_v18 = vld [vmem:[%s5187_s18 + $0x50] sm:$0xff]   ;;  %v635_v19 = vld [vmem:[%s5187_s18 + $0x58] sm:$0xff]   ;;  %v637_v20 = vld [vmem:[%s5187_s18 + $0x60] sm:$0xff]  }
  0x6c   : > { %4211 = vmatprep.subr.bf16.mxu0 %v4550_v2  ;;  %v639_v21 = vld [vmem:[%s5187_s18 + $0x68] sm:$0xff]   ;;  %v641_v22 = vld [vmem:[%s5187_s18 + $0x70] sm:$0xff]   ;;  %v643_v23 = vld [vmem:[%s5187_s18 + $0x78] sm:$0xff]  }
  0x6d   : > { %v645_v24 = vld [vmem:[%s5187_s18 + $0x80] sm:$0xff]   ;;  %v647_v25 = vld [vmem:[%s5187_s18 + $0x88] sm:$0xff]   ;;  %v649_v26 = vld [vmem:[%s5187_s18 + $0x90] sm:$0xff]  }
  0x6e   : > { %v651_v27 = vld [vmem:[%s5187_s18 + $0x98] sm:$0xff]   ;;  %v653_v28 = vld [vmem:[%s5187_s18 + $0xa0] sm:$0xff]   ;;  %v655_v29 = vld [vmem:[%s5187_s18 + $0xa8] sm:$0xff]  }
  0x6f   : > { %4212 = vmatpush3.bf16.msra.mxu0 %v4550_v2  ;;  %v657_v30 = vld [vmem:[%s5187_s18 + $0xb0] sm:$0xff]   ;;  %v659_v31 = vld [vmem:[%s5187_s18 + $0xb8] sm:$0xff]  }
  0x70   : > { %4213 = vmatprep.subr.bf16.mxu0 %v4551_v3 }
  0x73   : > { %4214 = vmatpush3.bf16.msra.mxu0 %v4551_v3 }
  0x74   : > { %4215 = vmatprep.subr.bf16.mxu0 %v4552_v5 }
  0x77   : > { %4216 = vmatpush3.bf16.msra.mxu0 %v4552_v5 }
  0x78   : > { %4217 = vmatprep.subr.bf16.mxu0 %v4553_v6 }
  0x7b   : > { %4218 = vmatpush3.bf16.msra.mxu0 %v4553_v6 }
  0x7c   : > { %4219 = vmatprep.subr.bf16.mxu0 %v4554_v7 }
  0x7f   : > { %4220 = vmatpush3.bf16.msra.mxu0 %v4554_v7 }
  0x80   : > { %4221 = vmatprep.subr.bf16.mxu0 %v4555_v8 }
  0x83   : > { %4222 = vmatpush3.bf16.msra.mxu0 %v4555_v8 }
  0x86   : > { %4224 = vmatmul.mubr.bf16.vlgmr.msra.gmra.mrb[0].mxu0 %v5191_v9 }
  0x87   : > { %4227 = vmatprep.mubr.bf16.mxu0 %v617_v10 }
  0x8e   : > { %4228 = vmatmul.mubr.bf16.gmra.mrb[4].mxu0 %v5195_v11 }
  0x8f   : > { %4231 = vmatprep.mubr.bf16.mxu0 %v621_v12 }
  0x96   : > { %4232 = vmatmul.mubr.bf16.gmra.mrb[8].mxu0 %v5200_v13 }
  0x97   : > { %4235 = vmatprep.mubr.bf16.mxu0 %v625_v14 }
  0x9e   : > { %4236 = vmatmul.mubr.bf16.gmra.mrb[12].mxu0 %v5205_v15 }
  0x9f   : > { %4239 = vmatprep.mubr.bf16.mxu0 %v629_v16 }
  0xa6   : > { %4240 = vmatmul.mubr.bf16.gmra.mrb[16].mxu0 %v631_v17 }
  0xa7   : > { %4243 = vmatprep.mubr.bf16.mxu0 %v633_v18 }
  0xae   : > { %4244 = vmatmul.mubr.bf16.gmra.mrb[20].mxu0 %v635_v19 }
  0xaf   : > { %4247 = vmatprep.mubr.bf16.mxu0 %v637_v20 }
  0xb6   : > { %4248 = vmatmul.mubr.bf16.gmra.mrb[24].mxu0 %v639_v21 }
  0xb7   : > { %4251 = vmatprep.mubr.bf16.mxu0 %v641_v22 }
  0xbe   : > { %4252 = vmatmul.mubr.bf16.gmra.mrb[28].mxu0 %v643_v23 }
  0xbf   : > { %4255 = vmatprep.mubr.bf16.mxu0 %v645_v24 }
  0xc6   : > { %4256 = vmatmul.mubr.bf16.gmra.mrb[32].mxu0 %v647_v25  ;;  %v4580_v25 = vld [vmem:[%s5161_s24] ss:$12 sps:$4 sm:$0xff]  }
  0xc7   : > { %4259 = vmatprep.mubr.bf16.mxu0 %v649_v26 }
  0xce   : > { %4260 = vmatmul.mubr.bf16.gmra.mrb[36].mxu0 %v651_v27  ;;  %v4583_v27 = vld [vmem:[%s5161_s24 + $0x1c] ss:$12 sps:$4 sm:$0xff]  }
  0xcf   : > { %4263 = vmatprep.mubr.bf16.mxu0 %v653_v28 }
  0xd6   : > { %4264 = vmatmul.mubr.bf16.gmra.mrb[40].mxu0 %v655_v29 }
  0xd7   : > { %4267 = vmatprep.mubr.bf16.mxu0 %v657_v30 }
  0xde   : > { %4268 = vmatmul.mubr.bf16.gmra.mrb[44].mxu0 %v659_v31 }
  0xdf   : > { %4287 = vmatprep.mubr.bf16.mxu0 %v4595_v34 }
 0x159   : > { %v4225_v35 = vpop.f32.mrb[0].mxu0 }
 0x15a   : > { %v903_v36 = vpop.f32.mrb[1].mxu0 }
 0x15b   : > { %v4226_v37 = vpop.f32.mrb[2].mxu0 }
 0x15c   : > { %v1095_v38 = vpack.c.bf16 %v4226_v37, %v4225_v35  ;;  %v906_v39 = vpop.f32.mrb[3].mxu0  ;;  %v4585_v35 = vld [vmem:[%s5161_s24 + $0x18] ss:$12 sps:$4 sm:$0xff]   ;;  %v4586_v37 = vld [vmem:[%s5161_s24 + $0x34] ss:$12 sps:$4 sm:$0xff]  }
 0x15d   : > { %v1094_v40 = vpack.c.bf16 %v906_v39, %v903_v36 }
 0x15f   : > { %1510 = vmatpush1.bf16.msra.mxu1 %v1094_v40 }
 0x160   : > { %1511 = vmatprep.subr.bf16.mxu1 %v4961_v32 }
 0x161   : > { %v4229_v41 = vpop.f32.mrb[4].mxu0 }
 0x162   : > { %v919_v42 = vpop.f32.mrb[5].mxu0 }
 0x163   : > { %v4230_v43 = vpop.f32.mrb[6].mxu0  ;;  %1512 = vmatpush1.bf16.msra.mxu1 %v1095_v38 }
 0x164   : > { %v1097_v44 = vpack.c.bf16 %v4230_v43, %v4229_v41  ;;  %v922_v45 = vpop.f32.mrb[7].mxu0  ;;  %1513 = vmatprep.subr.bf16.mxu1 %v4961_v32  ;;  %v4588_v43 = vld [vmem:[%s5161_s24 + $0x30] ss:$12 sps:$4 sm:$0xff]  }
 0x165   : > { %v1096_v46 = vpack.c.bf16 %v922_v45, %v919_v42  ;;  %v4589_v45 = vld [vmem:[%s5161_s24 + $0x4c] ss:$12 sps:$4 sm:$0xff]  }
 0x167   : > { %1514 = vmatpush1.bf16.msra.mxu1 %v1096_v46 }
 0x168   : > { %1515 = vmatprep.subr.bf16.mxu1 %v4961_v32 }
 0x169   : > { %v4233_v47 = vpop.f32.mrb[8].mxu0 }
 0x16a   : > { %v935_v48 = vpop.f32.mrb[9].mxu0 }
 0x16b   : > { %v4234_v49 = vpop.f32.mrb[10].mxu0  ;;  %1516 = vmatpush1.bf16.msra.mxu1 %v1097_v44 }
 0x16c   : > { %v1099_v50 = vpack.c.bf16 %v4234_v49, %v4233_v47  ;;  %v938_v51 = vpop.f32.mrb[11].mxu0  ;;  %1517 = vmatprep.subr.bf16.mxu1 %v4961_v32 }
 0x16d   : > { %v1098_v52 = vpack.c.bf16 %v938_v51, %v935_v48  ;;  %v4591_v51 = vld [vmem:[%s5161_s24 + $0x48] ss:$12 sps:$4 sm:$0xff]  }
 0x16f   : > { %1518 = vmatpush1.bf16.msra.mxu1 %v1098_v52 }
 0x170   : > { %1519 = vmatprep.subr.bf16.mxu1 %v4961_v32 }
 0x171   : > { %v4237_v53 = vpop.f32.mrb[12].mxu0 }
 0x172   : > { %v951_v54 = vpop.f32.mrb[13].mxu0 }
 0x173   : > { %v4238_v55 = vpop.f32.mrb[14].mxu0  ;;  %1520 = vmatpush1.bf16.msra.mxu1 %v1099_v50 }
 0x174   : > { %v1101_v56 = vpack.c.bf16 %v4238_v55, %v4237_v53  ;;  %v954_v57 = vpop.f32.mrb[15].mxu0  ;;  %1521 = vmatprep.subr.bf16.mxu1 %v4961_v32  ;;  %v4592_v53 = vld [vmem:[%s5161_s24 + $0x64] ss:$12 sps:$4 sm:$0xff]  }
 0x175   : > { %v1100_v58 = vpack.c.bf16 %v954_v57, %v951_v54  ;;  %v4594_v57 = vld [vmem:[%s5161_s24 + $0x60] ss:$12 sps:$4 sm:$0xff]  }
 0x177   : > { %1522 = vmatpush1.bf16.msra.mxu1 %v1100_v58  ;;  %v4596_v58 = vld [vmem:[%s5161_s24 + $0x20] ss:$12 sps:$4 sm:$0xff]  }
 0x178   : > { %1523 = vmatprep.subr.bf16.mxu1 %v4961_v32 }
 0x179   : > { %v4241_v59 = vpop.f32.mrb[16].mxu0 }
 0x17a   : > { %v967_v60 = vpop.f32.mrb[17].mxu0 }
 0x17b   : > { %v4242_v61 = vpop.f32.mrb[18].mxu0  ;;  %1524 = vmatpush1.bf16.msra.mxu1 %v1101_v56 }
 0x17c   : > { %v1103_v62 = vpack.c.bf16 %v4242_v61, %v4241_v59  ;;  %v970_v63 = vpop.f32.mrb[19].mxu0  ;;  %1525 = vmatprep.subr.bf16.mxu1 %v4961_v32  ;;  %v4597_v59 = vld [vmem:[%s5161_s24 + $0x7c] ss:$12 sps:$4 sm:$0xff]   ;;  %v4599_v61 = vld [vmem:[%s5161_s24 + $0x78] ss:$12 sps:$4 sm:$0xff]  }
 0x17d   : > { %v1102_v0 = vpack.c.bf16 %v970_v63, %v967_v60  ;;  %v4600_v60 = vld [vmem:[%s5161_s24 + $0x38] ss:$12 sps:$4 sm:$0xff]   ;;  %v4602_v63 = vld [vmem:[%s5161_s24 + $0x94] ss:$12 sps:$4 sm:$0xff]  }
 0x17f   : > { %1526 = vmatpush1.bf16.msra.mxu1 %v1102_v0  ;;  %v4611_v0 = vld [vmem:[%s5161_s24 + $0x68] ss:$12 sps:$4 sm:$0xff]  }
 0x180   : > { %1527 = vmatprep.subr.bf16.mxu1 %v4961_v32 }
 0x181   : > { %v4245_v1 = vpop.f32.mrb[20].mxu0 }
 0x182   : > { %v983_v2 = vpop.f32.mrb[21].mxu0 }
 0x183   : > { %v4246_v3 = vpop.f32.mrb[22].mxu0  ;;  %1528 = vmatpush1.bf16.msra.mxu1 %v1103_v62  ;;  %v4601_v62 = vld [vmem:[%s5161_s24 + $0x50] ss:$12 sps:$4 sm:$0xff]  }
 0x184   : > { %v1105_v4 = vpack.c.bf16 %v4246_v3, %v4245_v1  ;;  %v986_v5 = vpop.f32.mrb[23].mxu0  ;;  %1529 = vmatprep.subr.bf16.mxu1 %v4961_v32  ;;  %v4604_v1 = vld [vmem:[%s5161_s24 + $0x90] ss:$12 sps:$4 sm:$0xff]   ;;  %v4612_v3 = vld [vmem:[%s5161_s24 + $0x80] ss:$12 sps:$4 sm:$0xff]  }
 0x185   : > { %v1104_v6 = vpack.c.bf16 %v986_v5, %v983_v2  ;;  %v4605_v2 = vld [vmem:[%s5161_s24 + $0xac] ss:$12 sps:$4 sm:$0xff]   ;;  %v4607_v5 = vld [vmem:[%s5161_s24 + $0xa8] ss:$12 sps:$4 sm:$0xff]  }
 0x187   : > { %1530 = vmatpush1.bf16.msra.mxu1 %v1104_v6  ;;  %v4608_v6 = vld [vmem:[%s5161_s24 + $0xc4] ss:$12 sps:$4 sm:$0xff]  }
 0x188   : > { %1531 = vmatprep.subr.bf16.mxu1 %v4961_v32 }
 0x189   : > { %v4249_v7 = vpop.f32.mrb[24].mxu0 }
 0x18a   : > { %v999_v8 = vpop.f32.mrb[25].mxu0 }
 0x18b   : > { %v4250_v10 = vpop.f32.mrb[26].mxu0  ;;  %1532 = vmatpush1.bf16.msra.mxu1 %v1105_v4  ;;  %v4621_v4 = vld [vmem:[%s5161_s24 + $0x98] ss:$12 sps:$4 sm:$0xff]  }
 0x18c   : > { %v1107_v12 = vpack.c.bf16 %v4250_v10, %v4249_v7  ;;  %v1002_v14 = vpop.f32.mrb[27].mxu0  ;;  %1533 = vmatprep.subr.bf16.mxu1 %v4961_v32  ;;  %v4623_v7 = vld [vmem:[%s5161_s24 + $0xb0] ss:$12 sps:$4 sm:$0xff]   ;;  %v4676_v10 = vld [vmem:[%s5169_s28] sm:$0xff]  }
 0x18d   : > { %v1106_v16 = vpack.c.bf16 %v1002_v14, %v999_v8  ;;  %v4626_v8 = vld [vmem:[%s5161_s24 + $0xc8] ss:$12 sps:$4 sm:$0xff]   ;;  %v4610_v14 = vld [vmem:[%s5161_s24 + $0xc0] ss:$12 sps:$4 sm:$0xff]  }
 0x18f   : > { %1534 = vmatpush1.bf16.msra.mxu1 %v1106_v16  ;;  %v4613_v16 = vld [vmem:[%s5161_s24 + $0xdc] ss:$12 sps:$4 sm:$0xff]  }
 0x190   : > { %1535 = vmatprep.subr.bf16.mxu1 %v4961_v32 }
 0x191   : > { %v4253_v17 = vpop.f32.mrb[28].mxu0 }
 0x192   : > { %v1015_v18 = vpop.f32.mrb[29].mxu0 }
 0x193   : > { %v4254_v19 = vpop.f32.mrb[30].mxu0  ;;  %1536 = vmatpush1.bf16.msra.mxu1 %v1107_v12  ;;  %v4677_v12 = vld [vmem:[%s5169_s28 + $0x8] sm:$0xff]  }
 0x194   : > { %v1109_v20 = vpack.c.bf16 %v4254_v19, %v4253_v17  ;;  %v1018_v21 = vpop.f32.mrb[31].mxu0  ;;  %1537 = vmatprep.subr.bf16.mxu1 %v4961_v32  ;;  %v4628_v17 = vld [vmem:[%s5161_s24 + $0xe0] ss:$12 sps:$4 sm:$0xff]   ;;  %v4615_v19 = vld [vmem:[%s5161_s24 + $0xd8] ss:$12 sps:$4 sm:$0xff]  }
 0x195   : > { %v1108_v22 = vpack.c.bf16 %v1018_v21, %v1015_v18  ;;  %v4631_v18 = vld [vmem:[%s5161_s24 + $0xf8] ss:$12 sps:$4 sm:$0xff]   ;;  %v4633_v21 = vld [vmem:[%s5161_s24 + $0x110] ss:$12 sps:$4 sm:$0xff]  }
 0x197   : > { %1538 = vmatpush1.bf16.msra.mxu1 %v1108_v22  ;;  %v4636_v22 = vld [vmem:[%s5161_s24 + $0x128] ss:$12 sps:$4 sm:$0xff]  }
 0x198   : > { %1539 = vmatprep.subr.bf16.mxu1 %v4961_v32 }
 0x199   : > { %v4257_v23 = vpop.f32.mrb[32].mxu0 }
 0x19a   : > { %v1031_v24 = vpop.f32.mrb[33].mxu0 }
 0x19b   : > { %v4258_v26 = vpop.f32.mrb[34].mxu0  ;;  %1540 = vmatpush1.bf16.msra.mxu1 %v1109_v20  ;;  %v4616_v20 = vld [vmem:[%s5161_s24 + $0xf4] ss:$12 sps:$4 sm:$0xff]  }
 0x19c   : > { %v1111_v28 = vpack.c.bf16 %v4258_v26, %v4257_v23  ;;  %v1034_v29 = vpop.f32.mrb[35].mxu0  ;;  %2447 = vmatprep.subr.bf16.mxu1 %v4961_v32  ;;  %v4618_v23 = vld [vmem:[%s5161_s24 + $0xf0] ss:$12 sps:$4 sm:$0xff]   ;;  %v4641_v26 = vld [vmem:[%s5161_s24 + $0x158] ss:$12 sps:$4 sm:$0xff]  }
 0x19d   : > { %v1110_v30 = vpack.c.bf16 %v1034_v29, %v1031_v24  ;;  %v4619_v24 = vld [vmem:[%s5161_s24 + $0x10c] ss:$12 sps:$4 sm:$0xff]   ;;  %v4624_v29 = vld [vmem:[%s5161_s24 + $0x124] ss:$12 sps:$4 sm:$0xff]  }
 0x19e   : > { %1542 = vmatmul.mubr.bf16.vlgmr.msra.gmra.mrb[0].mxu1 %v4580_v25  ;;  %v4638_v25 = vld [vmem:[%s5161_s24 + $0x140] ss:$12 sps:$4 sm:$0xff]  }
 0x19f   : > { %4271 = vmatprep.subr.bf16.mxu0 %v1110_v30  ;;  %1549 = vmatprep.mubr.bf16.mxu1 %v4583_v27  ;;  %v4622_v27 = vld [vmem:[%s5161_s24 + $0x108] ss:$12 sps:$4 sm:$0xff]  }
 0x1a0   : > { %4272 = vmatpush3.bf16.msra.mxu0 %v1110_v30  ;;  %v4643_v30 = vld [vmem:[%s5161_s24 + $0x170] ss:$12 sps:$4 sm:$0xff]  }
 0x1a1   : > { %v4261_v31 = vpop.f32.mrb[36].mxu0  ;;  %4273 = vmatprep.subr.bf16.mxu0 %v1111_v28 }
 0x1a2   : > { %v1047_v34 = vpop.f32.mrb[37].mxu0 }
 0x1a3   : > { %v4262_v36 = vpop.f32.mrb[38].mxu0 }
 0x1a4   : > { %v1113_v38 = vpack.c.bf16 %v4262_v36, %v4261_v31  ;;  %v1050_v39 = vpop.f32.mrb[39].mxu0  ;;  %4274 = vmatpush3.bf16.msra.mxu0 %v1111_v28  ;;  %v4678_v28 = vld [vmem:[%s5169_s28 + $0x10] sm:$0xff]   ;;  %v4680_v36 = vld [vmem:[%s5169_s28 + $0x20] sm:$0xff]  }
 0x1a5   : > { %v1112_v40 = vpack.c.bf16 %v1050_v39, %v1047_v34  ;;  %v4658_v31 = vld [vmem:[%s5161_s24 + $0x188] ss:$12 sps:$4 sm:$0xff]   ;;  %v4679_v34 = vld [vmem:[%s5169_s28 + $0x18] sm:$0xff]  }
 0x1a6   : > { %1550 = vmatmul.mubr.bf16.gmra.mrb[4].mxu1 %v4585_v35  ;;  %v4627_v35 = vld [vmem:[%s5161_s24 + $0x120] ss:$12 sps:$4 sm:$0xff]   ;;  %v4663_v39 = vld [vmem:[%s5161_s24 + $0x1b8] ss:$12 sps:$4 sm:$0xff]  }
 0x1a7   : > { %4275 = vmatprep.subr.bf16.mxu0 %v1112_v40  ;;  %1557 = vmatprep.mubr.bf16.mxu1 %v4586_v37  ;;  %v4629_v37 = vld [vmem:[%s5161_s24 + $0x13c] ss:$12 sps:$4 sm:$0xff]  }
 0x1a8   : > { %4276 = vmatpush3.bf16.msra.mxu0 %v1112_v40  ;;  %v4632_v40 = vld [vmem:[%s5161_s24 + $0x138] ss:$12 sps:$4 sm:$0xff]  }
 0x1a9   : > { %v4265_v41 = vpop.f32.mrb[40].mxu0  ;;  %4277 = vmatprep.subr.bf16.mxu0 %v1113_v38 }
 0x1aa   : > { %v1063_v42 = vpop.f32.mrb[41].mxu0 }
 0x1ab   : > { %v4266_v44 = vpop.f32.mrb[42].mxu0 }
 0x1ac   : > { %v1115_v46 = vpack.c.bf16 %v4266_v44, %v4265_v41  ;;  %v1066_v47 = vpop.f32.mrb[43].mxu0  ;;  %4278 = vmatpush3.bf16.msra.mxu0 %v1113_v38  ;;  %v4660_v38 = vld [vmem:[%s5161_s24 + $0x1a0] ss:$12 sps:$4 sm:$0xff]   ;;  %v4637_v44 = vld [vmem:[%s5161_s24 + $0x150] ss:$12 sps:$4 sm:$0xff]  }
 0x1ad   : > { %v1114_v48 = vpack.c.bf16 %v1066_v47, %v1063_v42  ;;  %v4634_v41 = vld [vmem:[%s5161_s24 + $0x154] ss:$12 sps:$4 sm:$0xff]   ;;  %v4665_v42 = vld [vmem:[%s5161_s24 + $0x1d0] ss:$12 sps:$4 sm:$0xff]   ;;  %v4673_v47 = vld [vmem:[%s5161_s24 + $0x218] ss:$12 sps:$4 sm:$0xff]  }
 0x1ae   : > { %1558 = vmatmul.mubr.bf16.gmra.mrb[8].mxu1 %v4588_v43  ;;  %v4668_v43 = vld [vmem:[%s5161_s24 + $0x1e8] ss:$12 sps:$4 sm:$0xff]  }
 0x1af   : > { %4279 = vmatprep.subr.bf16.mxu0 %v1114_v48  ;;  %1565 = vmatprep.mubr.bf16.mxu1 %v4589_v45  ;;  %v4639_v45 = vld [vmem:[%s5161_s24 + $0x16c] ss:$12 sps:$4 sm:$0xff]  }
 0x1b0   : > { %4280 = vmatpush3.bf16.msra.mxu0 %v1114_v48  ;;  %v4681_v48 = vld [vmem:[%s5169_s28 + $0x28] sm:$0xff]  }
 0x1b1   : > { %v4269_v49 = vpop.f32.mrb[44].mxu0  ;;  %4281 = vmatprep.subr.bf16.mxu0 %v1115_v46 }
 0x1b2   : > { %v1079_v50 = vpop.f32.mrb[45].mxu0 }
 0x1b3   : > { %v4270_v52 = vpop.f32.mrb[46].mxu0 }
 0x1b4   : > { %v1117_v54 = vpack.c.bf16 %v4270_v52, %v4269_v49  ;;  %v1082_v55 = vpop.f32.mrb[47].mxu0  ;;  %4282 = vmatpush3.bf16.msra.mxu0 %v1115_v46  ;;  %v4670_v46 = vld [vmem:[%s5161_s24 + $0x200] ss:$12 sps:$4 sm:$0xff]   ;;  %v4642_v49 = vld [vmem:[%s5161_s24 + $0x168] ss:$12 sps:$4 sm:$0xff]  }
 0x1b5   : > { %v1116_v56 = vpack.c.bf16 %v1082_v55, %v1079_v50  ;;  %v4644_v50 = vld [vmem:[%s5161_s24 + $0x184] ss:$12 sps:$4 sm:$0xff]   ;;  %v4647_v55 = vld [vmem:[%s5161_s24 + $0x19c] ss:$12 sps:$4 sm:$0xff]  }
 0x1b6   : > { %1566 = vmatmul.mubr.bf16.gmra.mrb[12].mxu1 %v4591_v51  ;;  %v4675_v51 = vld [vmem:[%s5161_s24 + $0x230] ss:$12 sps:$4 sm:$0xff]  }
 0x1b7   : > { %4283 = vmatprep.subr.bf16.mxu0 %v1116_v56  ;;  %1573 = vmatprep.mubr.bf16.mxu1 %v4592_v53  ;;  %v4682_v52 = vld [vmem:[%s5169_s28 + $0x30] sm:$0xff]   ;;  %v4683_v53 = vld [vmem:[%s5169_s28 + $0x38] sm:$0xff]   ;;  %s3932_s28 = sshll.u32 %s5157_s17, 4 }
 0x1b8   : > { %4284 = vmatpush3.bf16.msra.mxu0 %v1116_v56  ;;  %v4649_v56 = vld [vmem:[%s5161_s24 + $0x198] ss:$12 sps:$4 sm:$0xff]  }
 0x1b9   : > { %4285 = vmatprep.subr.bf16.mxu0 %v1117_v54 }
 0x1bc   : > { %4286 = vmatpush3.bf16.msra.mxu0 %v1117_v54  ;;  %v4646_v54 = vld [vmem:[%s5161_s24 + $0x180] ss:$12 sps:$4 sm:$0xff]  }
 0x1bd   : > { %4335 = vmatprep.subr.bf16.mxu0 %v4676_v10 }
 0x1be   : > { %1574 = vmatmul.mubr.bf16.gmra.mrb[16].mxu1 %v4594_v57  ;;  %v4650_v57 = vld [vmem:[%s5161_s24 + $0x1b4] ss:$12 sps:$4 sm:$0xff]  }
 0x1bf   : > { %4288 = vmatmul.mubr.bf16.vlgmr.msra.gmra.mrb[48].mxu0 %v4596_v58  ;;  %1581 = vmatprep.mubr.bf16.mxu1 %v4597_v59  ;;  %v4652_v58 = vld [vmem:[%s5161_s24 + $0x1b0] ss:$12 sps:$4 sm:$0xff]   ;;  %v4653_v59 = vld [vmem:[%s5161_s24 + $0x1cc] ss:$12 sps:$4 sm:$0xff]  }
 0x1c0   : > { %4291 = vmatprep.mubr.bf16.mxu0 %v4600_v60  ;;  %4336 = vmatpush3.bf16.msra.mxu0 %v4676_v10  ;;  %v4655_v60 = vld [vmem:[%s5161_s24 + $0x1c8] ss:$12 sps:$4 sm:$0xff]  }
 0x1c1   : > { %4337 = vmatprep.subr.bf16.mxu0 %v4677_v12 }
 0x1c4   : > { %4338 = vmatpush3.bf16.msra.mxu0 %v4677_v12 }
 0x1c5   : > { %4339 = vmatprep.subr.bf16.mxu0 %v4678_v28 }
 0x1c6   : > { %1582 = vmatmul.mubr.bf16.gmra.mrb[20].mxu1 %v4599_v61  ;;  %v4656_v61 = vld [vmem:[%s5161_s24 + $0x1e4] ss:$12 sps:$4 sm:$0xff]  }
 0x1c7   : > { %4292 = vmatmul.mubr.bf16.gmra.mrb[52].mxu0 %v4601_v62  ;;  %1589 = vmatprep.mubr.bf16.mxu1 %v4602_v63  ;;  %v4659_v62 = vld [vmem:[%s5161_s24 + $0x1e0] ss:$12 sps:$4 sm:$0xff]   ;;  %v4661_v63 = vld [vmem:[%s5161_s24 + $0x1fc] ss:$12 sps:$4 sm:$0xff]  }
 0x1c8   : > { %4295 = vmatprep.mubr.bf16.mxu0 %v4611_v0  ;;  %4340 = vmatpush3.bf16.msra.mxu0 %v4678_v28  ;;  %v4664_v0 = vld [vmem:[%s5161_s24 + $0x1f8] ss:$12 sps:$4 sm:$0xff]  }
 0x1c9   : > { %4341 = vmatprep.subr.bf16.mxu0 %v4679_v34 }
 0x1cc   : > { %4342 = vmatpush3.bf16.msra.mxu0 %v4679_v34 }
 0x1cd   : > { %4343 = vmatprep.subr.bf16.mxu0 %v4680_v36 }
 0x1ce   : > { %1590 = vmatmul.mubr.bf16.gmra.mrb[24].mxu1 %v4604_v1  ;;  %v4666_v1 = vld [vmem:[%s5161_s24 + $0x214] ss:$12 sps:$4 sm:$0xff]  }
 0x1cf   : > { %1597 = vmatprep.mubr.bf16.mxu1 %v4605_v2  ;;  %4296 = vmatmul.mubr.bf16.gmra.mrb[56].mxu0 %v4612_v3  ;;  %v4669_v2 = vld [vmem:[%s5161_s24 + $0x210] ss:$12 sps:$4 sm:$0xff]   ;;  %v4671_v3 = vld [vmem:[%s5161_s24 + $0x22c] ss:$12 sps:$4 sm:$0xff]  }
 0x1d0   : > { %4299 = vmatprep.mubr.bf16.mxu0 %v4621_v4  ;;  %4344 = vmatpush3.bf16.msra.mxu0 %v4680_v36  ;;  %v4674_v4 = vld [vmem:[%s5161_s24 + $0x228] ss:$12 sps:$4 sm:$0xff]   ;;  %v4732_v36 = vld [vmem:[%s5187_s18] sm:$0xff]  }
 0x1d1   : > { %4345 = vmatprep.subr.bf16.mxu0 %v4681_v48 }
 0x1d4   : > { %4346 = vmatpush3.bf16.msra.mxu0 %v4681_v48 }
 0x1d5   : > { %4347 = vmatprep.subr.bf16.mxu0 %v4682_v52 }
 0x1d6   : > { %1598 = vmatmul.mubr.bf16.gmra.mrb[28].mxu1 %v4607_v5 }
 0x1d7   : > { %1605 = vmatprep.mubr.bf16.mxu1 %v4608_v6  ;;  %4300 = vmatmul.mubr.bf16.gmra.mrb[60].mxu0 %v4623_v7 }
 0x1d8   : > { %4303 = vmatprep.mubr.bf16.mxu0 %v4626_v8  ;;  %4348 = vmatpush3.bf16.msra.mxu0 %v4682_v52 }
 0x1d9   : > { %4349 = vmatprep.subr.bf16.mxu0 %v4683_v53 }
 0x1dc   : > { %4350 = vmatpush3.bf16.msra.mxu0 %v4683_v53 }
 0x1de   : > { %1606 = vmatmul.mubr.bf16.gmra.mrb[32].mxu1 %v4610_v14 }
 0x1df   : > { %1613 = vmatprep.mubr.bf16.mxu1 %v4613_v16  ;;  %4304 = vmatmul.mubr.bf16.gmra.mrb[64].mxu0 %v4628_v17 }
 0x1e0   : > { %4307 = vmatprep.mubr.bf16.mxu0 %v4631_v18 }
 0x1e6   : > { %1614 = vmatmul.mubr.bf16.gmra.mrb[36].mxu1 %v4615_v19 }
 0x1e7   : > { %1621 = vmatprep.mubr.bf16.mxu1 %v4616_v20  ;;  %4308 = vmatmul.mubr.bf16.gmra.mrb[68].mxu0 %v4633_v21 }
 0x1e8   : > { %4311 = vmatprep.mubr.bf16.mxu0 %v4636_v22 }
 0x1ee   : > { %1622 = vmatmul.mubr.bf16.gmra.mrb[40].mxu1 %v4618_v23 }
 0x1ef   : > { %1629 = vmatprep.mubr.bf16.mxu1 %v4619_v24  ;;  %4312 = vmatmul.mubr.bf16.gmra.mrb[72].mxu0 %v4638_v25  ;;  %v5332_v24 = vld [vmem:[%s498_s15] ss:$0 sm:$0xff] }
 0x1f0   : > { %4315 = vmatprep.mubr.bf16.mxu0 %v4641_v26 }
 0x1f6   : > { %1630 = vmatmul.mubr.bf16.gmra.mrb[44].mxu1 %v4622_v27 }
 0x1f7   : > { %1637 = vmatprep.mubr.bf16.mxu1 %v4624_v29  ;;  %4316 = vmatmul.mubr.bf16.gmra.mrb[76].mxu0 %v4643_v30 }
 0x1f8   : > { %4319 = vmatprep.mubr.bf16.mxu0 %v4658_v31 }
 0x1fe   : > { %1638 = vmatmul.mubr.bf16.gmra.mrb[48].mxu1 %v4627_v35 }
 0x1ff   : > { %1645 = vmatprep.mubr.bf16.mxu1 %v4629_v37  ;;  %4320 = vmatmul.mubr.bf16.gmra.mrb[80].mxu0 %v4660_v38  ;;  %v2007_v37 = vunpack.c.l.bf16 %v4732_v36 }
 0x200   : > { %4323 = vmatprep.mubr.bf16.mxu0 %v4663_v39 }
 0x206   : > { %1646 = vmatmul.mubr.bf16.gmra.mrb[52].mxu1 %v4632_v40 }
 0x207   : > { %1653 = vmatprep.mubr.bf16.mxu1 %v4634_v41  ;;  %4324 = vmatmul.mubr.bf16.gmra.mrb[84].mxu0 %v4665_v42 }
 0x208   : > { %4327 = vmatprep.mubr.bf16.mxu0 %v4668_v43  ;;  %v2009_v43 = vunpack.c.l.bf16 %v5191_v9 }
 0x20e   : > { %1654 = vmatmul.mubr.bf16.gmra.mrb[56].mxu1 %v4637_v44 }
 0x20f   : > { %1661 = vmatprep.mubr.bf16.mxu1 %v4639_v45  ;;  %4328 = vmatmul.mubr.bf16.gmra.mrb[88].mxu0 %v4670_v46  ;;  %v2010_v45 = vunpack.c.h.bf16 %v5191_v9 }
 0x210   : > { %4331 = vmatprep.mubr.bf16.mxu0 %v4673_v47  ;;  %v2008_v47 = vunpack.c.h.bf16 %v4732_v36 }
 0x216   : > { %1662 = vmatmul.mubr.bf16.gmra.mrb[60].mxu1 %v4642_v49 }
 0x217   : > { %1669 = vmatprep.mubr.bf16.mxu1 %v4644_v50  ;;  %4332 = vmatmul.mubr.bf16.gmra.mrb[92].mxu0 %v4675_v51 }
 0x21e   : > { %1670 = vmatmul.mubr.bf16.gmra.mrb[64].mxu1 %v4646_v54 }
 0x21f   : > { %1677 = vmatprep.mubr.bf16.mxu1 %v4647_v55 }
 0x226   : > { %1678 = vmatmul.mubr.bf16.gmra.mrb[68].mxu1 %v4649_v56 }
 0x227   : > { %1685 = vmatprep.mubr.bf16.mxu1 %v4650_v57 }
 0x22e   : > { %1686 = vmatmul.mubr.bf16.gmra.mrb[72].mxu1 %v4652_v58 }
 0x22f   : > { %1693 = vmatprep.mubr.bf16.mxu1 %v4653_v59 }
 0x236   : > { %1694 = vmatmul.mubr.bf16.gmra.mrb[76].mxu1 %v4655_v60 }
 0x237   : > { %1701 = vmatprep.mubr.bf16.mxu1 %v4656_v61 }
 0x23e   : > { %1702 = vmatmul.mubr.bf16.gmra.mrb[80].mxu1 %v4659_v62 }
 0x23f   : > { %1709 = vmatprep.mubr.bf16.mxu1 %v4661_v63 }
 0x246   : > { %1710 = vmatmul.mubr.bf16.gmra.mrb[84].mxu1 %v4664_v0 }
 0x247   : > { %1717 = vmatprep.mubr.bf16.mxu1 %v4666_v1 }
 0x24e   : > { %1718 = vmatmul.mubr.bf16.gmra.mrb[88].mxu1 %v4669_v2 }
 0x24f   : > { %1725 = vmatprep.mubr.bf16.mxu1 %v4671_v3 }
 0x256   : > { %1726 = vmatmul.mubr.bf16.gmra.mrb[92].mxu1 %v4674_v4 }
 0x257   : > { %2479 = vmatprep.mubr.bf16.mxu1 %v5229_v33 }
 0x271   : > { %v1543_v5 = vpop.f32.mrb[0].mxu1 }
 0x272   : > { %v1545_v6 = vpop.f32.mrb[1].mxu1  ;;  %v1544_v27 = vadd.f32 %v5332_v24, %v1543_v5 }
 0x273   : > { %v1546_v7 = vpop.f32.mrb[2].mxu1 }
 0x274   : > { %v1548_v8 = vpop.f32.mrb[3].mxu1  ;;  %v1547_v38 = vadd.f32 %v5332_v24, %v1546_v7  ;;  %v2013_v7 = vunpack.c.l.bf16 %v5195_v11 }
 0x279   : > { %v1551_v10 = vpop.f32.mrb[4].mxu1 }
 0x27a   : > { %v1553_v12 = vpop.f32.mrb[5].mxu1  ;;  %v1552_v25 = vadd.f32 %v5332_v24, %v1551_v10  ;;  %v2014_v10 = vunpack.c.h.bf16 %v5195_v11 }
 0x27b   : > { %v1554_v14 = vpop.f32.mrb[6].mxu1 }
 0x27c   : > { %v1556_v16 = vpop.f32.mrb[7].mxu1  ;;  %v1555_v30 = vadd.f32 %v5332_v24, %v1554_v14 }
 0x27d   : > { %v4733_v16 = vld [vmem:[%s5187_s18 + $0x10] sm:$0xff]  }
 0x281   : > { %v1559_v17 = vpop.f32.mrb[8].mxu1 }
 0x282   : > { %v1561_v18 = vpop.f32.mrb[9].mxu1  ;;  %v1560_v58 = vadd.f32 %v5332_v24, %v1559_v17  ;;  %v2011_v17 = vunpack.c.l.bf16 %v4733_v16 }
 0x283   : > { %v1562_v19 = vpop.f32.mrb[10].mxu1 }
 0x284   : > { %v1564_v20 = vpop.f32.mrb[11].mxu1  ;;  %v1563_v1 = vadd.f32 %v5332_v24, %v1562_v19 }
 0x285   : > { %v2012_v20 = vunpack.c.h.bf16 %v4733_v16 }
 0x289   : > { %v1567_v21 = vpop.f32.mrb[12].mxu1 }
 0x28a   : > { %v1569_v22 = vpop.f32.mrb[13].mxu1  ;;  %v1568_v55 = vadd.f32 %v5332_v24, %v1567_v21 }
 0x28b   : > { %v1570_v23 = vpop.f32.mrb[14].mxu1 }
 0x28c   : > { %v1572_v33 = vpop.f32.mrb[15].mxu1  ;;  %v1571_v63 = vadd.f32 %v5332_v24, %v1570_v23 }
 0x291   : > { %v5335_v26 = vpop.f32.mrb[16].mxu1 }
 0x292   : > { %v4289_v28 = vpop.f32.mrb[48].mxu0  ;;  %v1577_v29 = vpop.f32.mrb[17].mxu1  ;;  %v1576_v11 = vadd.f32 %v5332_v24, %v5335_v26 }
 0x293   : > { %v1777_v31 = vadd.f32 %v4289_v28, %v1552_v25  ;;  %v1768_v34 = vpop.f32.mrb[49].mxu0  ;;  %v5339_v35 = vpop.f32.mrb[18].mxu1 }
 0x294   : > { %v1769_v39 = vadd.f32 %v1768_v34, %v1544_v27  ;;  %v4290_v40 = vpop.f32.mrb[50].mxu0  ;;  %v1580_v41 = vpop.f32.mrb[19].mxu1 }
 0x295   : > { %v1961_v42 = vmax.f32 %v1777_v31, 0.0  ;;  %v1780_v44 = vadd.f32 %v4290_v40, %v1555_v30  ;;  %v1771_v46 = vpop.f32.mrb[51].mxu0  ;;  %v1579_v40 = vadd.f32 %v5332_v24, %v5339_v35 }
 0x296   : > { %v1959_v48 = vmax.f32 %v1769_v39, 0.0  ;;  %v1772_v49 = vadd.f32 %v1771_v46, %v1547_v38  ;;  %v2018_v46 = vunpack.c.h.bf16 %v5200_v13 }
 0x297   : > { %v1962_v50 = vmax.f32 %v1780_v44, 0.0  ;;  %v2057_v53 = vadd.f32 %v2009_v43, %v1961_v42 }
 0x298   : > { %v2055_v51 = vadd.f32 %v2007_v37, %v1959_v48  ;;  %v1960_v52 = vmax.f32 %v1772_v49, 0.0  ;;  %v4734_v49 = vld [vmem:[%s5187_s18 + $0x20] sm:$0xff]  }
 0x299   : > { %v2058_v54 = vadd.f32 %v2010_v45, %v1962_v50  ;;  %v1583_v56 = vpop.f32.mrb[20].mxu1  ;;  %v2017_v45 = vunpack.c.l.bf16 %v5200_v13  ;;  %v2015_v50 = vunpack.c.l.bf16 %v4734_v49 }
 0x29a   : > { %v2056_v57 = vadd.f32 %v2008_v47, %v1960_v52  ;;  %v4293_v59 = vpop.f32.mrb[52].mxu0  ;;  %v1585_v60 = vpop.f32.mrb[21].mxu1  ;;  %v1584_v33 = vadd.f32 %v5332_v24, %v1583_v56  ;;  %v2016_v52 = vunpack.c.h.bf16 %v4734_v49 }
 0x29b   : > { %v2104_v61 = vpack.c.bf16 %v2058_v54, %v2057_v53  ;;  %v1793_v62 = vadd.f32 %v4293_v59, %v1568_v55  ;;  %v1784_v9 = vpop.f32.mrb[53].mxu0  ;;  %v1586_v0 = vpop.f32.mrb[22].mxu1 }
 0x29c   : > { %v2103_v2 = vpack.c.bf16 %v2056_v57, %v2055_v51  ;;  %v1785_v3 = vadd.f32 %v1784_v9, %v1560_v58  ;;  %v4294_v4 = vpop.f32.mrb[54].mxu0  ;;  %v1588_v5 = vpop.f32.mrb[23].mxu1  ;;  %v1587_v37 = vadd.f32 %v5332_v24, %v1586_v0 }
 0x29d   : > { %v1965_v6 = vmax.f32 %v1793_v62, 0.0  ;;  %v1796_v8 = vadd.f32 %v4294_v4, %v1571_v63  ;;  %v1787_v12 = vpop.f32.mrb[55].mxu0 }
 0x29e   : > { %4351 = vmatprep.mubr.bf16.mxu0 %v2103_v2  ;;  %v1963_v14 = vmax.f32 %v1785_v3, 0.0  ;;  %v1788_v18 = vadd.f32 %v1787_v12, %v1563_v1  ;;  %v2022_v12 = vunpack.c.h.bf16 %v5205_v15 }
 0x29f   : > { %4352 = vmatmul.mubr.bf16.vlgmr.msra.gmra.mrb[96].mxu0 %v2104_v61  ;;  %v1966_v21 = vmax.f32 %v1796_v8, 0.0  ;;  %v2061_v22 = vadd.f32 %v2013_v7, %v1965_v6  ;;  %v2021_v7 = vunpack.c.l.bf16 %v5205_v15  ;;  %v4735_v8 = vld [vmem:[%s5187_s18 + $0x30] sm:$0xff]  }
 0x2a0   : > { %v1964_v19 = vmax.f32 %v1788_v18, 0.0  ;;  %v2059_v27 = vadd.f32 %v2011_v17, %v1963_v14  ;;  %v2020_v16 = vunpack.c.h.bf16 %v4735_v8 }
 0x2a1   : > { %v2062_v23 = vadd.f32 %v2014_v10, %v1966_v21  ;;  %v1591_v25 = vpop.f32.mrb[24].mxu1  ;;  %v2019_v10 = vunpack.c.l.bf16 %v4735_v8 }
 0x2a2   : > { %v2060_v28 = vadd.f32 %v2012_v20, %v1964_v19  ;;  %v4297_v29 = vpop.f32.mrb[56].mxu0  ;;  %v1593_v30 = vpop.f32.mrb[25].mxu1  ;;  %v1592_v59 = vadd.f32 %v5332_v24, %v1591_v25 }
 0x2a3   : > { %v2106_v31 = vpack.c.bf16 %v2062_v23, %v2061_v22  ;;  %v1809_v34 = vadd.f32 %v4297_v29, %v1584_v33  ;;  %v1800_v36 = vpop.f32.mrb[57].mxu0  ;;  %v1594_v38 = vpop.f32.mrb[26].mxu1 }
 0x2a4   : > { %v2105_v39 = vpack.c.bf16 %v2060_v28, %v2059_v27  ;;  %v1801_v41 = vadd.f32 %v1800_v36, %v1576_v11  ;;  %v4298_v42 = vpop.f32.mrb[58].mxu0  ;;  %v1596_v43 = vpop.f32.mrb[27].mxu1  ;;  %v1595_v9 = vadd.f32 %v5332_v24, %v1594_v38 }
 0x2a5   : > { %v1969_v44 = vmax.f32 %v1809_v34, 0.0  ;;  %v1812_v26 = vadd.f32 %v4298_v42, %v1587_v37  ;;  %v1803_v47 = vpop.f32.mrb[59].mxu0  ;;  %v4736_v43 = vld [vmem:[%s5187_s18 + $0x40] sm:$0xff]  }
 0x2a6   : > { %4355 = vmatprep.mubr.bf16.mxu0 %v2105_v39  ;;  %v1967_v48 = vmax.f32 %v1801_v41, 0.0  ;;  %v1804_v51 = vadd.f32 %v1803_v47, %v1579_v40 }
 0x2a7   : > { %4356 = vmatmul.mubr.bf16.gmra.mrb[100].mxu0 %v2106_v31  ;;  %v1970_v53 = vmax.f32 %v1812_v26, 0.0  ;;  %v2065_v35 = vadd.f32 %v2017_v45, %v1969_v44  ;;  %v2023_v44 = vunpack.c.l.bf16 %v4736_v43  ;;  %v2024_v26 = vunpack.c.h.bf16 %v4736_v43 }
 0x2a8   : > { %v1968_v54 = vmax.f32 %v1804_v51, 0.0  ;;  %v2063_v57 = vadd.f32 %v2015_v50, %v1967_v48 }
 0x2a9   : > { %v2066_v55 = vadd.f32 %v2018_v46, %v1970_v53  ;;  %v1599_v56 = vpop.f32.mrb[28].mxu1 }
 0x2aa   : > { %v2064_v58 = vadd.f32 %v2016_v52, %v1968_v54  ;;  %v1600_v13 = vadd.f32 %v5332_v24, %v1599_v56  ;;  %v4301_v60 = vpop.f32.mrb[60].mxu0  ;;  %v1601_v61 = vpop.f32.mrb[29].mxu1 }
 0x2ab   : > { %v2108_v62 = vpack.c.bf16 %v2066_v55, %v2065_v35  ;;  %v1816_v63 = vpop.f32.mrb[61].mxu0  ;;  %v1602_v0 = vpop.f32.mrb[30].mxu1 }
 0x2ac   : > { %v2107_v1 = vpack.c.bf16 %v2064_v58, %v2063_v57  ;;  %v1825_v2 = vadd.f32 %v4301_v60, %v1600_v13  ;;  %v1817_v3 = vadd.f32 %v1816_v63, %v1592_v59  ;;  %v1603_v4 = vadd.f32 %v5332_v24, %v1602_v0  ;;  %v4302_v5 = vpop.f32.mrb[62].mxu0  ;;  %v1604_v6 = vpop.f32.mrb[31].mxu1  ;;  %v4737_v60 = vld [vmem:[%s5187_s18 + $0x48] sm:$0xff]  }
 0x2ad   : > { %v1819_v14 = vpop.f32.mrb[63].mxu0  ;;  %v2025_v61 = vunpack.c.l.bf16 %v4737_v60 }
 0x2ae   : > { %4359 = vmatprep.mubr.bf16.mxu0 %v2107_v1  ;;  %v1973_v17 = vmax.f32 %v1825_v2, 0.0  ;;  %v1971_v18 = vmax.f32 %v1817_v3, 0.0  ;;  %v1828_v20 = vadd.f32 %v4302_v5, %v1603_v4  ;;  %v1820_v21 = vadd.f32 %v1819_v14, %v1595_v9 }
 0x2af   : > { %4360 = vmatmul.mubr.bf16.gmra.mrb[104].mxu0 %v2108_v62  ;;  %v2026_v9 = vunpack.c.h.bf16 %v4737_v60 }
 0x2b0   : > { %v1974_v19 = vmax.f32 %v1828_v20, 0.0  ;;  %v1972_v22 = vmax.f32 %v1820_v21, 0.0  ;;  %v2069_v23 = vadd.f32 %v2021_v7, %v1973_v17  ;;  %v2067_v25 = vadd.f32 %v2019_v10, %v1971_v18  ;;  %v4738_v20 = vld [vmem:[%s5187_s18 + $0x50] sm:$0xff]  }
 0x2b1   : > { %v1607_v33 = vpop.f32.mrb[32].mxu1  ;;  %v2027_v21 = vunpack.c.l.bf16 %v4738_v20 }
 0x2b2   : > { %v2070_v27 = vadd.f32 %v2022_v12, %v1974_v19  ;;  %v2068_v28 = vadd.f32 %v2020_v16, %v1972_v22  ;;  %v1608_v11 = vadd.f32 %v5332_v24, %v1607_v33  ;;  %v1609_v29 = vpop.f32.mrb[33].mxu1  ;;  %v4305_v15 = vpop.f32.mrb[64].mxu0  ;;  %v2028_v22 = vunpack.c.h.bf16 %v4738_v20  ;;  %v4741_v20 = vld [vmem:[%s5187_s18 + $0x68] sm:$0xff]  }
 0x2b3   : > { %v1610_v30 = vpop.f32.mrb[34].mxu1  ;;  %v1832_v31 = vpop.f32.mrb[65].mxu0 }
 0x2b4   : > { %v1611_v34 = vadd.f32 %v5332_v24, %v1610_v30  ;;  %v1612_v36 = vpop.f32.mrb[35].mxu1  ;;  %v1833_v37 = vadd.f32 %v1832_v31, %v1608_v11  ;;  %v4306_v38 = vpop.f32.mrb[66].mxu0  ;;  %v2109_v39 = vpack.c.bf16 %v2068_v28, %v2067_v25  ;;  %v2110_v40 = vpack.c.bf16 %v2070_v27, %v2069_v23 }
 0x2b5   : > { %v1835_v41 = vpop.f32.mrb[67].mxu0 }
 0x2b6   : > { %v1975_v42 = vmax.f32 %v1833_v37, 0.0  ;;  %v1836_v45 = vadd.f32 %v1835_v41, %v1611_v34  ;;  %4363 = vmatprep.mubr.bf16.mxu0 %v2109_v39  ;;  %v4739_v41 = vld [vmem:[%s5187_s18 + $0x58] sm:$0xff]  }
 0x2b7   : > { %4364 = vmatmul.mubr.bf16.gmra.mrb[108].mxu0 %v2110_v40 }
 0x2b8   : > { %v1976_v46 = vmax.f32 %v1836_v45, 0.0  ;;  %v2071_v50 = vadd.f32 %v2023_v44, %v1975_v42  ;;  %v2029_v42 = vunpack.c.l.bf16 %v4739_v41  ;;  %v2030_v44 = vunpack.c.h.bf16 %v4739_v41 }
 0x2b9   : > { %v1615_v47 = vpop.f32.mrb[36].mxu1 }
 0x2ba   : > { %v1616_v48 = vadd.f32 %v5332_v24, %v1615_v47  ;;  %v1617_v49 = vpop.f32.mrb[37].mxu1  ;;  %v2072_v51 = vadd.f32 %v2024_v26, %v1976_v46  ;;  %v4309_v52 = vpop.f32.mrb[68].mxu0 }
 0x2bb   : > { %v1618_v53 = vpop.f32.mrb[38].mxu1  ;;  %v1848_v54 = vpop.f32.mrb[69].mxu0 }
 0x2bc   : > { %v1841_v35 = vadd.f32 %v4305_v15, %v1616_v48  ;;  %v1619_v55 = vadd.f32 %v5332_v24, %v1618_v53  ;;  %v1620_v56 = vpop.f32.mrb[39].mxu1  ;;  %v4310_v57 = vpop.f32.mrb[70].mxu0  ;;  %v2111_v58 = vpack.c.bf16 %v2072_v51, %v2071_v50 }
 0x2bd   : > { %v1851_v59 = vpop.f32.mrb[71].mxu0 }
 0x2be   : > { %v1977_v13 = vmax.f32 %v1841_v35, 0.0  ;;  %v1844_v62 = vadd.f32 %v4306_v38, %v1619_v55  ;;  %4367 = vmatprep.mubr.bf16.mxu0 %v2111_v58 }
 0x2c0   : > { %v1978_v63 = vmax.f32 %v1844_v62, 0.0  ;;  %v2073_v1 = vadd.f32 %v2025_v61, %v1977_v13 }
 0x2c1   : > { %v1623_v0 = vpop.f32.mrb[40].mxu1 }
 0x2c2   : > { %v2074_v2 = vadd.f32 %v2026_v9, %v1978_v63  ;;  %v1624_v3 = vadd.f32 %v5332_v24, %v1623_v0  ;;  %v1625_v4 = vpop.f32.mrb[41].mxu1  ;;  %v5375_v5 = vpop.f32.mrb[72].mxu0 }
 0x2c3   : > { %v1626_v6 = vpop.f32.mrb[42].mxu1  ;;  %v1864_v7 = vpop.f32.mrb[73].mxu0 }
 0x2c4   : > { %v1627_v8 = vadd.f32 %v5332_v24, %v1626_v6  ;;  %v1628_v10 = vpop.f32.mrb[43].mxu1  ;;  %v1849_v12 = vadd.f32 %v1848_v54, %v1624_v3  ;;  %v2112_v14 = vpack.c.bf16 %v2074_v2, %v2073_v1  ;;  %v5378_v16 = vpop.f32.mrb[74].mxu0 }
 0x2c5   : > { %v1867_v17 = vpop.f32.mrb[75].mxu0 }
 0x2c6   : > { %v1979_v18 = vmax.f32 %v1849_v12, 0.0  ;;  %v1852_v19 = vadd.f32 %v1851_v59, %v1627_v8  ;;  %4368 = vmatmul.mubr.bf16.gmra.mrb[112].mxu0 %v2112_v14  ;;  %v4740_v59 = vld [vmem:[%s5187_s18 + $0x60] sm:$0xff]  }
 0x2c7   : > { %v2031_v13 = vunpack.c.l.bf16 %v4740_v59  ;;  %v2032_v61 = vunpack.c.h.bf16 %v4740_v59 }
 0x2c8   : > { %v1980_v23 = vmax.f32 %v1852_v19, 0.0  ;;  %v2075_v28 = vadd.f32 %v2027_v21, %v1979_v18  ;;  %v2033_v21 = vunpack.c.l.bf16 %v4741_v20 }
 0x2c9   : > { %v1631_v33 = vpop.f32.mrb[44].mxu1 }
 0x2ca   : > { %v1632_v25 = vadd.f32 %v5332_v24, %v1631_v33  ;;  %v1633_v27 = vpop.f32.mrb[45].mxu1  ;;  %v2076_v11 = vadd.f32 %v2028_v22, %v1980_v23  ;;  %v5382_v29 = vpop.f32.mrb[76].mxu0  ;;  %v2034_v22 = vunpack.c.h.bf16 %v4741_v20 }
 0x2cb   : > { %v1634_v15 = vpop.f32.mrb[46].mxu1  ;;  %v5384_v30 = vpop.f32.mrb[77].mxu0 }
 0x2cc   : > { %v1857_v31 = vadd.f32 %v4309_v52, %v1632_v25  ;;  %v1635_v34 = vadd.f32 %v5332_v24, %v1634_v15  ;;  %v1636_v36 = vpop.f32.mrb[47].mxu1  ;;  %v2113_v37 = vpack.c.bf16 %v2076_v11, %v2075_v28  ;;  %v5387_v38 = vpop.f32.mrb[78].mxu0 }
 0x2cd   : > { %v5389_v39 = vpop.f32.mrb[79].mxu0 }
 0x2ce   : > { %v1981_v40 = vmax.f32 %v1857_v31, 0.0  ;;  %v1860_v43 = vadd.f32 %v4310_v57, %v1635_v34  ;;  %4371 = vmatprep.mubr.bf16.mxu0 %v2113_v37 }
 0x2d0   : > { %v1982_v45 = vmax.f32 %v1860_v43, 0.0  ;;  %v2077_v46 = vadd.f32 %v2029_v42, %v1981_v40  ;;  %v4742_v43 = vld [vmem:[%s5187_s18 + $0x70] sm:$0xff]  }
 0x2d1   : > { %v1639_v26 = vpop.f32.mrb[48].mxu1 }
 0x2d2   : > { %v2078_v47 = vadd.f32 %v2030_v44, %v1982_v45  ;;  %v1640_v48 = vadd.f32 %v5332_v24, %v1639_v26  ;;  %v1641_v49 = vpop.f32.mrb[49].mxu1  ;;  %v5393_v50 = vpop.f32.mrb[80].mxu0  ;;  %v2035_v44 = vunpack.c.l.bf16 %v4742_v43  ;;  %v2036_v26 = vunpack.c.h.bf16 %v4742_v43 }
 0x2d3   : > { %v1642_v51 = vpop.f32.mrb[50].mxu1  ;;  %v5395_v52 = vpop.f32.mrb[81].mxu0 }
 0x2d4   : > { %v1643_v53 = vadd.f32 %v5332_v24, %v1642_v51  ;;  %v1644_v54 = vpop.f32.mrb[51].mxu1  ;;  %v1865_v35 = vadd.f32 %v1864_v7, %v1640_v48  ;;  %v2114_v55 = vpack.c.bf16 %v2078_v47, %v2077_v46  ;;  %v5398_v56 = vpop.f32.mrb[82].mxu0 }
 0x2d5   : > { %v5400_v57 = vpop.f32.mrb[83].mxu0 }
 0x2d6   : > { %v1983_v58 = vmax.f32 %v1865_v35, 0.0  ;;  %v1868_v60 = vadd.f32 %v1867_v17, %v1643_v53  ;;  %4372 = vmatmul.mubr.bf16.gmra.mrb[116].mxu0 %v2114_v55 }
 0x2d8   : > { %v1984_v62 = vmax.f32 %v1868_v60, 0.0  ;;  %v2079_v1 = vadd.f32 %v2031_v13, %v1983_v58 }
 0x2d9   : > { %v1647_v9 = vpop.f32.mrb[52].mxu1 }
 0x2da   : > { %v1648_v63 = vadd.f32 %v5332_v24, %v1647_v9  ;;  %v1649_v0 = vpop.f32.mrb[53].mxu1  ;;  %v2080_v2 = vadd.f32 %v2032_v61, %v1984_v62  ;;  %v5404_v3 = vpop.f32.mrb[84].mxu0  ;;  %v4743_v62 = vld [vmem:[%s5187_s18 + $0x78] sm:$0xff]  }
 0x2db   : > { %v1650_v4 = vpop.f32.mrb[54].mxu1  ;;  %v5406_v6 = vpop.f32.mrb[85].mxu0  ;;  %v2037_v9 = vunpack.c.l.bf16 %v4743_v62  ;;  %v2038_v0 = vunpack.c.h.bf16 %v4743_v62 }
 0x2dc   : > { %v1873_v7 = vadd.f32 %v5375_v5, %v1648_v63  ;;  %v1651_v8 = vadd.f32 %v5332_v24, %v1650_v4  ;;  %v1652_v10 = vpop.f32.mrb[55].mxu1  ;;  %v2115_v12 = vpack.c.bf16 %v2080_v2, %v2079_v1  ;;  %v5410_v14 = vpop.f32.mrb[86].mxu0 }
 0x2dd   : > { %v5412_v17 = vpop.f32.mrb[87].mxu0 }
 0x2de   : > { %v1985_v18 = vmax.f32 %v1873_v7, 0.0  ;;  %v1876_v19 = vadd.f32 %v5378_v16, %v1651_v8  ;;  %4375 = vmatprep.mubr.bf16.mxu0 %v2115_v12 }
 0x2e0   : > { %v1986_v23 = vmax.f32 %v1876_v19, 0.0  ;;  %v2081_v25 = vadd.f32 %v2033_v21, %v1985_v18  ;;  %v4744_v19 = vld [vmem:[%s5187_s18 + $0x80] sm:$0xff]  }
 0x2e1   : > { %v1655_v33 = vpop.f32.mrb[56].mxu1 }
 0x2e2   : > { %v2082_v5 = vadd.f32 %v2034_v22, %v1986_v23  ;;  %v1656_v27 = vadd.f32 %v5332_v24, %v1655_v33  ;;  %v1657_v28 = vpop.f32.mrb[57].mxu1  ;;  %v5417_v11 = vpop.f32.mrb[88].mxu0  ;;  %v2039_v22 = vunpack.c.l.bf16 %v4744_v19  ;;  %v2040_v33 = vunpack.c.h.bf16 %v4744_v19 }
 0x2e3   : > { %v1658_v15 = vpop.f32.mrb[58].mxu1  ;;  %v5419_v31 = vpop.f32.mrb[89].mxu0 }
 0x2e4   : > { %v1659_v34 = vadd.f32 %v5332_v24, %v1658_v15  ;;  %v1660_v36 = vpop.f32.mrb[59].mxu1  ;;  %v1881_v16 = vadd.f32 %v5384_v30, %v1656_v27  ;;  %v2116_v37 = vpack.c.bf16 %v2082_v5, %v2081_v25  ;;  %v5423_v40 = vpop.f32.mrb[90].mxu0 }
 0x2e5   : > { %v5425_v41 = vpop.f32.mrb[91].mxu0 }
 0x2e6   : > { %v1987_v42 = vmax.f32 %v1881_v16, 0.0  ;;  %v1884_v45 = vadd.f32 %v5389_v39, %v1659_v34  ;;  %4376 = vmatmul.mubr.bf16.gmra.mrb[120].mxu0 %v2116_v37  ;;  %v4745_v37 = vld [vmem:[%s5187_s18 + $0x88] sm:$0xff]  }
 0x2e8   : > { %v1988_v46 = vmax.f32 %v1884_v45, 0.0  ;;  %v2083_v51 = vadd.f32 %v2035_v44, %v1987_v42  ;;  %v2041_v42 = vunpack.c.l.bf16 %v4745_v37 }
 0x2e9   : > { %v1663_v47 = vpop.f32.mrb[60].mxu1 }
 0x2ea   : > { %v1664_v48 = vadd.f32 %v5332_v24, %v1663_v47  ;;  %v1665_v49 = vpop.f32.mrb[61].mxu1  ;;  %v2084_v30 = vadd.f32 %v2036_v26, %v1988_v46  ;;  %v5430_v53 = vpop.f32.mrb[92].mxu0  ;;  %v2042_v26 = vunpack.c.h.bf16 %v4745_v37 }
 0x2eb   : > { %v1666_v54 = vpop.f32.mrb[62].mxu1  ;;  %v5432_v35 = vpop.f32.mrb[93].mxu0 }
 0x2ec   : > { %v1889_v55 = vadd.f32 %v5382_v29, %v1664_v48  ;;  %v1667_v58 = vadd.f32 %v5332_v24, %v1666_v54  ;;  %v2117_v39 = vpack.c.bf16 %v2084_v30, %v2083_v51  ;;  %v1668_v59 = vpop.f32.mrb[63].mxu1  ;;  %v5436_v13 = vpop.f32.mrb[94].mxu0 }
 0x2ed   : > { %v5438_v60 = vpop.f32.mrb[95].mxu0 }
 0x2ee   : > { %v1989_v61 = vmax.f32 %v1889_v55, 0.0  ;;  %v1892_v63 = vadd.f32 %v5387_v38, %v1667_v58  ;;  %4379 = vmatprep.mubr.bf16.mxu0 %v2117_v39  ;;  %v4746_v39 = vld [vmem:[%s5187_s18 + $0x90] sm:$0xff]  }
 0x2ef   : > { %v2043_v59 = vunpack.c.l.bf16 %v4746_v39 }
 0x2f0   : > { %v1990_v1 = vmax.f32 %v1892_v63, 0.0  ;;  %v2085_v4 = vadd.f32 %v2037_v9, %v1989_v61  ;;  %v2044_v9 = vunpack.c.h.bf16 %v4746_v39 }
 0x2f1   : > { %v1671_v2 = vpop.f32.mrb[64].mxu1 }
 0x2f2   : > { %v2086_v29 = vadd.f32 %v2038_v0, %v1990_v1  ;;  %v1672_v7 = vadd.f32 %v5332_v24, %v1671_v2  ;;  %v1673_v8 = vpop.f32.mrb[65].mxu1 }
 0x2f3   : > { %v1674_v10 = vpop.f32.mrb[66].mxu1 }
 0x2f4   : > { %v2118_v12 = vpack.c.bf16 %v2086_v29, %v2085_v4  ;;  %v1675_v18 = vadd.f32 %v5332_v24, %v1674_v10  ;;  %v1676_v20 = vpop.f32.mrb[67].mxu1  ;;  %v1897_v21 = vadd.f32 %v5395_v52, %v1672_v7 }
 0x2f6   : > { %4380 = vmatmul.mubr.bf16.gmra.mrb[124].mxu0 %v2118_v12  ;;  %v1991_v38 = vmax.f32 %v1897_v21, 0.0  ;;  %v1900_v23 = vadd.f32 %v5400_v57, %v1675_v18 }
 0x2f8   : > { %v2087_v25 = vadd.f32 %v2039_v22, %v1991_v38  ;;  %v1992_v5 = vmax.f32 %v1900_v23, 0.0 }
 0x2f9   : > { %v1679_v27 = vpop.f32.mrb[68].mxu1 }
 0x2fa   : > { %v1680_v28 = vadd.f32 %v5332_v24, %v1679_v27  ;;  %v1681_v15 = vpop.f32.mrb[69].mxu1  ;;  %v2088_v34 = vadd.f32 %v2040_v33, %v1992_v5 }
 0x2fb   : > { %v1682_v36 = vpop.f32.mrb[70].mxu1 }
 0x2fc   : > { %v1905_v16 = vadd.f32 %v5393_v50, %v1680_v28  ;;  %v1683_v52 = vadd.f32 %v5332_v24, %v1682_v36  ;;  %v1684_v43 = vpop.f32.mrb[71].mxu1  ;;  %v2119_v44 = vpack.c.bf16 %v2088_v34, %v2087_v25  ;;  %v4748_v34 = vld [vmem:[%s5187_s18 + $0xa0] sm:$0xff]  }
 0x2fd   : > { %v2047_v36 = vunpack.c.l.bf16 %v4748_v34 }
 0x2fe   : > { %v1993_v45 = vmax.f32 %v1905_v16, 0.0  ;;  %v1908_v57 = vadd.f32 %v5398_v56, %v1683_v52  ;;  %4383 = vmatprep.mubr.bf16.mxu0 %v2119_v44 }
 0x300   : > { %v2089_v46 = vadd.f32 %v2041_v42, %v1993_v45  ;;  %v1994_v47 = vmax.f32 %v1908_v57, 0.0  ;;  %v2048_v42 = vunpack.c.h.bf16 %v4748_v34  ;;  %v2906_v34 = vld [vmem:[%s5487_s27 + $0x48] sm:$0xff] }
 0x301   : > { %v1687_v48 = vpop.f32.mrb[72].mxu1 }
 0x302   : > { %v2090_v49 = vadd.f32 %v2042_v26, %v1994_v47  ;;  %v1688_v51 = vadd.f32 %v5332_v24, %v1687_v48  ;;  %v1689_v30 = vpop.f32.mrb[73].mxu1 }
 0x303   : > { %v1690_v50 = vpop.f32.mrb[74].mxu1 }
 0x304   : > { %v1691_v54 = vadd.f32 %v5332_v24, %v1690_v50  ;;  %v1692_v55 = vpop.f32.mrb[75].mxu1  ;;  %v1913_v58 = vadd.f32 %v5406_v6, %v1688_v51  ;;  %v2120_v61 = vpack.c.bf16 %v2090_v49, %v2089_v46  ;;  %v4747_v6 = vld [vmem:[%s5187_s18 + $0x98] sm:$0xff]  }
 0x305   : > { %v2045_v10 = vunpack.c.l.bf16 %v4747_v6  ;;  %v2046_v19 = vunpack.c.h.bf16 %v4747_v6 }
 0x306   : > { %v1995_v56 = vmax.f32 %v1913_v58, 0.0  ;;  %v1916_v62 = vadd.f32 %v5412_v17, %v1691_v54  ;;  %4384 = vmatmul.mubr.bf16.gmra.mrb[128].mxu0 %v2120_v61 }
 0x308   : > { %v2091_v63 = vadd.f32 %v2043_v59, %v1995_v56  ;;  %v1996_v0 = vmax.f32 %v1916_v62, 0.0 }
 0x309   : > { %v1695_v1 = vpop.f32.mrb[76].mxu1 }
 0x30a   : > { %v1696_v2 = vadd.f32 %v5332_v24, %v1695_v1  ;;  %v1697_v4 = vpop.f32.mrb[77].mxu1  ;;  %v2092_v29 = vadd.f32 %v2044_v9, %v1996_v0  ;;  %v4750_v0 = vld [vmem:[%s5187_s18 + $0xb0] sm:$0xff]  }
 0x30b   : > { %v1698_v7 = vpop.f32.mrb[78].mxu1  ;;  %v2051_v1 = vunpack.c.l.bf16 %v4750_v0 }
 0x30c   : > { %v1921_v8 = vadd.f32 %v5404_v3, %v1696_v2  ;;  %v1699_v12 = vadd.f32 %v5332_v24, %v1698_v7  ;;  %v1700_v18 = vpop.f32.mrb[79].mxu1  ;;  %v2121_v20 = vpack.c.bf16 %v2092_v29, %v2091_v63  ;;  %v2052_v29 = vunpack.c.h.bf16 %v4750_v0 }
 0x30e   : > { %v1997_v17 = vmax.f32 %v1921_v8, 0.0  ;;  %v1924_v21 = vadd.f32 %v5410_v14, %v1699_v12  ;;  %4387 = vmatprep.mubr.bf16.mxu0 %v2121_v20 }
 0x310   : > { %v2093_v22 = vadd.f32 %v2045_v10, %v1997_v17  ;;  %v1998_v38 = vmax.f32 %v1924_v21, 0.0  ;;  %v4751_v17 = vld [vmem:[%s5187_s18 + $0xb8] sm:$0xff]  }
 0x311   : > { %v1703_v23 = vpop.f32.mrb[80].mxu1  ;;  %v2053_v21 = vunpack.c.l.bf16 %v4751_v17 }
 0x312   : > { %v2094_v33 = vadd.f32 %v2046_v19, %v1998_v38  ;;  %v1704_v25 = vadd.f32 %v5332_v24, %v1703_v23  ;;  %v1705_v5 = vpop.f32.mrb[81].mxu1 }
 0x313   : > { %v1706_v3 = vpop.f32.mrb[82].mxu1 }
 0x314   : > { %v1707_v27 = vadd.f32 %v5332_v24, %v1706_v3  ;;  %v1708_v28 = vpop.f32.mrb[83].mxu1  ;;  %v1929_v15 = vadd.f32 %v5419_v31, %v1704_v25  ;;  %v2122_v16 = vpack.c.bf16 %v2094_v33, %v2093_v22  ;;  %v4749_v31 = vld [vmem:[%s5187_s18 + $0xa8] sm:$0xff]   ;;  %v2054_v33 = vunpack.c.h.bf16 %v4751_v17  ;;  %v5548_v17 = vld [vmem:[%s5487_s27 + $0x78] sm:$0xff]  ;;  %s5877_s18 = scalar_lea.vmem %s6288_s7, %s4077_s16 }
 0x315   : > { %v2049_v48 = vunpack.c.l.bf16 %v4749_v31  ;;  %v2050_v54 = vunpack.c.h.bf16 %v4749_v31  ;;  %v4752_v28 = vld [vmem:[%s5161_s24 + $0x8] ss:$12 sps:$4 sm:$0xff]  }
 0x316   : > { %v1999_v14 = vmax.f32 %v1929_v15, 0.0  ;;  %v1932_v37 = vadd.f32 %v5425_v41, %v1707_v27  ;;  %4388 = vmatmul.mubr.bf16.gmra.mrb[132].mxu0 %v2122_v16  ;;  %v2904_v15 = vld [vmem:[%s5487_s27 + $0x38] sm:$0xff] }
 0x318   : > { %v2095_v52 = vadd.f32 %v2047_v36, %v1999_v14  ;;  %v2000_v43 = vmax.f32 %v1932_v37, 0.0  ;;  %v2908_v36 = vld [vmem:[%s5487_s27 + $0x58] sm:$0xff] }
 0x319   : > { %v1711_v44 = vpop.f32.mrb[84].mxu1 }
 0x31a   : > { %v1712_v45 = vadd.f32 %v5332_v24, %v1711_v44  ;;  %v1713_v57 = vpop.f32.mrb[85].mxu1  ;;  %v2096_v26 = vadd.f32 %v2048_v42, %v2000_v43  ;;  %v4962_v43 = vmov 1   ;;  %v2897_v44 = vld [vmem:[%s5487_s27] sm:$0xff] }
 0x31b   : > { %v1714_v46 = vpop.f32.mrb[86].mxu1  ;;  %2948 = vperm.xlu0 %4526, %v2897_v44  }
 0x31c   : > { %v1937_v47 = vadd.f32 %v5417_v11, %v1712_v45  ;;  %v1715_v49 = vadd.f32 %v5332_v24, %v1714_v46  ;;  %v1716_v51 = vpop.f32.mrb[87].mxu1  ;;  %v2123_v30 = vpack.c.bf16 %v2096_v26, %v2095_v52  ;;  %v5499_v26 = vld [vmem:[%s5487_s27 + $0x8] sm:$0xff] }
 0x31d   : > { %v5504_v51 = vld [vmem:[%s5487_s27 + $0x20] sm:$0xff] }
 0x31e   : > { %v2001_v41 = vmax.f32 %v1937_v47, 0.0  ;;  %v1940_v50 = vadd.f32 %v5423_v40, %v1715_v49  ;;  %4391 = vmatprep.mubr.bf16.mxu0 %v2123_v30 }
 0x31f   : > { %2953 = vperm.xlu0 %4526, %v5499_v26  }
 0x320   : > { %v2097_v55 = vadd.f32 %v2049_v48, %v2001_v41  ;;  %v2002_v58 = vmax.f32 %v1940_v50, 0.0  ;;  %v5509_v41 = vld [vmem:[%s5487_s27 + $0x30] sm:$0xff] }
 0x321   : > { %v1719_v39 = vpop.f32.mrb[88].mxu1 }
 0x322   : > { %v2098_v59 = vadd.f32 %v2050_v54, %v2002_v58  ;;  %v1720_v61 = vadd.f32 %v5332_v24, %v1719_v39  ;;  %v1721_v56 = vpop.f32.mrb[89].mxu1 }
 0x323   : > { %v1722_v11 = vpop.f32.mrb[90].mxu1  ;;  %2968 = vperm.xlu0 %4526, %v5504_v51   ;;  %v5519_v56 = vld [vmem:[%s5487_s27 + $0x50] sm:$0xff] }
 0x324   : > { %v1723_v62 = vadd.f32 %v5332_v24, %v1722_v11  ;;  %v1724_v9 = vpop.f32.mrb[91].mxu1  ;;  %v1945_v63 = vadd.f32 %v5432_v35, %v1720_v61  ;;  %v2124_v2 = vpack.c.bf16 %v2098_v59, %v2097_v55  ;;  %v5514_v59 = vld [vmem:[%s5487_s27 + $0x40] sm:$0xff] }
 0x326   : > { %v2003_v40 = vmax.f32 %v1945_v63, 0.0  ;;  %v1948_v4 = vadd.f32 %v5438_v60, %v1723_v62  ;;  %4392 = vmatmul.mubr.bf16.gmra.mrb[136].mxu0 %v2124_v2  ;;  %v2910_v2 = vld [vmem:[%s5487_s27 + $0x68] sm:$0xff] }
 0x327   : > { %2978 = vperm.xlu0 %4526, %v5509_v41  }
 0x328   : > { %v2099_v7 = vadd.f32 %v2051_v1, %v2003_v40  ;;  %v2004_v8 = vmax.f32 %v1948_v4, 0.0  ;;  %v5524_v1 = vld [vmem:[%s5487_s27 + $0x60] sm:$0xff]  ;;  %v2914_v40 = vld [vmem:[%s5487_s27 + $0x88] sm:$0xff] }
 0x329   : > { %v1727_v6 = vpop.f32.mrb[92].mxu1 }
 0x32a   : > { %v1728_v10 = vadd.f32 %v5332_v24, %v1727_v6  ;;  %v1729_v12 = vpop.f32.mrb[93].mxu1  ;;  %v2100_v18 = vadd.f32 %v2052_v29, %v2004_v8 }
 0x32b   : > { %v1730_v20 = vpop.f32.mrb[94].mxu1  ;;  %2988 = vperm.xlu0 %4526, %v5514_v59  }
 0x32c   : > { %v1953_v35 = vadd.f32 %v5430_v53, %v1728_v10  ;;  %v1731_v19 = vadd.f32 %v5332_v24, %v1730_v20  ;;  %v2125_v22 = vpack.c.bf16 %v2100_v18, %v2099_v7  ;;  %v1732_v60 = vpop.f32.mrb[95].mxu1  ;;  %v2899_v24 = vld [vmem:[%s5487_s27 + $0x10] sm:$0xff]  ;;  %v2900_v53 = vld [vmem:[%s5487_s27 + $0x18] sm:$0xff]  ;;  %v5533_v7 = vld [vmem:[%s5487_s27 + $0xa8] sm:$0xff] }
 0x32d   : > { %2958 = vperm.xlu1 %4527, %v2899_v24   ;;  %v5537_v18 = vld [vmem:[%s5487_s27 + $0xc8] sm:$0xff]  ;;  %v2911_v20 = vld [vmem:[%s5487_s27 + $0x70] sm:$0xff] }
 0x32e   : > { %v2005_v38 = vmax.f32 %v1953_v35, 0.0  ;;  %v1956_v23 = vadd.f32 %v5436_v13, %v1731_v19  ;;  %4395 = vmatprep.mubr.bf16.mxu0 %v2125_v22  ;;  %v2902_v13 = vld [vmem:[%s5487_s27 + $0x28] sm:$0xff] }
 0x32f   : > { %2998 = vperm.xlu0 %4526, %v5519_v56   ;;  %v5543_v35 = vld [vmem:[%s5487_s27 + $0xe8] sm:$0xff] }
 0x330   : > { %v2101_v25 = vadd.f32 %v2053_v21, %v2005_v38  ;;  %v2006_v5 = vmax.f32 %v1956_v23, 0.0  ;;  %v5551_v21 = vld [vmem:[%s5487_s27 + $0x108] sm:$0xff] }
 0x331   : > { %2963 = vperm.xlu1 %4527, %v2900_v53   ;;  %v5556_v60 = vld [vmem:[%s5487_s27 + $0x128] sm:$0xff] }
 0x332   : > { %v2102_v3 = vadd.f32 %v2054_v33, %v2006_v5  ;;  %v5561_v5 = vld [vmem:[%s5487_s27 + $0x148] sm:$0xff] }
 0x333   : > { %3008 = vperm.xlu0 %4526, %v5524_v1  }
 0x334   : > { %v2126_v27 = vpack.c.bf16 %v2102_v3, %v2101_v25  ;;  %v5566_v3 = vld [vmem:[%s5487_s27 + $0x168] sm:$0xff] }
 0x335   : > { %2973 = vperm.xlu1 %4527, %v2902_v13  }
 0x336   : > { %4396 = vmatmul.mubr.bf16.gmra.mrb[140].mxu0 %v2126_v27  ;;  %v2913_v27 = vld [vmem:[%s5487_s27 + $0x80] sm:$0xff] }
 0x337   : > { %4415 = vmatprep.mubr.bf16.mxu0 %v4752_v28  ;;  %3013 = vperm.xlu0 %4526, %v2910_v2   ;;  %v2915_v28 = vld [vmem:[%s5487_s27 + $0x90] sm:$0xff] }
 0x339   : > { %2983 = vperm.xlu1 %4527, %v2904_v15  }
 0x33b   : > { %3033 = vperm.xlu0 %4526, %v2914_v40  }
 0x33d   : > { %2993 = vperm.xlu1 %4527, %v2906_v34  }
 0x33f   : > { %3053 = vperm.xlu0 %4526, %v5533_v7  }
 0x341   : > { %3003 = vperm.xlu1 %4527, %v2908_v36  }
 0x343   : > { %3073 = vperm.xlu0 %4526, %v5537_v18  }
 0x345   : > { %4528 = vset.pattern.permute.xlu1 %v4962_v43 }
 0x346   : > { %3289 = vperm.xlu1 %4528, %v2897_v44  }
 0x347   : > { %3093 = vperm.xlu0 %4526, %v5543_v35  }
 0x34a   : > { %3297 = vperm.xlu1 %4528, %v2899_v24  }
 0x34b   : > { %3113 = vperm.xlu0 %4526, %v5551_v21  }
 0x34e   : > { %3301 = vperm.xlu1 %4528, %v2900_v53  }
 0x34f   : > { %3133 = vperm.xlu0 %4526, %v5556_v60  }
 0x352   : > { %3309 = vperm.xlu1 %4528, %v2902_v13  }
 0x353   : > { %3153 = vperm.xlu0 %4526, %v5561_v5  }
 0x356   : > { %3317 = vperm.xlu1 %4528, %v2904_v15  }
 0x357   : > { %3173 = vperm.xlu0 %4526, %v5566_v3  }
 0x35a   : > { %3325 = vperm.xlu1 %4528, %v2906_v34  }
 0x35b   : > { %4546 = vset.pattern.permute.xlu0 %v4962_v43 }
 0x35c   : > { %3293 = vperm.xlu0 %4546, %v5499_v26   ;;  %v2919_v26 = vld [vmem:[%s5487_s27 + $0xb0] sm:$0xff] }
 0x35e   : > { %3333 = vperm.xlu1 %4528, %v2908_v36   ;;  %v2916_v36 = vld [vmem:[%s5487_s27 + $0x98] sm:$0xff] }
 0x360   : > { %3305 = vperm.xlu0 %4546, %v5504_v51  }
 0x362   : > { %4529 = vset.pattern.permute.xlu1 %v4961_v32 }
 0x363   : > { %3018 = vperm.xlu1 %4529, %v2911_v20  }
 0x364   : > { %3313 = vperm.xlu0 %4546, %v5509_v41  }
 0x367   : > { %3023 = vperm.xlu1 %4529, %v5548_v17  }
 0x368   : > { %3321 = vperm.xlu0 %4546, %v5514_v59   ;;  %v4757_v59 = vld [vmem:[%s5161_s24 + $0x30] ss:$12 sps:$4 sm:$0xff]  }
 0x36b   : > { %4530 = vset.pattern.permute.xlu1 %v4962_v43 }
 0x36c   : > { %3341 = vperm.xlu1 %4530, %v2910_v2   ;;  %3329 = vperm.xlu0 %4546, %v5519_v56   ;;  %v4758_v56 = vld [vmem:[%s5161_s24 + $0x4c] ss:$12 sps:$4 sm:$0xff]  }
 0x36d   : > { %v2925_v2 = vld [vmem:[%s5487_s27 + $0xe0] sm:$0xff] }
 0x370   : > { %3345 = vperm.xlu1 %4530, %v2911_v20   ;;  %3337 = vperm.xlu0 %4546, %v5524_v1   ;;  %v2927_v20 = vld [vmem:[%s5487_s27 + $0xf0] sm:$0xff] }
 0x372   : > { %v4353_v16 = vpop.f32.mrb[96].mxu0 }
 0x373   : > { %v2225_v14 = vpop.f32.mrb[97].mxu0 }
 0x374   : > { %v4354_v37 = vpop.f32.mrb[98].mxu0  ;;  %4531 = vset.pattern.permute.xlu1 %v4961_v32  ;;  %3349 = vperm.xlu0 %4546, %v5548_v17  }
 0x375   : > { %v2417_v42 = vpack.c.bf16 %v4354_v37, %v4353_v16  ;;  %v2228_v52 = vpop.f32.mrb[99].mxu0  ;;  %3028 = vperm.xlu1 %4531, %v2913_v27  }
 0x376   : > { %v2416_v45 = vpack.c.bf16 %v2228_v52, %v2225_v14 }
 0x378   : > { %2448 = vmatpush1.bf16.msra.mxu1 %v2416_v45  ;;  %3353 = vperm.xlu0 %4546, %v2913_v27   ;;  %v5621_v27 = vld [vmem:[%s5487_s27 + $0x138] sm:$0xff] }
 0x379   : > { %2449 = vmatprep.subr.bf16.mxu1 %v4961_v32  ;;  %3038 = vperm.xlu1 %4531, %v2915_v28  }
 0x37a   : > { %v4357_v57 = vpop.f32.mrb[100].mxu0 }
 0x37b   : > { %v2241_v46 = vpop.f32.mrb[101].mxu0 }
 0x37c   : > { %2450 = vmatpush1.bf16.msra.mxu1 %v2417_v42  ;;  %v4358_v47 = vpop.f32.mrb[102].mxu0  ;;  %v2917_v42 = vld [vmem:[%s5487_s27 + $0xa0] sm:$0xff]  ;;  %3365 = vperm.xlu0 %4546, %v2916_v36  }
 0x37d   : > { %v2419_v31 = vpack.c.bf16 %v4358_v47, %v4357_v57  ;;  %v2244_v48 = vpop.f32.mrb[103].mxu0  ;;  %2451 = vmatprep.subr.bf16.mxu1 %v4961_v32  ;;  %3043 = vperm.xlu1 %4531, %v2916_v36   ;;  %v4753_v47 = vld [vmem:[%s5161_s24] ss:$12 sps:$4 sm:$0xff]  }
 0x37e   : > { %v2418_v49 = vpack.c.bf16 %v2244_v48, %v2241_v46  ;;  %v2920_v46 = vld [vmem:[%s5487_s27 + $0xb8] sm:$0xff] }
 0x380   : > { %2452 = vmatpush1.bf16.msra.mxu1 %v2418_v49  ;;  %3369 = vperm.xlu0 %4546, %v2917_v42  }
 0x381   : > { %2453 = vmatprep.subr.bf16.mxu1 %v4961_v32  ;;  %4532 = vset.pattern.permute.xlu1 %v4962_v43 }
 0x382   : > { %v4361_v30 = vpop.f32.mrb[104].mxu0  ;;  %3357 = vperm.xlu1 %4532, %v2914_v40   ;;  %v4759_v40 = vld [vmem:[%s5161_s24 + $0x48] ss:$12 sps:$4 sm:$0xff]  }
 0x383   : > { %v2257_v50 = vpop.f32.mrb[105].mxu0 }
 0x384   : > { %2454 = vmatpush1.bf16.msra.mxu1 %v2419_v31  ;;  %v4362_v54 = vpop.f32.mrb[106].mxu0  ;;  %v4754_v31 = vld [vmem:[%s5161_s24 + $0x1c] ss:$12 sps:$4 sm:$0xff]   ;;  %3381 = vperm.xlu0 %4546, %v2920_v46  }
 0x385   : > { %v2421_v55 = vpack.c.bf16 %v4362_v54, %v4361_v30  ;;  %v2260_v58 = vpop.f32.mrb[107].mxu0  ;;  %2455 = vmatprep.subr.bf16.mxu1 %v4961_v32  ;;  %v4755_v54 = vld [vmem:[%s5161_s24 + $0x18] ss:$12 sps:$4 sm:$0xff]  }
 0x386   : > { %v2420_v39 = vpack.c.bf16 %v2260_v58, %v2257_v50  ;;  %3361 = vperm.xlu1 %4532, %v2915_v28   ;;  %v4756_v58 = vld [vmem:[%s5161_s24 + $0x34] ss:$12 sps:$4 sm:$0xff]   ;;  %v4765_v28 = vld [vmem:[%s5161_s24 + $0x90] ss:$12 sps:$4 sm:$0xff]  }
 0x388   : > { %2456 = vmatpush1.bf16.msra.mxu1 %v2420_v39  ;;  %v2923_v39 = vld [vmem:[%s5487_s27 + $0xd0] sm:$0xff] }
 0x389   : > { %2457 = vmatprep.subr.bf16.mxu1 %v4961_v32 }
 0x38a   : > { %v4365_v61 = vpop.f32.mrb[108].mxu0  ;;  %4533 = vset.pattern.permute.xlu1 %v4961_v32 }
 0x38b   : > { %v2273_v11 = vpop.f32.mrb[109].mxu0  ;;  %3048 = vperm.xlu1 %4533, %v2917_v42   ;;  %v5639_v42 = vld [vmem:[%s5487_s27 + $0x160] sm:$0xff] }
 0x38c   : > { %2458 = vmatpush1.bf16.msra.mxu1 %v2421_v55  ;;  %v4366_v62 = vpop.f32.mrb[110].mxu0  ;;  %v2921_v55 = vld [vmem:[%s5487_s27 + $0xc0] sm:$0xff] }
 0x38d   : > { %v2423_v9 = vpack.c.bf16 %v4366_v62, %v4365_v61  ;;  %v2276_v63 = vpop.f32.mrb[111].mxu0  ;;  %2459 = vmatprep.subr.bf16.mxu1 %v4961_v32  ;;  %v2924_v61 = vld [vmem:[%s5487_s27 + $0xd8] sm:$0xff]  ;;  %3385 = vperm.xlu0 %4546, %v2921_v55  }
 0x38e   : > { %v2422_v0 = vpack.c.bf16 %v2276_v63, %v2273_v11 }
 0x38f   : > { %3058 = vperm.xlu1 %4533, %v2919_v26  }
 0x390   : > { %2460 = vmatpush1.bf16.msra.mxu1 %v2422_v0 }
 0x391   : > { %2461 = vmatprep.subr.bf16.mxu1 %v4961_v32  ;;  %3397 = vperm.xlu0 %4546, %v2924_v61  }
 0x393   : > { %3063 = vperm.xlu1 %4533, %v2920_v46   ;;  %v4771_v46 = vld [vmem:[%s5161_s24 + $0xdc] ss:$12 sps:$4 sm:$0xff]  }
 0x394   : > { %2462 = vmatpush1.bf16.msra.mxu1 %v2423_v9 }
 0x395   : > { %2463 = vmatprep.subr.bf16.mxu1 %v4961_v32  ;;  %3401 = vperm.xlu0 %4546, %v2925_v2  }
 0x397   : > { %4534 = vset.pattern.permute.xlu1 %v4962_v43 }
 0x398   : > { %3373 = vperm.xlu1 %4534, %v5533_v7   ;;  %v2929_v7 = vld [vmem:[%s5487_s27 + $0x100] sm:$0xff] }
 0x399   : > { %v4369_v4 = vpop.f32.mrb[112].mxu0 }
 0x39a   : > { %v2289_v29 = vpop.f32.mrb[113].mxu0 }
 0x39b   : > { %v4370_v8 = vpop.f32.mrb[114].mxu0 }
 0x39c   : > { %v2425_v6 = vpack.c.bf16 %v4370_v8, %v4369_v4  ;;  %v2292_v10 = vpop.f32.mrb[115].mxu0  ;;  %3377 = vperm.xlu1 %4534, %v2919_v26   ;;  %v4760_v4 = vld [vmem:[%s5161_s24 + $0x64] ss:$12 sps:$4 sm:$0xff]   ;;  %v4761_v8 = vld [vmem:[%s5161_s24 + $0x60] ss:$12 sps:$4 sm:$0xff]  }
 0x39d   : > { %v2424_v12 = vpack.c.bf16 %v2292_v10, %v2289_v29  ;;  %v2928_v29 = vld [vmem:[%s5487_s27 + $0xf8] sm:$0xff]  ;;  %v4770_v26 = vld [vmem:[%s5161_s24 + $0x20] ss:$12 sps:$4 sm:$0xff]  }
 0x39e   : > { %3413 = vperm.xlu0 %4546, %v2928_v29  }
 0x39f   : > { %2464 = vmatpush1.bf16.msra.mxu1 %v2424_v12  ;;  %v2932_v12 = vld [vmem:[%s5487_s27 + $0x118] sm:$0xff] }
 0x3a0   : > { %2465 = vmatprep.subr.bf16.mxu1 %v4961_v32  ;;  %4535 = vset.pattern.permute.xlu1 %v4961_v32 }
 0x3a1   : > { %3068 = vperm.xlu1 %4535, %v2921_v55   ;;  %v4779_v55 = vld [vmem:[%s5161_s24 + $0x10c] ss:$12 sps:$4 sm:$0xff]  }
 0x3a2   : > { %3417 = vperm.xlu0 %4546, %v2929_v7  }
 0x3a3   : > { %2466 = vmatpush1.bf16.msra.mxu1 %v2425_v6  ;;  %v4762_v6 = vld [vmem:[%s5161_s24 + $0x7c] ss:$12 sps:$4 sm:$0xff]  }
 0x3a4   : > { %2467 = vmatprep.subr.bf16.mxu1 %v4961_v32 }
 0x3a5   : > { %3078 = vperm.xlu1 %4535, %v2923_v39  }
 0x3a6   : > { %3429 = vperm.xlu0 %4546, %v2932_v12  }
 0x3a9   : > { %v4373_v19 = vpop.f32.mrb[116].mxu0  ;;  %3083 = vperm.xlu1 %4535, %v2924_v61   ;;  %v4781_v61 = vld [vmem:[%s5161_s24 + $0x108] ss:$12 sps:$4 sm:$0xff]  }
 0x3aa   : > { %v2305_v22 = vpop.f32.mrb[117].mxu0 }
 0x3ab   : > { %v4374_v38 = vpop.f32.mrb[118].mxu0 }
 0x3ac   : > { %v2427_v23 = vpack.c.bf16 %v4374_v38, %v4373_v19  ;;  %v2308_v33 = vpop.f32.mrb[119].mxu0 }
 0x3ad   : > { %v2426_v25 = vpack.c.bf16 %v2308_v33, %v2305_v22  ;;  %4536 = vset.pattern.permute.xlu1 %v4962_v43  ;;  %v5616_v33 = vld [vmem:[%s5487_s27 + $0x120] sm:$0xff] }
 0x3ae   : > { %3389 = vperm.xlu1 %4536, %v5537_v18   ;;  %3433 = vperm.xlu0 %4546, %v5616_v33  }
 0x3af   : > { %2468 = vmatpush1.bf16.msra.mxu1 %v2426_v25  ;;  %v4764_v25 = vld [vmem:[%s5161_s24 + $0x94] ss:$12 sps:$4 sm:$0xff]  }
 0x3b0   : > { %2469 = vmatprep.subr.bf16.mxu1 %v4961_v32 }
 0x3b2   : > { %3393 = vperm.xlu1 %4536, %v2923_v39   ;;  %3445 = vperm.xlu0 %4546, %v5621_v27   ;;  %v4780_v39 = vld [vmem:[%s5161_s24 + $0x98] ss:$12 sps:$4 sm:$0xff]  }
 0x3b3   : > { %2470 = vmatpush1.bf16.msra.mxu1 %v2427_v23  ;;  %v4763_v23 = vld [vmem:[%s5161_s24 + $0x78] ss:$12 sps:$4 sm:$0xff]  }
 0x3b4   : > { %2471 = vmatprep.subr.bf16.mxu1 %v4961_v32 }
 0x3b6   : > { %4537 = vset.pattern.permute.xlu1 %v4961_v32 }
 0x3b7   : > { %3088 = vperm.xlu1 %4537, %v2925_v2   ;;  %v4788_v2 = vld [vmem:[%s5161_s24 + $0xf8] ss:$12 sps:$4 sm:$0xff]  }
 0x3b9   : > { %v4377_v24 = vpop.f32.mrb[120].mxu0 }
 0x3ba   : > { %v2321_v53 = vpop.f32.mrb[121].mxu0 }
 0x3bb   : > { %v4378_v13 = vpop.f32.mrb[122].mxu0  ;;  %3098 = vperm.xlu1 %4537, %v2927_v20  }
 0x3bc   : > { %v2429_v15 = vpack.c.bf16 %v4378_v13, %v4377_v24  ;;  %v2324_v34 = vpop.f32.mrb[123].mxu0  ;;  %v5628_v24 = vld [vmem:[%s5487_s27 + $0x140] sm:$0xff] }
 0x3bd   : > { %v2428_v16 = vpack.c.bf16 %v2324_v34, %v2321_v53  ;;  %v4766_v53 = vld [vmem:[%s5161_s24 + $0xac] ss:$12 sps:$4 sm:$0xff]   ;;  %3449 = vperm.xlu0 %4546, %v5628_v24   ;;  %v5633_v34 = vld [vmem:[%s5487_s27 + $0x158] sm:$0xff] }
 0x3bf   : > { %2472 = vmatpush1.bf16.msra.mxu1 %v2428_v16  ;;  %3103 = vperm.xlu1 %4537, %v2928_v29   ;;  %v4790_v29 = vld [vmem:[%s5161_s24 + $0x110] ss:$12 sps:$4 sm:$0xff]  }
 0x3c0   : > { %2473 = vmatprep.subr.bf16.mxu1 %v4961_v32 }
 0x3c1   : > { %3461 = vperm.xlu0 %4546, %v5633_v34  }
 0x3c3   : > { %2474 = vmatpush1.bf16.msra.mxu1 %v2429_v15  ;;  %4538 = vset.pattern.permute.xlu1 %v4962_v43 }
 0x3c4   : > { %2475 = vmatprep.subr.bf16.mxu1 %v4961_v32  ;;  %3405 = vperm.xlu1 %4538, %v5543_v35  }
 0x3c5   : > { %3465 = vperm.xlu0 %4546, %v5639_v42  }
 0x3c8   : > { %3409 = vperm.xlu1 %4538, %v2927_v20   ;;  %v4795_v20 = vld [vmem:[%s5161_s24 + $0x16c] ss:$12 sps:$4 sm:$0xff]  }
 0x3c9   : > { %v4381_v14 = vpop.f32.mrb[124].mxu0 }
 0x3ca   : > { %v2337_v37 = vpop.f32.mrb[125].mxu0 }
 0x3cb   : > { %v4382_v52 = vpop.f32.mrb[126].mxu0 }
 0x3cc   : > { %v2431_v44 = vpack.c.bf16 %v4382_v52, %v4381_v14  ;;  %v2340_v45 = vpop.f32.mrb[127].mxu0  ;;  %4539 = vset.pattern.permute.xlu1 %v4961_v32  ;;  %v4768_v52 = vld [vmem:[%s5161_s24 + $0xc4] ss:$12 sps:$4 sm:$0xff]  }
 0x3cd   : > { %v2430_v57 = vpack.c.bf16 %v2340_v45, %v2337_v37  ;;  %v4767_v37 = vld [vmem:[%s5161_s24 + $0xa8] ss:$12 sps:$4 sm:$0xff]   ;;  %3108 = vperm.xlu1 %4539, %v2929_v7  }
 0x3ce   : > { %v5645_v45 = vld [vmem:[%s5487_s27 + $0x178] sm:$0xff] }
 0x3cf   : > { %2476 = vmatpush1.bf16.msra.mxu1 %v2430_v57  ;;  %3477 = vperm.xlu0 %4546, %v5645_v45   ;;  %v4769_v57 = vld [vmem:[%s5161_s24 + $0xc0] ss:$12 sps:$4 sm:$0xff]  }
 0x3d0   : > { %2477 = vmatprep.subr.bf16.mxu1 %v4961_v32  ;;  %v4791_v7 = vld [vmem:[%s5161_s24 + $0x154] ss:$12 sps:$4 sm:$0xff]  }
 0x3d3   : > { %2478 = vmatpush1.bf16.msra.mxu1 %v2431_v44  ;;  %v2931_v44 = vld [vmem:[%s5487_s27 + $0x110] sm:$0xff] }
 0x3d4   : > { %3118 = vperm.xlu1 %4539, %v2931_v44  }
 0x3d6   : > { %2480 = vmatmul.mubr.bf16.vlgmr.msra.gmra.mrb[96].mxu1 %v4753_v47  ;;  %v4772_v47 = vld [vmem:[%s5161_s24 + $0x38] ss:$12 sps:$4 sm:$0xff]  }
 0x3d7   : > { %2487 = vmatprep.mubr.bf16.mxu1 %v4754_v31  ;;  %v5653_v31 = vpop.permute.xlu1 %2958 }
 0x3d8   : > { %3123 = vperm.xlu1 %4539, %v2932_v12   ;;  %v4793_v12 = vld [vmem:[%s5161_s24 + $0x150] ss:$12 sps:$4 sm:$0xff]  }
 0x3d9   : > { %v4385_v48 = vpop.f32.mrb[128].mxu0 }
 0x3da   : > { %v2353_v49 = vpop.f32.mrb[129].mxu0 }
 0x3db   : > { %v4386_v51 = vpop.f32.mrb[130].mxu0 }
 0x3dc   : > { %v2433_v30 = vpack.c.bf16 %v4386_v51, %v4385_v48  ;;  %v2356_v41 = vpop.f32.mrb[131].mxu0  ;;  %4540 = vset.pattern.permute.xlu1 %v4962_v43  ;;  %v4773_v48 = vld [vmem:[%s5161_s24 + $0xd8] ss:$12 sps:$4 sm:$0xff]   ;;  %v4775_v51 = vld [vmem:[%s5161_s24 + $0xf4] ss:$12 sps:$4 sm:$0xff]  }
 0x3dd   : > { %v2432_v50 = vpack.c.bf16 %v2356_v41, %v2353_v49  ;;  %3421 = vperm.xlu1 %4540, %v5551_v21   ;;  %v4774_v49 = vld [vmem:[%s5161_s24 + $0x50] ss:$12 sps:$4 sm:$0xff]   ;;  %v5660_v41 = vpop.permute.xlu1 %2963 }
 0x3de   : > { %2488 = vmatmul.mubr.bf16.gmra.mrb[100].mxu1 %v4755_v54  ;;  %v4777_v21 = vld [vmem:[%s5161_s24 + $0xf0] ss:$12 sps:$4 sm:$0xff]   ;;  %v4778_v54 = vld [vmem:[%s5161_s24 + $0x80] ss:$12 sps:$4 sm:$0xff]  }
 0x3df   : > { %2495 = vmatprep.mubr.bf16.mxu1 %v4756_v58  ;;  %4399 = vmatprep.subr.bf16.mxu0 %v2432_v50 }
 0x3e0   : > { %4400 = vmatpush3.bf16.msra.mxu0 %v2432_v50  ;;  %v2935_v50 = vld [vmem:[%s5487_s27 + $0x130] sm:$0xff] }
 0x3e1   : > { %4401 = vmatprep.subr.bf16.mxu0 %v2433_v30  ;;  %3425 = vperm.xlu1 %4540, %v2931_v44   ;;  %v5668_v58 = vpop.permute.xlu1 %2973  ;;  %v4811_v44 = vld [vmem:[%s5161_s24 + $0x200] ss:$12 sps:$4 sm:$0xff]  }
 0x3e4   : > { %4402 = vmatpush3.bf16.msra.mxu0 %v2433_v30  ;;  %v4776_v30 = vld [vmem:[%s5161_s24 + $0x68] ss:$12 sps:$4 sm:$0xff]  }
 0x3e5   : > { %4541 = vset.pattern.permute.xlu1 %v4961_v32 }
 0x3e6   : > { %2496 = vmatmul.mubr.bf16.gmra.mrb[104].mxu1 %v4757_v59  ;;  %3128 = vperm.xlu1 %4541, %v5616_v33   ;;  %v5671_v59 = vpop.permute.xlu1 %2983  ;;  %v4800_v33 = vld [vmem:[%s5161_s24 + $0x188] ss:$12 sps:$4 sm:$0xff]  }
 0x3e7   : > { %2503 = vmatprep.mubr.bf16.mxu1 %v4758_v56  ;;  %v4782_v56 = vld [vmem:[%s5161_s24 + $0xb0] ss:$12 sps:$4 sm:$0xff]  }
 0x3e9   : > { %v4389_v11 = vpop.f32.mrb[132].mxu0 }
 0x3ea   : > { %v2369_v62 = vpop.f32.mrb[133].mxu0  ;;  %3138 = vperm.xlu1 %4541, %v2935_v50  }
 0x3eb   : > { %v4390_v9 = vpop.f32.mrb[134].mxu0 }
 0x3ec   : > { %v2435_v63 = vpack.c.bf16 %v4390_v9, %v4389_v11  ;;  %v2372_v0 = vpop.f32.mrb[135].mxu0  ;;  %v4783_v11 = vld [vmem:[%s5161_s24 + $0x124] ss:$12 sps:$4 sm:$0xff]   ;;  %v5680_v9 = vpop.permute.xlu1 %2993 }
 0x3ed   : > { %v2434_v1 = vpack.c.bf16 %v2372_v0, %v2369_v62  ;;  %v4784_v62 = vld [vmem:[%s5161_s24 + $0xc8] ss:$12 sps:$4 sm:$0xff]   ;;  %v4786_v0 = vld [vmem:[%s5161_s24 + $0xe0] ss:$12 sps:$4 sm:$0xff]  }
 0x3ee   : > { %2504 = vmatmul.mubr.bf16.gmra.mrb[108].mxu1 %v4759_v40  ;;  %3143 = vperm.xlu1 %4541, %v5621_v27   ;;  %v4801_v27 = vld [vmem:[%s5161_s24 + $0x180] ss:$12 sps:$4 sm:$0xff]  }
 0x3ef   : > { %2511 = vmatprep.mubr.bf16.mxu1 %v4760_v4  ;;  %4403 = vmatprep.subr.bf16.mxu0 %v2434_v1  ;;  %v4789_v4 = vld [vmem:[%s5161_s24 + $0x138] ss:$12 sps:$4 sm:$0xff]  }
 0x3f0   : > { %4404 = vmatpush3.bf16.msra.mxu0 %v2434_v1  ;;  %v4787_v1 = vld [vmem:[%s5161_s24 + $0x13c] ss:$12 sps:$4 sm:$0xff]   ;;  %v5686_v40 = vpop.permute.xlu1 %3003 }
 0x3f1   : > { %4405 = vmatprep.subr.bf16.mxu0 %v2435_v63 }
 0x3f2   : > { %4542 = vset.pattern.permute.xlu1 %v4962_v43 }
 0x3f3   : > { %3437 = vperm.xlu1 %4542, %v5556_v60   ;;  %v2939_v60 = vld [vmem:[%s5487_s27 + $0x150] sm:$0xff] }
 0x3f4   : > { %4406 = vmatpush3.bf16.msra.mxu0 %v2435_v63  ;;  %v4785_v63 = vld [vmem:[%s5161_s24 + $0x120] ss:$12 sps:$4 sm:$0xff]  }
 0x3f6   : > { %2512 = vmatmul.mubr.bf16.gmra.mrb[112].mxu1 %v4761_v8  ;;  %v5694_v8 = vpop.permute.xlu1 %3289 }
 0x3f7   : > { %2519 = vmatprep.mubr.bf16.mxu1 %v4762_v6  ;;  %3441 = vperm.xlu1 %4542, %v2935_v50   ;;  %v4792_v6 = vld [vmem:[%s5161_s24 + $0x128] ss:$12 sps:$4 sm:$0xff]  }
 0x3f8   : > { %v4817_v50 = vld [vmem:[%s5161_s24 + $0x1fc] ss:$12 sps:$4 sm:$0xff]  }
 0x3f9   : > { %v4393_v10 = vpop.f32.mrb[136].mxu0 }
 0x3fa   : > { %v2385_v18 = vpop.f32.mrb[137].mxu0 }
 0x3fb   : > { %v4394_v17 = vpop.f32.mrb[138].mxu0  ;;  %4543 = vset.pattern.permute.xlu1 %v4961_v32 }
 0x3fc   : > { %v2437_v19 = vpack.c.bf16 %v4394_v17, %v4393_v10  ;;  %v2388_v22 = vpop.f32.mrb[139].mxu0  ;;  %3148 = vperm.xlu1 %4543, %v5628_v24   ;;  %v5698_v10 = vpop.permute.xlu1 %3297  ;;  %v4796_v17 = vld [vmem:[%s5161_s24 + $0x158] ss:$12 sps:$4 sm:$0xff]   ;;  %v4803_v24 = vld [vmem:[%s5161_s24 + $0x19c] ss:$12 sps:$4 sm:$0xff]  }
 0x3fd   : > { %v2436_v38 = vpack.c.bf16 %v2388_v22, %v2385_v18  ;;  %v4794_v18 = vld [vmem:[%s5161_s24 + $0x140] ss:$12 sps:$4 sm:$0xff]   ;;  %v4797_v22 = vld [vmem:[%s5161_s24 + $0x168] ss:$12 sps:$4 sm:$0xff]  }
 0x3fe   : > { %2520 = vmatmul.mubr.bf16.gmra.mrb[116].mxu1 %v4763_v23  ;;  %v4799_v23 = vld [vmem:[%s5161_s24 + $0x184] ss:$12 sps:$4 sm:$0xff]  }
 0x3ff   : > { %2527 = vmatprep.mubr.bf16.mxu1 %v4764_v25  ;;  %4407 = vmatprep.subr.bf16.mxu0 %v2436_v38 }
 0x400   : > { %4408 = vmatpush3.bf16.msra.mxu0 %v2436_v38  ;;  %3158 = vperm.xlu1 %4543, %v2939_v60   ;;  %v4798_v38 = vld [vmem:[%s5161_s24 + $0x170] ss:$12 sps:$4 sm:$0xff]  }
 0x401   : > { %4409 = vmatprep.subr.bf16.mxu0 %v2437_v19 }
 0x404   : > { %4410 = vmatpush3.bf16.msra.mxu0 %v2437_v19  ;;  %3163 = vperm.xlu1 %4543, %v5633_v34   ;;  %v5706_v19 = vpop.permute.xlu1 %3301  ;;  %v4805_v34 = vld [vmem:[%s5161_s24 + $0x198] ss:$12 sps:$4 sm:$0xff]  }
 0x406   : > { %2528 = vmatmul.mubr.bf16.gmra.mrb[120].mxu1 %v4765_v28  ;;  %v4802_v28 = vld [vmem:[%s5161_s24 + $0x1a0] ss:$12 sps:$4 sm:$0xff]  }
 0x407   : > { %2535 = vmatprep.mubr.bf16.mxu1 %v4766_v53 }
 0x408   : > { %4544 = vset.pattern.permute.xlu1 %v4962_v43  ;;  %v5712_v25 = vpop.permute.xlu1 %3309 }
 0x409   : > { %v4397_v13 = vpop.f32.mrb[140].mxu0  ;;  %3453 = vperm.xlu1 %4544, %v5561_v5   ;;  %v2943_v5 = vld [vmem:[%s5487_s27 + $0x170] sm:$0xff]  ;;  %s485_s27 = scalar_lea.vmem [#allocation8], %s3932_s28 }
 0x40a   : > { %v2401_v15 = vpop.f32.mrb[141].mxu0 }
 0x40b   : > { %v4398_v35 = vpop.f32.mrb[142].mxu0 }
 0x40c   : > { %v2439_v36 = vpack.c.bf16 %v4398_v35, %v4397_v13  ;;  %v2404_v16 = vpop.f32.mrb[143].mxu0  ;;  %v5720_v53 = vpop.permute.xlu1 %3317  ;;  %v4804_v13 = vld [vmem:[%s5161_s24 + $0x1b8] ss:$12 sps:$4 sm:$0xff]  }
 0x40d   : > { %v2438_v14 = vpack.c.bf16 %v2404_v16, %v2401_v15  ;;  %3457 = vperm.xlu1 %4544, %v2939_v60   ;;  %v5727_v35 = vpop.permute.xlu0 %2948  ;;  %v4807_v16 = vld [vmem:[%s5161_s24 + $0x1d0] ss:$12 sps:$4 sm:$0xff]  }
 0x40e   : > { %2536 = vmatmul.mubr.bf16.gmra.mrb[124].mxu1 %v4767_v37 }
 0x40f   : > { %4411 = vmatprep.subr.bf16.mxu0 %v2438_v14  ;;  %2543 = vmatprep.mubr.bf16.mxu1 %v4768_v52  ;;  %v4809_v52 = vld [vmem:[%s5161_s24 + $0x1b0] ss:$12 sps:$4 sm:$0xff]  }
 0x410   : > { %4412 = vmatpush3.bf16.msra.mxu0 %v2438_v14  ;;  %v5724_v15 = vpop.permute.xlu1 %3325  ;;  %v4808_v14 = vld [vmem:[%s5161_s24 + $0x1e8] ss:$12 sps:$4 sm:$0xff]  }
 0x411   : > { %4413 = vmatprep.subr.bf16.mxu0 %v2439_v36  ;;  %4545 = vset.pattern.permute.xlu1 %v4961_v32 }
 0x412   : > { %3168 = vperm.xlu1 %4545, %v5639_v42   ;;  %v5736_v42 = vpop.permute.xlu0 %2953 }
 0x414   : > { %4414 = vmatpush3.bf16.msra.mxu0 %v2439_v36  ;;  %v4806_v36 = vld [vmem:[%s5161_s24 + $0x1b4] ss:$12 sps:$4 sm:$0xff]   ;;  %v5734_v37 = vpop.permute.xlu1 %3333 }
 0x416   : > { %2544 = vmatmul.mubr.bf16.gmra.mrb[128].mxu1 %v4769_v57  ;;  %3178 = vperm.xlu1 %4545, %v2943_v5   ;;  %v4812_v57 = vld [vmem:[%s5161_s24 + $0x218] ss:$12 sps:$4 sm:$0xff]  }
 0x417   : > { %4416 = vmatmul.mubr.bf16.vlgmr.msra.gmra.mrb[144].mxu0 %v4770_v26  ;;  %2551 = vmatprep.mubr.bf16.mxu1 %v4771_v46  ;;  %v4813_v46 = vld [vmem:[%s5161_s24 + $0x1c8] ss:$12 sps:$4 sm:$0xff]  }
 0x418   : > { %4419 = vmatprep.mubr.bf16.mxu0 %v4772_v47  ;;  %v4814_v47 = vld [vmem:[%s5161_s24 + $0x1e4] ss:$12 sps:$4 sm:$0xff]  }
 0x41a   : > { %3183 = vperm.xlu1 %4545, %v5645_v45   ;;  %v5741_v45 = vpop.permute.xlu1 %3018 }
 0x41e   : > { %2552 = vmatmul.mubr.bf16.gmra.mrb[132].mxu1 %v4773_v48  ;;  %4547 = vset.pattern.permute.xlu1 %v4962_v43  ;;  %v4810_v43 = vld [vmem:[%s5161_s24 + $0x1cc] ss:$12 sps:$4 sm:$0xff]   ;;  %v5746_v26 = vpop.permute.xlu1 %3023  ;;  %v4815_v48 = vld [vmem:[%s5161_s24 + $0x230] ss:$12 sps:$4 sm:$0xff]  }
 0x41f   : > { %4420 = vmatmul.mubr.bf16.gmra.mrb[148].mxu0 %v4774_v49  ;;  %2559 = vmatprep.mubr.bf16.mxu1 %v4775_v51 }
 0x420   : > { %4423 = vmatprep.mubr.bf16.mxu0 %v4776_v30  ;;  %3469 = vperm.xlu1 %4547, %v5566_v3   ;;  %v5744_v3 = vpop.permute.xlu0 %2968  ;;  %v4816_v30 = vld [vmem:[%s5161_s24 + $0x1e0] ss:$12 sps:$4 sm:$0xff]  }
 0x422   : > { %v5754_v51 = vpop.permute.xlu1 %3341 }
 0x423   : > { %6307 = vst [vmem:[#allocation15_spill] sm:$0xff] %v5754_v51  ;;  %v4690_v51 = vld [vmem:[%s5877_s18 + $0x20] ss:$8 sps:$4 sm:$0xff]  }
 0x424   : > { %3473 = vperm.xlu1 %4547, %v2943_v5   ;;  %v5751_v49 = vpop.permute.xlu0 %2978 }
 0x426   : > { %2560 = vmatmul.mubr.bf16.gmra.mrb[136].mxu1 %v4777_v21 }
 0x427   : > { %4424 = vmatmul.mubr.bf16.gmra.mrb[152].mxu0 %v4778_v54  ;;  %2567 = vmatprep.mubr.bf16.mxu1 %v4779_v55  ;;  %v5760_v54 = vpop.permute.xlu1 %3345 }
 0x428   : > { %4427 = vmatprep.mubr.bf16.mxu0 %v4780_v39  ;;  %v5757_v21 = vpop.permute.xlu0 %2988  ;;  %v4818_v39 = vld [vmem:[%s5161_s24 + $0x1f8] ss:$12 sps:$4 sm:$0xff]  }
 0x42c   : > { %v5762_v55 = vpop.permute.xlu0 %2998 }
 0x42e   : > { %2568 = vmatmul.mubr.bf16.gmra.mrb[140].mxu1 %v4781_v61  ;;  %v4819_v61 = vld [vmem:[%s5161_s24 + $0x214] ss:$12 sps:$4 sm:$0xff]  }
 0x42f   : > { %4428 = vmatmul.mubr.bf16.gmra.mrb[156].mxu0 %v4782_v56  ;;  %2575 = vmatprep.mubr.bf16.mxu1 %v4783_v11 }
 0x430   : > { %4431 = vmatprep.mubr.bf16.mxu0 %v4784_v62  ;;  %v5768_v56 = vpop.permute.xlu0 %3008  ;;  %v4820_v62 = vld [vmem:[%s5161_s24 + $0x210] ss:$12 sps:$4 sm:$0xff]  }
 0x436   : > { %2576 = vmatmul.mubr.bf16.gmra.mrb[144].mxu1 %v4785_v63  ;;  %v4821_v63 = vld [vmem:[%s5161_s24 + $0x22c] ss:$12 sps:$4 sm:$0xff]  }
 0x437   : > { %4432 = vmatmul.mubr.bf16.gmra.mrb[160].mxu0 %v4786_v0  ;;  %2583 = vmatprep.mubr.bf16.mxu1 %v4787_v1  ;;  %v5774_v0 = vpop.permute.xlu0 %3013 }
 0x438   : > { %4435 = vmatprep.mubr.bf16.mxu0 %v4788_v2  ;;  %v4822_v2 = vld [vmem:[%s5161_s24 + $0x228] ss:$12 sps:$4 sm:$0xff]   ;;  %s3752_s24 = sshll.u32 %s485_s27, 4  ;;  %s6239_s24 = int_to_ptr.vmem [resolvable:$true] %s3752_s24 }
 0x439   : > { %s4883_s16 = scalar_lea.vmem %s6239_s24, 256  ;;  %p4890_p7 = scmp.lt.s32.totalorder %s6239_s24, %s4888_s14 }
 0x43a   : > { %p4884_p1 = scmp.ne.s32.totalorder %s6239_s24, %s4883_s16 }
 0x43b   : > { %v5779_v60 = vpop.permute.xlu0 %3033 }
 0x43c   : > { %6311 = vst [vmem:[#allocation19_spill] sm:$0xff] %v5779_v60  ;;  %p4885_p10 = pnand %p4884_p1, %p6369_p11 }
 0x43e   : > { %2584 = vmatmul.mubr.bf16.gmra.mrb[148].mxu1 %v4789_v4  ;;  %p4886_p5 = pneg %p4885_p10 }
 0x43f   : > { %4436 = vmatmul.mubr.bf16.gmra.mrb[164].mxu0 %v4790_v29  ;;  %2591 = vmatprep.mubr.bf16.mxu1 %v4791_v7  ;;  %v5783_v29 = vpop.permute.xlu0 %3053 }
 0x440   : > { %4439 = vmatprep.mubr.bf16.mxu0 %v4792_v6  ;;  %6313 = vst [vmem:[#allocation21_spill] sm:$0xff] %v5783_v29 }
 0x443   : > { %v5787_v6 = vpop.permute.xlu0 %3073 }
 0x444   : > { %6315 = vst [vmem:[#allocation23_spill] sm:$0xff] %v5787_v6 }
 0x446   : > { %2592 = vmatmul.mubr.bf16.gmra.mrb[152].mxu1 %v4793_v12 }
 0x447   : > { %4440 = vmatmul.mubr.bf16.gmra.mrb[168].mxu0 %v4794_v18  ;;  %2599 = vmatprep.mubr.bf16.mxu1 %v4795_v20  ;;  %v5791_v18 = vpop.permute.xlu0 %3093 }
 0x448   : > { %4443 = vmatprep.mubr.bf16.mxu0 %v4796_v17  ;;  %6317 = vst [vmem:[#allocation25_spill] sm:$0xff] %v5791_v18 }
 0x44b   : > { %v5795_v17 = vpop.permute.xlu0 %3113 }
 0x44c   : > { %6319 = vst [vmem:[#allocation27_spill] sm:$0xff] %v5795_v17 }
 0x44e   : > { %2600 = vmatmul.mubr.bf16.gmra.mrb[156].mxu1 %v4797_v22 }
 0x44f   : > { %4444 = vmatmul.mubr.bf16.gmra.mrb[172].mxu0 %v4798_v38  ;;  %2607 = vmatprep.mubr.bf16.mxu1 %v4799_v23 }
 0x450   : > { %4447 = vmatprep.mubr.bf16.mxu0 %v4800_v33 }
 0x456   : > { %2608 = vmatmul.mubr.bf16.gmra.mrb[160].mxu1 %v4801_v27  ;;  %v5805_v27 = vpop.permute.xlu0 %3133 }
 0x457   : > { %4448 = vmatmul.mubr.bf16.gmra.mrb[176].mxu0 %v4802_v28  ;;  %2615 = vmatprep.mubr.bf16.mxu1 %v4803_v24  ;;  %6322 = vst [vmem:[#allocation30_spill] sm:$0xff] %v5805_v27 }
 0x458   : > { %4451 = vmatprep.mubr.bf16.mxu0 %v4804_v13 }
 0x45e   : > { %2616 = vmatmul.mubr.bf16.gmra.mrb[164].mxu1 %v4805_v34  ;;  %v5809_v34 = vpop.permute.xlu0 %3153 }
 0x45f   : > { %2623 = vmatprep.mubr.bf16.mxu1 %v4806_v36  ;;  %4452 = vmatmul.mubr.bf16.gmra.mrb[180].mxu0 %v4807_v16  ;;  %6324 = vst [vmem:[#allocation32_spill] sm:$0xff] %v5809_v34 }
 0x460   : > { %4455 = vmatprep.mubr.bf16.mxu0 %v4808_v14 }
 0x466   : > { %2624 = vmatmul.mubr.bf16.gmra.mrb[168].mxu1 %v4809_v52 }
 0x467   : > { %2631 = vmatprep.mubr.bf16.mxu1 %v4810_v43  ;;  %4456 = vmatmul.mubr.bf16.gmra.mrb[184].mxu0 %v4811_v44  ;;  %v5813_v43 = vpop.permute.xlu0 %3173 }
 0x468   : > { %4459 = vmatprep.mubr.bf16.mxu0 %v4812_v57  ;;  %6326 = vst [vmem:[#allocation34_spill] sm:$0xff] %v5813_v43 }
 0x46e   : > { %2632 = vmatmul.mubr.bf16.gmra.mrb[172].mxu1 %v4813_v46 }
 0x46f   : > { %2639 = vmatprep.mubr.bf16.mxu1 %v4814_v47  ;;  %4460 = vmatmul.mubr.bf16.gmra.mrb[188].mxu0 %v4815_v48 }
 0x470   : > { %3724 = vmatprep.mubr.bf16.mxu0 %v4961_v32  ;;  %v5766_v32 = vpop.permute.xlu1 %3028 }
 0x471   : > { %6308 = vst [vmem:[#allocation16_spill] sm:$0xff] %v5766_v32 }
 0x474   : > { %v5770_v11 = vpop.permute.xlu1 %3038 }
 0x475   : > { %6309 = vst [vmem:[#allocation17_spill] sm:$0xff] %v5770_v11 }
 0x476   : > { %2640 = vmatmul.mubr.bf16.gmra.mrb[176].mxu1 %v4816_v30  ;;  %v5821_v30 = vpop.permute.xlu0 %3293 }
 0x477   : > { %2647 = vmatprep.mubr.bf16.mxu1 %v4817_v50 }
 0x478   : > { %v5776_v1 = vpop.permute.xlu1 %3043 }
 0x479   : > { %6310 = vst [vmem:[#allocation18_spill] sm:$0xff] %v5776_v1 }
 0x47c   : > { %v5781_v4 = vpop.permute.xlu1 %3357 }
 0x47d   : > { %6312 = vst [vmem:[#allocation20_spill] sm:$0xff] %v5781_v4 }
 0x47e   : > { %2648 = vmatmul.mubr.bf16.gmra.mrb[180].mxu1 %v4818_v39 }
 0x47f   : > { %2655 = vmatprep.mubr.bf16.mxu1 %v4819_v61 }
 0x480   : > { %v5785_v7 = vpop.permute.xlu1 %3361 }
 0x481   : > { %6314 = vst [vmem:[#allocation22_spill] sm:$0xff] %v5785_v7 }
 0x484   : > { %v5789_v12 = vpop.permute.xlu1 %3048 }
 0x485   : > { %6316 = vst [vmem:[#allocation24_spill] sm:$0xff] %v5789_v12  ;;  %v4963_v12 = vmov 0.0  }
 0x486   : > { %2656 = vmatmul.mubr.bf16.gmra.mrb[184].mxu1 %v4820_v62  ;;  %2945 = vst [vmem:[#allocation2] sm:$0xff] %v4963_v12 }
 0x487   : > { %2663 = vmatprep.mubr.bf16.mxu1 %v4821_v63  ;;  %v5829_v63 = vpop.permute.xlu0 %3305 }
 0x488   : > { %v5793_v20 = vpop.permute.xlu1 %3058 }
 0x489   : > { %6318 = vst [vmem:[#allocation26_spill] sm:$0xff] %v5793_v20 }
 0x48c   : > { %v5797_v22 = vpop.permute.xlu1 %3063 }
 0x48d   : > { %6320 = vst [vmem:[#allocation28_spill] sm:$0xff] %v5797_v22 }
 0x48e   : > { %2664 = vmatmul.mubr.bf16.gmra.mrb[188].mxu1 %v4822_v2 }
 0x490   : > { %v5803_v5 = vpop.permute.xlu1 %3373 }
 0x491   : > { %6321 = vst [vmem:[#allocation29_spill] sm:$0xff] %v5803_v5 }
 0x494   : > { %v5807_v13 = vpop.permute.xlu1 %3377 }
 0x495   : > { %6323 = vst [vmem:[#allocation31_spill] sm:$0xff] %v5807_v13  ;;  %v4689_v13 = vld [vmem:[%s5877_s18 + $0x14] ss:$8 sps:$4 sm:$0xff]  }
 0x498   : > { %v5811_v52 = vpop.permute.xlu1 %3068 }
 0x499   : > { %6325 = vst [vmem:[#allocation33_spill] sm:$0xff] %v5811_v52 }
 0x49c   : > { %v5819_v48 = vpop.permute.xlu1 %3078 }
 0x49d   : > { %6327 = vst [vmem:[#allocation35_spill] sm:$0xff] %v5819_v48 }
 0x4a0   : > { %v5827_v62 = vpop.permute.xlu1 %3083 }
 0x4a1   : > { %6328 = vst [vmem:[#allocation36_spill] sm:$0xff] %v5827_v62 }
 0x4a9   : > { %v5799_v38 = vpop.f32.mrb[96].mxu1 }
 0x4aa   : > { %v2483_v23 = vpop.f32.mrb[97].mxu1 }
 0x4ab   : > { %v5801_v33 = vpop.f32.mrb[98].mxu1  ;;  %v5831_v23 = vpop.permute.xlu1 %3389 }
 0x4ac   : > { %v2486_v28 = vpop.f32.mrb[99].mxu1  ;;  %6329 = vst [vmem:[#allocation37_spill] sm:$0xff] %v5831_v23 }
 0x4af   : > { %v5839_v43 = vpop.permute.xlu1 %3393 }
 0x4b0   : > { %6330 = vst [vmem:[#allocation38_spill] sm:$0xff] %v5839_v43 }
 0x4b1   : > { %v2489_v24 = vpop.f32.mrb[100].mxu1 }
 0x4b2   : > { %v2491_v36 = vpop.f32.mrb[101].mxu1 }
 0x4b3   : > { %v2492_v16 = vpop.f32.mrb[102].mxu1  ;;  %v5835_v36 = vpop.permute.xlu0 %3313 }
 0x4b4   : > { %v2494_v14 = vpop.f32.mrb[103].mxu1 }
 0x4b9   : > { %v5815_v44 = vpop.f32.mrb[104].mxu1 }
 0x4ba   : > { %v2499_v57 = vpop.f32.mrb[105].mxu1 }
 0x4bb   : > { %v5817_v46 = vpop.f32.mrb[106].mxu1 }
 0x4bc   : > { %v2502_v47 = vpop.f32.mrb[107].mxu1 }
 0x4c1   : > { %v5823_v50 = vpop.f32.mrb[108].mxu1 }
 0x4c2   : > { %v2507_v39 = vpop.f32.mrb[109].mxu1 }
 0x4c3   : > { %v5825_v61 = vpop.f32.mrb[110].mxu1  ;;  %v5841_v39 = vpop.permute.xlu0 %3321 }
 0x4c4   : > { %v2510_v2 = vpop.f32.mrb[111].mxu1 }
 0x4c5   : > { %v5847_v2 = vpop.permute.xlu1 %3088 }
 0x4c6   : > { %6331 = vst [vmem:[#allocation39_spill] sm:$0xff] %v5847_v2 }
 0x4c7   : > { %v5849_v23 = vpop.permute.xlu0 %3329 }
 0x4c9   : > { %v5833_v28 = vpop.f32.mrb[112].mxu1  ;;  %v5853_v6 = vpop.permute.xlu1 %3098 }
 0x4ca   : > { %v2515_v14 = vpop.f32.mrb[113].mxu1  ;;  %6332 = vst [vmem:[#allocation40_spill] sm:$0xff] %v5853_v6 }
 0x4cb   : > { %v5837_v57 = vpop.f32.mrb[114].mxu1  ;;  %v5857_v43 = vpop.permute.xlu0 %3337 }
 0x4cc   : > { %v2518_v47 = vpop.f32.mrb[115].mxu1 }
 0x4cd   : > { %v5859_v48 = vpop.permute.xlu1 %3103 }
 0x4ce   : > { %6333 = vst [vmem:[#allocation41_spill] sm:$0xff] %v5859_v48  ;;  %v4684_v48 = vld [vmem:[%s5877_s18] ss:$8 sps:$4 sm:$0xff]  }
 0x4cf   : > { %v5867_v2 = vpop.permute.xlu0 %3349 }
 0x4d1   : > { %v5843_v34 = vpop.f32.mrb[116].mxu1  ;;  %v5871_v6 = vpop.permute.xlu1 %3405 }
 0x4d2   : > { %v2523_v27 = vpop.f32.mrb[117].mxu1  ;;  %6334 = vst [vmem:[#allocation42_spill] sm:$0xff] %v5871_v6 }
 0x4d3   : > { %v5845_v17 = vpop.f32.mrb[118].mxu1  ;;  %v5883_v29 = vpop.permute.xlu0 %3353 }
 0x4d4   : > { %v2526_v18 = vpop.f32.mrb[119].mxu1  ;;  %6335 = vst [vmem:[#allocation43_spill] sm:$0xff] %v5883_v29 }
 0x4d5   : > { %v5888_v22 = vpop.permute.xlu1 %3409 }
 0x4d6   : > { %6337 = vst [vmem:[#allocation45_spill] sm:$0xff] %v5888_v22 }
 0x4d9   : > { %v5851_v14 = vpop.f32.mrb[120].mxu1 }
 0x4da   : > { %v2531_v47 = vpop.f32.mrb[121].mxu1 }
 0x4db   : > { %v5855_v62 = vpop.f32.mrb[122].mxu1 }
 0x4dc   : > { %v2534_v52 = vpop.f32.mrb[123].mxu1 }
 0x4dd   : > { %v5879_v52 = vld [vmem:[%s501_s11] ss:$0 sm:$0xff]  ;;  %s6237_s11 = scalar_lea.hbm %s6290_s9, %s4078_s23 }
 0x4de   : > { %v2490_v6 = vadd.f32 %v5879_v52, %v2489_v24  ;;  %v2482_v20 = vadd.f32 %v5879_v52, %v5799_v38  ;;  %v2493_v1 = vadd.f32 %v5879_v52, %v2492_v16  ;;  %v2485_v22 = vadd.f32 %v5879_v52, %v5801_v33  ;;  %v5907_v33 = vpop.permute.xlu1 %3108 }
 0x4e1   : > { %v5861_v27 = vpop.f32.mrb[124].mxu1 }
 0x4e2   : > { %v2539_v18 = vpop.f32.mrb[125].mxu1 }
 0x4e3   : > { %v5869_v5 = vpop.f32.mrb[126].mxu1  ;;  %v4686_v18 = vld [vmem:[%s5877_s18 + $0x4] ss:$8 sps:$4 sm:$0xff]  }
 0x4e4   : > { %v2542_v47 = vpop.f32.mrb[127].mxu1  ;;  %3692 = vmatprep.subr.bf16.mxu0 %v4686_v18  ;;  %v4687_v18 = vld [vmem:[%s5877_s18 + $0x10] ss:$8 sps:$4 sm:$0xff]  }
 0x4e5   : > { %3693 = vmatpush1.bf16.msra.mxu0 %v4684_v48 }
 0x4e6   : > { %3694 = vmatprep.subr.bf16.mxu0 %v4689_v13 }
 0x4e9   : > { %v5886_v47 = vpop.f32.mrb[128].mxu1  ;;  %3695 = vmatpush1.bf16.msra.mxu0 %v4687_v18 }
 0x4ea   : > { %6336 = vst [vmem:[#allocation44_spill] sm:$0xff] %v5886_v47  ;;  %v4417_v4 = vpop.f32.mrb[144].mxu0  ;;  %v2547_v60 = vpop.f32.mrb[129].mxu1 }
 0x4eb   : > { %v2715_v48 = vadd.f32 %v4417_v4, %v2490_v6  ;;  %v2706_v29 = vpop.f32.mrb[145].mxu0  ;;  %v5895_v24 = vpop.f32.mrb[130].mxu1  ;;  %v4692_v60 = vld [vmem:[%s5877_s18 + $0x24] ss:$8 sps:$4 sm:$0xff]   ;;  %v2506_v6 = vadd.f32 %v5879_v52, %v5823_v50 }
 0x4ec   : > { %v2707_v12 = vadd.f32 %v2706_v29, %v2482_v20  ;;  %v4418_v32 = vpop.f32.mrb[146].mxu0  ;;  %v2550_v7 = vpop.f32.mrb[131].mxu1  ;;  %3696 = vmatprep.subr.bf16.mxu0 %v4692_v60  ;;  %v4695_v29 = vld [vmem:[%s5877_s18 + $0x34] ss:$8 sps:$4 sm:$0xff]  }
 0x4ed   : > { %v2718_v38 = vadd.f32 %v4418_v32, %v2493_v1  ;;  %v2709_v11 = vpop.f32.mrb[147].mxu0  ;;  %v5901_v4 = vpop.permute.xlu0 %3365  ;;  %3697 = vmatpush1.bf16.msra.mxu0 %v4690_v51  ;;  %v2498_v32 = vadd.f32 %v5879_v52, %v5815_v44  ;;  %v2501_v1 = vadd.f32 %v5879_v52, %v5817_v46  ;;  %v4693_v51 = vld [vmem:[%s5877_s18 + $0x30] ss:$8 sps:$4 sm:$0xff]   ;;  %v5921_v16 = vadd.f32 %v5698_v10, %v2715_v48 }
 0x4ee   : > { %v2710_v47 = vadd.f32 %v2709_v11, %v2485_v22  ;;  %v2509_v11 = vadd.f32 %v5879_v52, %v5825_v61  ;;  %v5918_v22 = vadd.f32 %v5653_v31, %v2715_v48  ;;  %v5924_v50 = vadd.f32 %v5727_v35, %v2707_v12  ;;  %3698 = vmatprep.subr.bf16.mxu0 %v4695_v29 }
 0x4ef   : > { %v5929_v46 = vadd.f32 %v5694_v8, %v2707_v12  ;;  %v5932_v61 = vadd.f32 %v5660_v41, %v2718_v38  ;;  %v5935_v31 = vadd.f32 %v5706_v19, %v2718_v38 }
 0x4f0   : > { %v5944_v41 = vadd.f32 %v5821_v30, %v2710_v47 }
 0x4f1   : > { %v5905_v13 = vpop.f32.mrb[132].mxu1  ;;  %3699 = vmatpush1.bf16.msra.mxu0 %v4693_v51 }
 0x4f2   : > { %v4421_v7 = vpop.f32.mrb[148].mxu0  ;;  %v2555_v20 = vpop.f32.mrb[133].mxu1 }
 0x4f3   : > { %v2731_v18 = vadd.f32 %v4421_v7, %v2506_v6  ;;  %v2722_v44 = vpop.f32.mrb[149].mxu0  ;;  %v5926_v60 = vpop.f32.mrb[134].mxu1  ;;  %v5938_v6 = vadd.f32 %v5736_v42, %v2710_v47  ;;  %v4698_v20 = vld [vmem:[%s5877_s18 + $0x44] ss:$8 sps:$4 sm:$0xff]  }
 0x4f4   : > { %v2723_v10 = vadd.f32 %v2722_v44, %v2498_v32  ;;  %v4422_v48 = vpop.f32.mrb[150].mxu0  ;;  %v2558_v35 = vpop.f32.mrb[135].mxu1  ;;  %v4696_v44 = vld [vmem:[%s5877_s18 + $0x40] ss:$8 sps:$4 sm:$0xff]   ;;  %3700 = vmatprep.subr.bf16.mxu0 %v4698_v20 }
 0x4f5   : > { %v3192_v7 = vadd.f32 %v5751_v49, %v2731_v18  ;;  %v3486_v29 = vadd.f32 %v5835_v36, %v2731_v18  ;;  %v2734_v8 = vadd.f32 %v4422_v48, %v2509_v11  ;;  %v2725_v12 = vpop.f32.mrb[151].mxu0  ;;  %v5953_v11 = vpop.permute.xlu1 %3118  ;;  %3701 = vmatpush1.bf16.msra.mxu0 %v4696_v44  ;;  %v2514_v18 = vadd.f32 %v5879_v52, %v5833_v28 }
 0x4f6   : > { %v3190_v19 = vadd.f32 %v5744_v3, %v2723_v10  ;;  %v3484_v38 = vadd.f32 %v5829_v63, %v2723_v10  ;;  %v2726_v32 = vadd.f32 %v2725_v12, %v2501_v1  ;;  %v2517_v28 = vadd.f32 %v5879_v52, %v5837_v57  ;;  %v4704_v12 = vld [vmem:[%s5877_s18 + $0x64] ss:$8 sps:$4 sm:$0xff]  }
 0x4f7   : > { %v3236_v51 = vmax.f32 %v5918_v22, %v3192_v7  ;;  %v3530_v42 = vmax.f32 %v5921_v16, %v3486_v29  ;;  %v3193_v49 = vadd.f32 %v5671_v59, %v2734_v8  ;;  %v3487_v36 = vadd.f32 %v5720_v53, %v2734_v8  ;;  %v5965_v16 = vpop.permute.xlu0 %3369  ;;  %v4702_v8 = vld [vmem:[%s5877_s18 + $0x60] ss:$8 sps:$4 sm:$0xff]  }
 0x4f8   : > { %v3234_v30 = vmax.f32 %v5924_v50, %v3190_v19  ;;  %v3528_v3 = vmax.f32 %v5929_v46, %v3484_v38  ;;  %v3191_v63 = vadd.f32 %v5668_v58, %v2726_v32  ;;  %v3485_v47 = vadd.f32 %v5712_v25, %v2726_v32  ;;  %v4701_v50 = vld [vmem:[%s5877_s18 + $0x54] ss:$8 sps:$4 sm:$0xff]  }
 0x4f9   : > { %v3237_v1 = vmax.f32 %v5932_v61, %v3193_v49  ;;  %v3531_v22 = vmax.f32 %v5935_v31, %v3487_v36  ;;  %v2522_v59 = vadd.f32 %v5879_v52, %v5843_v34  ;;  %v5963_v53 = vpop.f32.mrb[136].mxu1  ;;  %v4699_v31 = vld [vmem:[%s5877_s18 + $0x50] ss:$8 sps:$4 sm:$0xff]   ;;  %v2525_v34 = vadd.f32 %v5879_v52, %v5845_v17  ;;  %3702 = vmatprep.subr.bf16.mxu0 %v4701_v50  ;;  %v5983_v38 = vpop.permute.xlu1 %3123  ;;  %v4707_v32 = vld [vmem:[%s5877_s18 + $0x74] ss:$8 sps:$4 sm:$0xff]  }
 0x4fa   : > { %v3235_v58 = vmax.f32 %v5938_v6, %v3191_v63  ;;  %v3529_v25 = vmax.f32 %v5944_v41, %v3485_v47  ;;  %v4425_v46 = vpop.f32.mrb[152].mxu0  ;;  %v2563_v61 = vpop.f32.mrb[137].mxu1  ;;  %3703 = vmatpush1.bf16.msra.mxu0 %v4699_v31 }
 0x4fb   : > { %v2747_v10 = vadd.f32 %v4425_v46, %v2522_v59  ;;  %v2738_v48 = vpop.f32.mrb[153].mxu0  ;;  %v5975_v35 = vpop.f32.mrb[138].mxu1  ;;  %3704 = vmatprep.subr.bf16.mxu0 %v4704_v12  ;;  %v2541_v61 = vadd.f32 %v5879_v52, %v5869_v5 }
 0x4fc   : > { %v2739_v7 = vadd.f32 %v2738_v48, %v2514_v18  ;;  %v4426_v6 = vpop.f32.mrb[154].mxu0  ;;  %v2566_v29 = vpop.f32.mrb[139].mxu1 }
 0x4fd   : > { %v3196_v20 = vadd.f32 %v5762_v55, %v2747_v10  ;;  %v3490_v41 = vadd.f32 %v5849_v23, %v2747_v10  ;;  %v2750_v17 = vadd.f32 %v4426_v6, %v2525_v34  ;;  %v2741_v19 = vpop.f32.mrb[155].mxu0  ;;  %v6000_v18 = vpop.permute.xlu0 %3381  ;;  %v2533_v34 = vadd.f32 %v5879_v52, %v5855_v62 }
 0x4fe   : > { %v3194_v44 = vadd.f32 %v5757_v21, %v2739_v7  ;;  %v3488_v57 = vadd.f32 %v5841_v39, %v2739_v7  ;;  %v2742_v49 = vadd.f32 %v2741_v19, %v2517_v28  ;;  %3705 = vmatpush1.bf16.msra.mxu0 %v4702_v8  ;;  %v4705_v39 = vld [vmem:[%s5877_s18 + $0x70] ss:$8 sps:$4 sm:$0xff]   ;;  %s4889_s18 = scalar_lea.vmem %s4888_s14, 512 }
 0x4ff   : > { %v5988_v36 = vmax.f32 %v3236_v51, %v3196_v20  ;;  %v5990_v63 = vmax.f32 %v3530_v42, %v3490_v41  ;;  %v3197_v55 = vadd.f32 %v5686_v40, %v2750_v17  ;;  %v3491_v23 = vadd.f32 %v5734_v37, %v2750_v17  ;;  %3706 = vmatprep.subr.bf16.mxu0 %v4707_v32  ;;  %v6338_v17 = vld [vmem:[#allocation15_spill] sm:$0xff]  ;;  %p4891_p9 = scmp.lt.s32.totalorder %s4889_s18, %s4883_s16 }
 0x500   : > { %v5994_v47 = vmax.f32 %v3234_v30, %v3194_v44  ;;  %v5996_v59 = vmax.f32 %v3528_v3, %v3488_v57  ;;  %v3195_v50 = vadd.f32 %v5680_v9, %v2742_v49  ;;  %v3489_v21 = vadd.f32 %v5724_v15, %v2742_v49  ;;  %v6011_v30 = vpop.permute.xlu1 %3421  ;;  %v6339_v57 = vld [vmem:[#allocation44_spill] sm:$0xff] }
 0x501   : > { %v6003_v51 = vmax.f32 %v3237_v1, %v3197_v55  ;;  %v2538_v42 = vadd.f32 %v5879_v52, %v5861_v27  ;;  %v6007_v40 = vmax.f32 %v3531_v22, %v3491_v23  ;;  %v6009_v37 = vpop.f32.mrb[140].mxu1  ;;  %v2530_v9 = vadd.f32 %v5879_v52, %v5851_v14  ;;  %p4892_p3 = por %p4891_p9, %p4890_p7 }
 0x502   : > { %v6015_v15 = vmax.f32 %v3235_v58, %v3195_v50  ;;  %v6017_v3 = vmax.f32 %v3529_v25, %v3489_v21  ;;  %v4429_v46 = vpop.f32.mrb[156].mxu0  ;;  %v2571_v1 = vpop.f32.mrb[141].mxu1  ;;  %3707 = vmatpush1.bf16.msra.mxu0 %v4705_v39  ;;  %v2554_v44 = vadd.f32 %v5879_v52, %v5905_v13  ;;  %v2546_v49 = vadd.f32 %v5879_v52, %v6339_v57 }
 0x503   : > { %v2763_v27 = vadd.f32 %v4429_v46, %v2538_v42  ;;  %v2754_v22 = vpop.f32.mrb[157].mxu0  ;;  %v6021_v31 = vpop.f32.mrb[142].mxu1  ;;  %v2557_v23 = vadd.f32 %v5879_v52, %v5926_v60  ;;  %v2549_v13 = vadd.f32 %v5879_v52, %v5895_v24  ;;  %v6340_v42 = vld [vmem:[#allocation17_spill] sm:$0xff]  ;;  %v6342_v1 = vld [vmem:[#allocation16_spill] sm:$0xff]  ;;  %p4893_p12 = pnand %p4892_p3, %p4886_p5 }
 0x504   : > { %v2755_v10 = vadd.f32 %v2754_v22, %v2530_v9  ;;  %v4430_v48 = vpop.f32.mrb[158].mxu0  ;;  %v2574_v28 = vpop.f32.mrb[143].mxu1  ;;  %v6341_v9 = vld [vmem:[#allocation22_spill] sm:$0xff] }
 0x505   : > { %v3200_v14 = vadd.f32 %v5741_v45, %v2763_v27  ;;  %v3494_v58 = vadd.f32 %v5760_v54, %v2763_v27  ;;  %v2766_v25 = vadd.f32 %v4430_v48, %v2541_v61  ;;  %v2757_v7 = vpop.f32.mrb[159].mxu0  ;;  %v6343_v27 = vld [vmem:[#allocation43_spill] sm:$0xff]  ;;  %v6344_v48 = vld [vmem:[#allocation18_spill] sm:$0xff] }
 0x506   : > { %v3198_v6 = vadd.f32 %v5768_v56, %v2755_v10  ;;  %v3492_v5 = vadd.f32 %v5857_v43, %v2755_v10  ;;  %v2758_v29 = vadd.f32 %v2757_v7, %v2533_v34  ;;  %v6037_v56 = vpop.permute.xlu0 %3385 }
 0x507   : > { %v3244_v8 = vmax.f32 %v5988_v36, %v3200_v14  ;;  %v3538_v12 = vmax.f32 %v5990_v63, %v3494_v58  ;;  %v3201_v62 = vadd.f32 %v5746_v26, %v2766_v25  ;;  %v3495_v20 = vadd.f32 %v5867_v2, %v2766_v25  ;;  %v6045_v2 = vpop.permute.xlu1 %3425  ;;  %v6345_v25 = vld [vmem:[#allocation19_spill] sm:$0xff] }
 0x508   : > { %v3242_v41 = vmax.f32 %v5994_v47, %v3198_v6  ;;  %v3536_v45 = vmax.f32 %v5996_v59, %v3492_v5  ;;  %v3199_v54 = vadd.f32 %v5774_v0, %v2758_v29  ;;  %v3493_v19 = vadd.f32 %v6338_v17, %v2758_v29  ;;  %v6346_v6 = vld [vmem:[#allocation20_spill] sm:$0xff] }
 0x509   : > { %v3245_v43 = vmax.f32 %v6003_v51, %v3201_v62  ;;  %v3539_v32 = vmax.f32 %v6007_v40, %v3495_v20  ;;  %v6043_v26 = vpop.f32.mrb[144].mxu1 }
 0x50a   : > { %v3243_v0 = vmax.f32 %v6015_v15, %v3199_v54  ;;  %v3537_v36 = vmax.f32 %v6017_v3, %v3493_v19  ;;  %v4433_v63 = vpop.f32.mrb[160].mxu0  ;;  %v2579_v55 = vpop.f32.mrb[145].mxu1 }
 0x50b   : > { %v2779_v47 = vadd.f32 %v4433_v63, %v2554_v44  ;;  %v2770_v59 = vpop.f32.mrb[161].mxu0  ;;  %v6053_v50 = vpop.f32.mrb[146].mxu1 }
 0x50c   : > { %v2771_v21 = vadd.f32 %v2770_v59, %v2546_v49  ;;  %v4434_v39 = vpop.f32.mrb[162].mxu0  ;;  %v2582_v51 = vpop.f32.mrb[147].mxu1 }
 0x50d   : > { %v3204_v40 = vadd.f32 %v6340_v42, %v2779_v47  ;;  %v3498_v15 = vadd.f32 %v6341_v9, %v2779_v47  ;;  %v2782_v3 = vadd.f32 %v4434_v39, %v2557_v23  ;;  %v2773_v46 = vpop.f32.mrb[163].mxu0  ;;  %v6073_v29 = vpop.permute.xlu0 %3397  ;;  %v6347_v23 = vld [vmem:[#allocation26_spill] sm:$0xff] }
 0x50e   : > { %v3202_v61 = vadd.f32 %v6342_v1, %v2771_v21  ;;  %v3496_v60 = vadd.f32 %v6343_v27, %v2771_v21  ;;  %v2774_v22 = vadd.f32 %v2773_v46, %v2549_v13  ;;  %v6081_v54 = vpop.permute.xlu1 %3128  ;;  %v6349_v13 = vld [vmem:[#allocation24_spill] sm:$0xff]  ;;  %v6351_v1 = vld [vmem:[#allocation21_spill] sm:$0xff] }
 0x50f   : > { %v6061_v34 = vmax.f32 %v3244_v8, %v3204_v40  ;;  %v6063_v10 = vmax.f32 %v3538_v12, %v3498_v15  ;;  %v3205_v24 = vadd.f32 %v6344_v48, %v2782_v3  ;;  %v3499_v28 = vadd.f32 %v5901_v4, %v2782_v3  ;;  %v6350_v40 = vld [vmem:[#allocation28_spill] sm:$0xff]  ;;  %v6352_v27 = vld [vmem:[#allocation29_spill] sm:$0xff] }
 0x510   : > { %v6067_v14 = vmax.f32 %v3242_v41, %v3202_v61  ;;  %v6069_v58 = vmax.f32 %v3536_v45, %v3496_v60  ;;  %v3203_v7 = vadd.f32 %v6345_v25, %v2774_v22  ;;  %v3497_v5 = vadd.f32 %v6346_v6, %v2774_v22 }
 0x511   : > { %v6075_v62 = vmax.f32 %v3245_v43, %v3205_v24  ;;  %v6077_v8 = vmax.f32 %v3539_v32, %v3499_v28  ;;  %v2570_v12 = vadd.f32 %v5879_v52, %v6009_v37  ;;  %v2585_v20 = vpop.f32.mrb[148].mxu1  ;;  %v2562_v4 = vadd.f32 %v5879_v52, %v5963_v53  ;;  %v3402_v48 = vpop.permute.xlu0 %3401 }
 0x512   : > { %v6085_v41 = vmax.f32 %v3243_v0, %v3203_v7  ;;  %v6087_v45 = vmax.f32 %v3537_v36, %v3497_v5  ;;  %v4437_v17 = vpop.f32.mrb[164].mxu0  ;;  %v2587_v19 = vpop.f32.mrb[149].mxu1  ;;  %v2573_v43 = vadd.f32 %v5879_v52, %v6021_v31  ;;  %v2565_v37 = vadd.f32 %v5879_v52, %v5975_v35  ;;  %v6348_v0 = vld [vmem:[#allocation31_spill] sm:$0xff] }
 0x513   : > { %v2795_v32 = vadd.f32 %v4437_v17, %v2570_v12  ;;  %v2786_v44 = vpop.f32.mrb[165].mxu0  ;;  %v2588_v57 = vpop.f32.mrb[150].mxu1 }
 0x514   : > { %v2787_v49 = vadd.f32 %v2786_v44, %v2562_v4  ;;  %v4438_v63 = vpop.f32.mrb[166].mxu0  ;;  %v2590_v55 = vpop.f32.mrb[151].mxu1  ;;  %v2589_v25 = vadd.f32 %v5879_v52, %v2588_v57  ;;  %v6353_v4 = vld [vmem:[#allocation35_spill] sm:$0xff] }
 0x515   : > { %v3208_v53 = vadd.f32 %v6347_v23, %v2795_v32  ;;  %v3502_v47 = vadd.f32 %v6348_v0, %v2795_v32  ;;  %v2798_v36 = vadd.f32 %v4438_v63, %v2573_v43  ;;  %v2789_v59 = vpop.f32.mrb[167].mxu0  ;;  %v6101_v15 = vpop.permute.xlu1 %3138  ;;  %v6355_v32 = vld [vmem:[#allocation33_spill] sm:$0xff] }
 0x516   : > { %v3206_v21 = vadd.f32 %v6349_v13, %v2787_v49  ;;  %v3500_v39 = vadd.f32 %v5965_v16, %v2787_v49  ;;  %v2790_v31 = vadd.f32 %v2789_v59, %v2565_v37  ;;  %v6358_v59 = vld [vmem:[#allocation37_spill] sm:$0xff] }
 0x517   : > { %v3252_v51 = vmax.f32 %v6061_v34, %v3208_v53  ;;  %v3546_v42 = vmax.f32 %v6063_v10, %v3502_v47  ;;  %v3209_v35 = vadd.f32 %v6350_v40, %v2798_v36  ;;  %v3503_v9 = vadd.f32 %v6000_v18, %v2798_v36  ;;  %v6357_v47 = vld [vmem:[#allocation23_spill] sm:$0xff] }
 0x518   : > { %v3250_v3 = vmax.f32 %v6067_v14, %v3206_v21  ;;  %v3544_v46 = vmax.f32 %v6069_v58, %v3500_v39  ;;  %v3207_v61 = vadd.f32 %v6351_v1, %v2790_v31  ;;  %v3501_v60 = vadd.f32 %v6352_v27, %v2790_v31  ;;  %v3414_v21 = vpop.permute.xlu0 %3413 }
 0x519   : > { %v3253_v16 = vmax.f32 %v6075_v62, %v3209_v35  ;;  %v3547_v22 = vmax.f32 %v6077_v8, %v3503_v9  ;;  %v2586_v34 = vadd.f32 %v5879_v52, %v2585_v20  ;;  %v2593_v10 = vpop.f32.mrb[152].mxu1  ;;  %v2578_v18 = vadd.f32 %v5879_v52, %v6043_v26  ;;  %v6354_v26 = vld [vmem:[#allocation38_spill] sm:$0xff] }
 0x51a   : > { %v3251_v24 = vmax.f32 %v6085_v41, %v3207_v61  ;;  %v3545_v28 = vmax.f32 %v6087_v45, %v3501_v60  ;;  %v4441_v14 = vpop.f32.mrb[168].mxu0  ;;  %v2595_v58 = vpop.f32.mrb[153].mxu1  ;;  %v2581_v62 = vadd.f32 %v5879_v52, %v6053_v50  ;;  %v6356_v50 = vld [vmem:[#allocation36_spill] sm:$0xff] }
 0x51b   : > { %v2811_v7 = vadd.f32 %v4441_v14, %v2586_v34  ;;  %v2802_v6 = vpop.f32.mrb[169].mxu0  ;;  %v2596_v5 = vpop.f32.mrb[154].mxu1  ;;  %v6359_v14 = vld [vmem:[#allocation40_spill] sm:$0xff] }
 0x51c   : > { %v2803_v8 = vadd.f32 %v2802_v6, %v2578_v18  ;;  %v4442_v12 = vpop.f32.mrb[170].mxu0  ;;  %v2598_v20 = vpop.f32.mrb[155].mxu1  ;;  %v2597_v34 = vadd.f32 %v5879_v52, %v2596_v5  ;;  %v6363_v5 = vld [vmem:[#allocation25_spill] sm:$0xff] }
 0x51d   : > { %v3212_v17 = vadd.f32 %v6353_v4, %v2811_v7  ;;  %v3506_v19 = vadd.f32 %v6354_v26, %v2811_v7  ;;  %v2814_v41 = vadd.f32 %v4442_v12, %v2589_v25  ;;  %v2805_v43 = vpop.f32.mrb[171].mxu0  ;;  %v6119_v45 = vpop.permute.xlu1 %3143  ;;  %v6362_v26 = vld [vmem:[#allocation41_spill] sm:$0xff] }
 0x51e   : > { %v3210_v44 = vadd.f32 %v6355_v32, %v2803_v8  ;;  %v3504_v57 = vadd.f32 %v6037_v56, %v2803_v8  ;;  %v2806_v37 = vadd.f32 %v2805_v43, %v2581_v62  ;;  %v3418_v4 = vpop.permute.xlu0 %3417  ;;  %v6364_v43 = vld [vmem:[#allocation42_spill] sm:$0xff] }
 0x51f   : > { %v6123_v49 = vmax.f32 %v3252_v51, %v3212_v17  ;;  %v6125_v63 = vmax.f32 %v3546_v42, %v3506_v19  ;;  %v3213_v55 = vadd.f32 %v6356_v50, %v2814_v41  ;;  %v3507_v23 = vadd.f32 %v6073_v29, %v2814_v41 }
 0x520   : > { %v3254_v53 = vmax.f32 %v3250_v3, %v3210_v44  ;;  %v3548_v0 = vmax.f32 %v3544_v46, %v3504_v57  ;;  %v3211_v36 = vadd.f32 %v6357_v47, %v2806_v37  ;;  %v3505_v13 = vadd.f32 %v6358_v59, %v2806_v37 }
 0x521   : > { %v6131_v39 = vmax.f32 %v3253_v16, %v3213_v55  ;;  %v6133_v31 = vmax.f32 %v3547_v22, %v3507_v23  ;;  %v2601_v56 = vpop.f32.mrb[156].mxu1  ;;  %v6135_v51 = vpop.permute.xlu1 %3437  ;;  %v2594_v42 = vadd.f32 %v5879_v52, %v2593_v10  ;;  %v6360_v10 = vld [vmem:[#allocation45_spill] sm:$0xff] }
 0x522   : > { %v3255_v40 = vmax.f32 %v3251_v24, %v3211_v36  ;;  %v3549_v35 = vmax.f32 %v3545_v28, %v3505_v13  ;;  %v2602_v29 = vadd.f32 %v5879_v52, %v2601_v56  ;;  %v2603_v9 = vpop.f32.mrb[157].mxu1  ;;  %v4445_v3 = vpop.f32.mrb[172].mxu0  ;;  %v6361_v28 = vld [vmem:[#allocation39_spill] sm:$0xff] }
 0x523   : > { %v2604_v46 = vpop.f32.mrb[158].mxu1  ;;  %v2818_v1 = vpop.f32.mrb[173].mxu0 }
 0x524   : > { %v2827_v61 = vadd.f32 %v4445_v3, %v2602_v29  ;;  %v2605_v27 = vadd.f32 %v5879_v52, %v2604_v46  ;;  %v2819_v60 = vadd.f32 %v2818_v1, %v2594_v42  ;;  %v4446_v16 = vpop.f32.mrb[174].mxu0  ;;  %v2606_v22 = vpop.f32.mrb[159].mxu1 }
 0x525   : > { %v2821_v18 = vpop.f32.mrb[175].mxu0  ;;  %v6149_v37 = vpop.permute.xlu1 %3441 }
 0x526   : > { %v3216_v58 = vadd.f32 %v6359_v14, %v2827_v61  ;;  %v3510_v24 = vadd.f32 %v6360_v10, %v2827_v61  ;;  %v3214_v25 = vadd.f32 %v6361_v28, %v2819_v60  ;;  %v3508_v7 = vadd.f32 %v3402_v48, %v2819_v60 }
 0x527   : > { %v2830_v6 = vadd.f32 %v4446_v16, %v2605_v27  ;;  %v2822_v62 = vadd.f32 %v2821_v18, %v2597_v34 }
 0x528   : > { %v3260_v8 = vmax.f32 %v6123_v49, %v3216_v58  ;;  %v3554_v12 = vmax.f32 %v6125_v63, %v3510_v24  ;;  %v3258_v20 = vmax.f32 %v3254_v53, %v3214_v25  ;;  %v3552_v17 = vmax.f32 %v3548_v0, %v3508_v7 }
 0x529   : > { %v3217_v19 = vadd.f32 %v6362_v26, %v2830_v6  ;;  %v3215_v41 = vadd.f32 %v6363_v5, %v2822_v62  ;;  %v3509_v32 = vadd.f32 %v6364_v43, %v2822_v62  ;;  %v3511_v44 = vadd.f32 %v3414_v21, %v2830_v6  ;;  %v2609_v57 = vpop.f32.mrb[160].mxu1  ;;  %v6162_v61 = vpop.permute.xlu1 %3148 }
 0x52a   : > { %v2610_v48 = vadd.f32 %v5879_v52, %v2609_v57  ;;  %v2611_v50 = vpop.f32.mrb[161].mxu1  ;;  %v4449_v55 = vpop.f32.mrb[176].mxu0 }
 0x52b   : > { %v3261_v49 = vmax.f32 %v6131_v39, %v3217_v19  ;;  %v3259_v63 = vmax.f32 %v3255_v40, %v3215_v41  ;;  %v3553_v23 = vmax.f32 %v3549_v35, %v3509_v32  ;;  %v3555_v53 = vmax.f32 %v6133_v31, %v3511_v44  ;;  %v2612_v0 = vpop.f32.mrb[162].mxu1  ;;  %v2834_v47 = vpop.f32.mrb[177].mxu0  ;;  %v6365_v39 = vld [vmem:[#allocation27_spill] sm:$0xff] }
 0x52c   : > { %v2613_v36 = vadd.f32 %v5879_v52, %v2612_v0  ;;  %v2835_v59 = vadd.f32 %v2834_v47, %v2610_v48  ;;  %v4450_v13 = vpop.f32.mrb[178].mxu0  ;;  %v2614_v21 = vpop.f32.mrb[163].mxu1  ;;  %v6366_v0 = vld [vmem:[#allocation30_spill] sm:$0xff] }
 0x52d   : > { %v2837_v56 = vpop.f32.mrb[179].mxu0  ;;  %v3430_v35 = vpop.permute.xlu0 %3429 }
 0x52e   : > { %v3218_v42 = vadd.f32 %v5907_v33, %v2835_v59  ;;  %v3512_v29 = vadd.f32 %v3418_v4, %v2835_v59  ;;  %v2838_v9 = vadd.f32 %v2837_v56, %v2613_v36  ;;  %v6172_v6 = vpop.permute.xlu1 %3158 }
 0x530   : > { %v6156_v3 = vmax.f32 %v3258_v20, %v3218_v42  ;;  %v6158_v46 = vmax.f32 %v3552_v17, %v3512_v29  ;;  %v3219_v40 = vadd.f32 %v6365_v39, %v2838_v9  ;;  %v3513_v31 = vadd.f32 %v6011_v30, %v2838_v9 }
 0x531   : > { %v2617_v1 = vpop.f32.mrb[164].mxu1  ;;  %v3434_v19 = vpop.permute.xlu0 %3433 }
 0x532   : > { %v6164_v27 = vmax.f32 %v3259_v63, %v3219_v40  ;;  %v6166_v60 = vmax.f32 %v3553_v23, %v3513_v31  ;;  %v2618_v33 = vadd.f32 %v5879_v52, %v2617_v1  ;;  %v2619_v16 = vpop.f32.mrb[165].mxu1  ;;  %v4453_v22 = vpop.f32.mrb[180].mxu0 }
 0x533   : > { %v2620_v34 = vpop.f32.mrb[166].mxu1  ;;  %v2850_v18 = vpop.f32.mrb[181].mxu0 }
 0x534   : > { %v2843_v14 = vadd.f32 %v4449_v55, %v2618_v33  ;;  %v2621_v58 = vadd.f32 %v5879_v52, %v2620_v34  ;;  %v2622_v10 = vpop.f32.mrb[167].mxu1  ;;  %v4454_v24 = vpop.f32.mrb[182].mxu0 }
 0x535   : > { %v2853_v30 = vpop.f32.mrb[183].mxu0 }
 0x536   : > { %v3220_v28 = vadd.f32 %v5953_v11, %v2843_v14  ;;  %v3514_v25 = vadd.f32 %v6045_v2, %v2843_v14  ;;  %v2846_v7 = vadd.f32 %v4450_v13, %v2621_v58 }
 0x538   : > { %v6174_v62 = vmax.f32 %v3260_v8, %v3220_v28  ;;  %v6176_v20 = vmax.f32 %v3554_v12, %v3514_v25  ;;  %v3221_v4 = vadd.f32 %v5983_v38, %v2846_v7  ;;  %v3515_v17 = vadd.f32 %v3430_v35, %v2846_v7  ;;  %v6189_v38 = vpop.permute.xlu1 %3163 }
 0x539   : > { %v2625_v26 = vpop.f32.mrb[168].mxu1 }
 0x53a   : > { %v6179_v5 = vmax.f32 %v3261_v49, %v3221_v4  ;;  %v6181_v41 = vmax.f32 %v3555_v53, %v3515_v17  ;;  %v2626_v11 = vadd.f32 %v5879_v52, %v2625_v26  ;;  %v2627_v43 = vpop.f32.mrb[169].mxu1  ;;  %v6184_v2 = vpop.f32.mrb[184].mxu0 }
 0x53b   : > { %v2628_v32 = vpop.f32.mrb[170].mxu1  ;;  %v2866_v44 = vpop.f32.mrb[185].mxu0 }
 0x53c   : > { %v2629_v8 = vadd.f32 %v5879_v52, %v2628_v32  ;;  %v2851_v12 = vadd.f32 %v2850_v18, %v2626_v11  ;;  %v2630_v57 = vpop.f32.mrb[171].mxu1  ;;  %v6187_v48 = vpop.f32.mrb[186].mxu0 }
 0x53d   : > { %v2869_v50 = vpop.f32.mrb[187].mxu0  ;;  %v3454_v13 = vpop.permute.xlu1 %3453 }
 0x53e   : > { %v3222_v55 = vadd.f32 %v6081_v54, %v2851_v12  ;;  %v3516_v49 = vadd.f32 %v3434_v19, %v2851_v12  ;;  %v2854_v63 = vadd.f32 %v2853_v30, %v2629_v8  ;;  %v6367_v19 = vld [vmem:[#allocation32_spill] sm:$0xff] }
 0x540   : > { %v3266_v23 = vmax.f32 %v6156_v3, %v3222_v55  ;;  %v3560_v53 = vmax.f32 %v6158_v46, %v3516_v49  ;;  %v3223_v47 = vadd.f32 %v6366_v0, %v2854_v63  ;;  %v3517_v36 = vadd.f32 %v6135_v51, %v2854_v63 }
 0x541   : > { %v2633_v59 = vpop.f32.mrb[172].mxu1  ;;  %v3458_v33 = vpop.permute.xlu1 %3457 }
 0x542   : > { %v3267_v21 = vmax.f32 %v6164_v27, %v3223_v47  ;;  %v3561_v56 = vmax.f32 %v6166_v60, %v3517_v36  ;;  %v2634_v42 = vadd.f32 %v5879_v52, %v2633_v59  ;;  %v2635_v29 = vpop.f32.mrb[173].mxu1  ;;  %v6199_v54 = vpop.f32.mrb[188].mxu0 }
 0x543   : > { %v2636_v9 = vpop.f32.mrb[174].mxu1  ;;  %v2882_v39 = vpop.f32.mrb[189].mxu0 }
 0x544   : > { %v2859_v3 = vadd.f32 %v4453_v22, %v2634_v42  ;;  %v2637_v46 = vadd.f32 %v5879_v52, %v2636_v9  ;;  %v2638_v40 = vpop.f32.mrb[175].mxu1  ;;  %v6202_v31 = vpop.f32.mrb[190].mxu0 }
 0x545   : > { %v2885_v51 = vpop.f32.mrb[191].mxu0  ;;  %v3446_v60 = vpop.permute.xlu0 %3445 }
 0x546   : > { %v3224_v35 = vadd.f32 %v6101_v15, %v2859_v3  ;;  %v3518_v1 = vadd.f32 %v6149_v37, %v2859_v3  ;;  %v2862_v27 = vadd.f32 %v4454_v24, %v2637_v46 }
 0x548   : > { %v3268_v16 = vmax.f32 %v6174_v62, %v3224_v35  ;;  %v3225_v34 = vadd.f32 %v6119_v45, %v2862_v27  ;;  %v3519_v18 = vadd.f32 %v3446_v60, %v2862_v27  ;;  %v3562_v22 = vmax.f32 %v6176_v20, %v3518_v1  ;;  %v3169_v62 = vpop.permute.xlu1 %3168 }
 0x549   : > { %v2641_v14 = vpop.f32.mrb[176].mxu1  ;;  %v3450_v7 = vpop.permute.xlu0 %3449 }
 0x54a   : > { %v3269_v58 = vmax.f32 %v6179_v5, %v3225_v34  ;;  %v3563_v10 = vmax.f32 %v6181_v41, %v3519_v18  ;;  %v2642_v30 = vadd.f32 %v5879_v52, %v2641_v14  ;;  %v2643_v15 = vpop.f32.mrb[177].mxu1 }
 0x54b   : > { %v2644_v28 = vpop.f32.mrb[178].mxu1 }
 0x54c   : > { %v2645_v37 = vadd.f32 %v5879_v52, %v2644_v28  ;;  %v2867_v24 = vadd.f32 %v2866_v44, %v2642_v30  ;;  %v2646_v25 = vpop.f32.mrb[179].mxu1  ;;  %v3179_v44 = vpop.permute.xlu1 %3178 }
 0x54e   : > { %v3226_v45 = vadd.f32 %v6162_v61, %v2867_v24  ;;  %v3520_v4 = vadd.f32 %v3450_v7, %v2867_v24  ;;  %v2870_v17 = vadd.f32 %v2869_v50, %v2645_v37 }
 0x550   : > { %v3270_v20 = vmax.f32 %v3266_v23, %v3226_v45  ;;  %v3564_v26 = vmax.f32 %v3560_v53, %v3520_v4  ;;  %v3227_v5 = vadd.f32 %v6367_v19, %v2870_v17  ;;  %v3521_v11 = vadd.f32 %v3454_v13, %v2870_v17  ;;  %v3462_v53 = vpop.permute.xlu0 %3461 }
 0x551   : > { %v2649_v41 = vpop.f32.mrb[180].mxu1 }
 0x552   : > { %v3271_v43 = vmax.f32 %v3267_v21, %v3227_v5  ;;  %v2650_v32 = vadd.f32 %v5879_v52, %v2649_v41  ;;  %v2651_v8 = vpop.f32.mrb[181].mxu1  ;;  %v3565_v12 = vmax.f32 %v3561_v56, %v3521_v11  ;;  %v3184_v21 = vpop.permute.xlu1 %3183 }
 0x553   : > { %v2652_v57 = vpop.f32.mrb[182].mxu1 }
 0x554   : > { %v2875_v55 = vadd.f32 %v6184_v2, %v2650_v32  ;;  %v2653_v49 = vadd.f32 %v5879_v52, %v2652_v57  ;;  %v2654_v61 = vpop.f32.mrb[183].mxu1  ;;  %v3466_v40 = vpop.permute.xlu0 %3465 }
 0x556   : > { %v3228_v50 = vadd.f32 %v6172_v6, %v2875_v55  ;;  %v3522_v63 = vadd.f32 %v3458_v33, %v2875_v55  ;;  %v2878_v23 = vadd.f32 %v6187_v48, %v2653_v49  ;;  %v3470_v48 = vpop.permute.xlu1 %3469  ;;  %v6368_v33 = vld [vmem:[#allocation34_spill] sm:$0xff] }
 0x558   : > { %v3272_v0 = vmax.f32 %v3268_v16, %v3228_v50  ;;  %v3229_v47 = vadd.f32 %v6189_v38, %v2878_v23  ;;  %v3523_v36 = vadd.f32 %v3462_v53, %v2878_v23  ;;  %v3566_v59 = vmax.f32 %v3562_v22, %v3522_v63  ;;  %v3478_v45 = vpop.permute.xlu0 %3477 }
 0x559   : > { %v2657_v13 = vpop.f32.mrb[184].mxu1 }
 0x55a   : > { %v3273_v56 = vmax.f32 %v3269_v58, %v3229_v47  ;;  %v3567_v42 = vmax.f32 %v3563_v10, %v3523_v36  ;;  %v2658_v2 = vadd.f32 %v5879_v52, %v2657_v13  ;;  %v2659_v29 = vpop.f32.mrb[185].mxu1 }
 0x55b   : > { %v2660_v9 = vpop.f32.mrb[186].mxu1 }
 0x55c   : > { %v2661_v3 = vadd.f32 %v5879_v52, %v2660_v9  ;;  %v2883_v6 = vadd.f32 %v2882_v39, %v2658_v2  ;;  %v2662_v46 = vpop.f32.mrb[187].mxu1 }
 0x55e   : > { %v3230_v35 = vadd.f32 %v3169_v62, %v2883_v6  ;;  %v3524_v1 = vadd.f32 %v3466_v40, %v2883_v6  ;;  %v2886_v27 = vadd.f32 %v2885_v51, %v2661_v3  ;;  %v3474_v51 = vpop.permute.xlu1 %3473 }
 0x560   : > { %v3274_v38 = vmax.f32 %v3270_v20, %v3230_v35  ;;  %v3568_v60 = vmax.f32 %v3564_v26, %v3524_v1  ;;  %v3231_v16 = vadd.f32 %v6368_v33, %v2886_v27  ;;  %v3525_v34 = vadd.f32 %v3470_v48, %v2886_v27 }
 0x561   : > { %v2665_v18 = vpop.f32.mrb[188].mxu1 }
 0x562   : > { %v3275_v22 = vmax.f32 %v3271_v43, %v3231_v16  ;;  %v3569_v14 = vmax.f32 %v3565_v12, %v3525_v34  ;;  %v2666_v58 = vadd.f32 %v5879_v52, %v2665_v18  ;;  %v2667_v10 = vpop.f32.mrb[189].mxu1 }
 0x563   : > { %v2668_v30 = vpop.f32.mrb[190].mxu1 }
 0x564   : > { %v3278_v15 = vmax.f32 %v3274_v38, %v3275_v22  ;;  %v3572_v39 = vmax.f32 %v3568_v60, %v3569_v14  ;;  %v2669_v28 = vadd.f32 %v5879_v52, %v2668_v30  ;;  %v2891_v37 = vadd.f32 %v6199_v54, %v2666_v58  ;;  %v2670_v24 = vpop.f32.mrb[191].mxu1 }
 0x566   : > { %v3232_v25 = vadd.f32 %v3179_v44, %v2891_v37  ;;  %v3526_v7 = vadd.f32 %v3474_v51, %v2891_v37  ;;  %v2894_v62 = vadd.f32 %v6202_v31, %v2669_v28 }
 0x568   : > { %v3276_v4 = vmax.f32 %v3272_v0, %v3232_v25  ;;  %v3570_v17 = vmax.f32 %v3566_v59, %v3526_v7  ;;  %v3233_v20 = vadd.f32 %v3184_v21, %v2894_v62  ;;  %v3527_v26 = vadd.f32 %v3478_v45, %v2894_v62  ;;  %v3600_v59 = vld [vmem:[%s515_s22] sm:$0x3] }
 0x569   : > { %v3602_v0 = vlaneseq }
 0x56a   : > { %v3277_v19 = vmax.f32 %v3273_v56, %v3233_v20  ;;  %v3571_v5 = vmax.f32 %v3567_v42, %v3527_v26 }
 0x56b   : > { %v3603_v47 = vshrl.u32 %v3602_v0, 7 }
 0x56c   : > { %v3279_v11 = vmax.f32 %v3276_v4, %v3277_v19  ;;  %v3573_v41 = vmax.f32 %v3570_v17, %v3571_v5 }
 0x56d   : > { %v3604_v36 = vsub.s32 0, %v3603_v47  ;;  %v3608_v13 = vsub.s32 1, %v3603_v47 }
 0x56e   : > { %v3280_v43 = vmax.f32 %v3278_v15, %v3279_v11  ;;  %v3574_v32 = vmax.f32 %v3572_v39, %v3573_v41 }
 0x56f   : > { %v3605_v21 = vrot.slane %v3600_v59, %v3604_v36  ;;  %v3609_v56 = vrot.slane %v3600_v59, %v3608_v13 }
 0x570   : > { %v3281_v52 = vrot.slane %v3280_v43, 4  ;;  %v3575_v8 = vrot.slane %v3574_v32, 4 }
 0x572   : > { %v3282_v54 = vmax.f32 %v3280_v43, %v3281_v52  ;;  %v3576_v12 = vmax.f32 %v3574_v32, %v3575_v8 }
 0x574   : > { %v3283_v57 = vrot.slane %v3282_v54, 2  ;;  %v3577_v44 = vrot.slane %v3576_v12, 2 }
 0x576   : > { %v3284_v55 = vmax.f32 %v3282_v54, %v3283_v57  ;;  %v3578_v31 = vmax.f32 %v3576_v12, %v3577_v44 }
 0x578   : > { %v3285_v49 = vrot.slane %v3284_v55, 1  ;;  %v3579_v61 = vrot.slane %v3578_v31, 1 }
 0x57a   : > { %v3286_v50 = vmax.f32 %v3284_v55, %v3285_v49  ;;  %v3580_v63 = vmax.f32 %v3578_v31, %v3579_v61 }
 0x57c   : > { %3287 = vst [vmem:[#allocation2] sm:$0x1] %v3286_v50  ;;  %3581 = vst [vmem:[#allocation2 + $0x1] sm:$0x1] %v3580_v63 }
 0x583   : > { %v3582_v23 = vld [vmem:[#allocation2] sm:$0xff] }
 0x584   : > { %v3583_v53 = vpack.c.bf16 %v3582_v23, %v3582_v23 }
 0x586   : > { %3725 = vmatmul.mubr.bf16.vlgmr.msra.gmra.mrb[192].mxu0 %v3583_v53 }
 0x659   : > { %v3726_v42 = vpop.f32.mrb[192].mxu0 }
 0x65a   : > { %v3727_v2 = vadd.f32 %v3726_v42, %v3605_v21  ;;  %v3728_v29 = vpop.f32.mrb[193].mxu0 }
 0x65b   : > { %v3729_v9 = vadd.f32 %v3728_v29, %v3609_v56  ;;  %v3730_v3 = vpop.f32.mrb[194].mxu0 }
 0x65c   : > { %v3733_v6 = vmax.f32 %v3727_v2, 0.0  ;;  %v3731_v46 = vpop.f32.mrb[195].mxu0 }
 0x65d   : > { %v3734_v40 = vmax.f32 %v3729_v9, 0.0 }
 0x65e   : > { %3735 = vst [vmem:[%s485_s27] sm:$0xff] %v3733_v6 }
 0x65f   : > { %3736 = vst [vmem:[%s485_s27 + $0x8] sm:$0xff] %v3734_v40 }
 0x660   : > { %4896 = shalt.err (!%p4893_p12)
}
 0x661   : > { %s4897_s17 = scalar_lea.hbm %s6237_s11, 256  ;;  %s4901_s15 = scalar_lea.hbm %s6290_s9, 512 }
 0x662   : > { %p4898_p8 = scmp.ne.s32.totalorder %s6237_s11, %s4897_s17  ;;  %p4902_p4 = scmp.lt.u32.totalorder %s6237_s11, %s6290_s9 }
 0x663   : > { %p4903_p6 = scmp.lt.u32.totalorder %s4901_s15, %s4897_s17  ;;  %p4905_p1 = scmp.lt.u32.totalorder %s4897_s17, %s6237_s11 }
 0x664   : > { %p4899_p0 = pnand %p4898_p8, %p6369_p11 }
 0x665   : > { %p4904_p13 = por %p4903_p6, %p4902_p4 }
 0x666   : > { %p4900_p2 = pneg %p4899_p0 }
 0x667   : > { %p4906_p10 = por %p4905_p1, %p4904_p13 }
 0x669   : > { %p4907_p5 = pnand %p4906_p10, %p4900_p2 }
 0x66b   : > { %4910 = shalt.err (!%p4907_p5)
}
 0x66c   : > { %4472 = dma.vmem_to_hbm [thread:$0]  (%p6369_p11), %s6239_s24, 256, %s6237_s11, %s3738_s13  }
 0x66d PF: > { %s3764_s23 = sand.u32 1, %s4941_s30   ;;  %p6370_p7 = scmp.ne.s32.totalorder %s6302_s21, 0 }
 0x66e   : > { %p6371_p9 = scmp.ge.s32.totalorder %s4953_s12, 2  ;;  %s3765_s27 = scalar_lea.sflag [#allocation5], %s3764_s23 }
 0x670   : > { %p4482_p3 = pnand %p6371_p9, %p6370_p7 }
 0x672   : > { %4936 = dma.done.wait (!%p4482_p3), %s3765_s27, 256  }
 0x673   : > { %4938 = vsyncadd (!%p4482_p3), %s3765_s27, 4294967040  ;;  %s6372_s12 = sld [smem:[#allocation13_spill]]  ;;  %s6373_s26 = sld [smem:[#allocation12_spill]] }
 0x674   : > { %s6374_s11 = sld [smem:[#allocation14_spill]]  ;;  %s6375_s30 = smov %s4945_s10 }
 0x679   : > { %p25_p12 = scmp.ge.s32.totalorder %s6372_s12, 4   ;;  %s6376_s10 = smov %s6373_s26 }
 0x67b   :  { %27 = sbr.rel (!%p25_p12) target bundleno = 9 (0x9), region = 135 }
 0x682   :  { %3770 = vsyncpa [#allocation4], 1 }
 0x683   :  { %3772 = vsyncpa [#allocation4 + $0x1], 1 }
 0x684   :  { %3773 = vsyncpa [#allocation7], 1 }
 0x685   :  { %3775 = vsyncpa [#allocation7 + $0x1], 1 }
 0x686   :  { %3776 = vsyncpa [#allocation5], 1 }
 0x687   :  { %3778 = vsyncpa [#allocation5 + $0x1], 1 }

</bundles_post_ra>
